<compile_context>
chip_gen: v7x
topology: tpu7x:2x2x1
jax: 0.10.0
libtpu: 0.0.40
codegen_flags: <defaults>
</compile_context>

<pallas_src>
import jax
import jax.numpy as jnp
from jax.experimental import pallas as pl
from jax.experimental.pallas import tpu as pltpu


def _unet_up_kernel(x1c_ref, x1t_ref, x1b_ref, x2c_ref, x2t_ref, x2b_ref,
                    wup_ref, bup_ref, w1a_ref, w1b_ref, b1_ref, w2_ref, b2_ref,
                    o_ref,
                    x1p_ref, x2p_ref, up_ref, mid_ref):
    """One (batch, row-tile) step of the fused unetUp forward.

    Row/col conventions (r0 = t*TH is the first output row of this tile):
      x1p_ref : (th+4, w+2, C1)   half-res x1 rows [t*th-2, t*th+th+2), 1 zero col halo
      up_ref  : (TH+4, W+2, Cup)  in1_up rows [r0-2, r0+TH+2), 1 zero col halo
      x2p_ref : (TH+4, W+2, C2)   skip rows  [r0-2, r0+TH+2), 1 zero col halo
      mid_ref : (TH+2, W+2, Cm)   conv1 rows [r0-1, r0+TH+1), 1 zero col halo
    Rows that fall outside the image are zero (they implement the convs' zero pad).
    """
    f32 = jnp.float32
    th, w, C1 = x1c_ref.shape[1], x1c_ref.shape[2], x1c_ref.shape[3]
    TH, W, C2 = x2c_ref.shape[1], x2c_ref.shape[2], x2c_ref.shape[3]
    Cup, Cmid, Cout = wup_ref.shape[3], w1a_ref.shape[3], w2_ref.shape[3]
    A1, A2 = TH + 4, TH + 2

    t, nt = pl.program_id(1), pl.num_programs(1)
    keep_top = (t > 0).astype(f32)        # top halo rows are real image rows?
    keep_bot = (t < nt - 1).astype(f32)   # bottom halo rows are real image rows?

    # ---- 1. half-resolution x1 band (for the `up` path) -------------------
    x1p_ref[:, 0:1, :] = jnp.zeros((th + 4, 1, C1), f32)
    x1p_ref[:, w + 1:w + 2, :] = jnp.zeros((th + 4, 1, C1), f32)
    x1p_ref[0:2, 1:w + 1, :] = x1t_ref[0] * keep_top
    x1p_ref[2:th + 2, 1:w + 1, :] = x1c_ref[0]
    x1p_ref[th + 2:th + 4, 1:w + 1, :] = x1b_ref[0] * keep_bot

    # ---- 2. nearest-neighbour 2x upsample (rows then cols) ----------------
    up2 = jnp.repeat(jnp.repeat(x1p_ref[...], 2, axis=0), 2, axis=1)  # (TH+8, W+4, C1)

    # ---- 3. up-conv: 3x3 conv + bias (no activation) on rows [r0-2,r0+TH+2)
    acc = jnp.zeros((A1 * W, Cup), f32)
    for kh in range(3):
        for kw in range(3):
            patch = up2[1 + kh:1 + kh + A1, 1 + kw:1 + kw + W, :]
            acc = acc + jnp.dot(patch.reshape(A1 * W, C1), wup_ref[kh, kw],
                                preferred_element_type=f32)
    in1_up = (acc + bup_ref[0]).reshape(A1, W, Cup)

    up_ref[:, 0:1, :] = jnp.zeros((A1, 1, Cup), f32)
    up_ref[:, W + 1:W + 2, :] = jnp.zeros((A1, 1, Cup), f32)
    up_ref[0:2, 1:W + 1, :] = in1_up[0:2] * keep_top
    up_ref[2:A1 - 2, 1:W + 1, :] = in1_up[2:A1 - 2]
    up_ref[A1 - 2:A1, 1:W + 1, :] = in1_up[A1 - 2:A1] * keep_bot

    # ---- 4. skip-connection (inputs2) band, same window/padding convention -
    x2p_ref[:, 0:1, :] = jnp.zeros((A1, 1, C2), f32)
    x2p_ref[:, W + 1:W + 2, :] = jnp.zeros((A1, 1, C2), f32)
    x2p_ref[0:2, 1:W + 1, :] = x2t_ref[0] * keep_top
    x2p_ref[2:TH + 2, 1:W + 1, :] = x2c_ref[0]
    x2p_ref[TH + 2:A1, 1:W + 1, :] = x2b_ref[0] * keep_bot

    # ---- 5. unetConv conv1 over channel-concat([in1_up, x2]) + bias + ReLU -
    #         (split-K: the concat is never materialized)
    acc1 = jnp.zeros((A2 * W, Cmid), f32)
    for kh in range(3):
        for kw in range(3):
            pa = up_ref[kh:kh + A2, kw:kw + W, :].reshape(A2 * W, Cup)
            pb = x2p_ref[kh:kh + A2, kw:kw + W, :].reshape(A2 * W, C2)
            acc1 = acc1 + jnp.dot(pa, w1a_ref[kh, kw], preferred_element_type=f32)
            acc1 = acc1 + jnp.dot(pb, w1b_ref[kh, kw], preferred_element_type=f32)
    mid = jnp.maximum(acc1 + b1_ref[0], 0.0).reshape(A2, W, Cmid)

    mid_ref[:, 0:1, :] = jnp.zeros((A2, 1, Cmid), f32)
    mid_ref[:, W + 1:W + 2, :] = jnp.zeros((A2, 1, Cmid), f32)
    mid_ref[0:1, 1:W + 1, :] = mid[0:1] * keep_top
    mid_ref[1:A2 - 1, 1:W + 1, :] = mid[1:A2 - 1]
    mid_ref[A2 - 1:A2, 1:W + 1, :] = mid[A2 - 1:A2] * keep_bot

    # ---- 6. unetConv conv2 + bias + ReLU -> output rows [r0, r0+TH) --------
    acc2 = jnp.zeros((TH * W, Cout), f32)
    for kh in range(3):
        for kw in range(3):
            p = mid_ref[kh:kh + TH, kw:kw + W, :].reshape(TH * W, Cmid)
            acc2 = acc2 + jnp.dot(p, w2_ref[kh, kw], preferred_element_type=f32)
    out = jnp.maximum(acc2 + b2_ref[0], 0.0)
    o_ref[0] = out.reshape(TH, W, Cout).astype(o_ref.dtype)


def _pick_row_tile(H, max_rows=64):
    """Largest multiple of 4 that divides H and is <= max_rows; else whole H."""
    best = None
    c = 4
    while c <= min(H, max_rows):
        if H % c == 0:
            best = c
        c += 4
    return best if best is not None else H


def unet_up_forward(inputs1_nchw, inputs2_nchw, params, *, row_tile=None):
    """Forward pass of unetUp (nearest upsample, zero pad, ReLU, drop=0.0).

    inputs1_nchw: (N, 2*F, H/2, W/2) low-resolution features.
    inputs2_nchw: (N, F, H2, W2) skip connection (center-cropped to (H, W)).
    Returns (N, F, H, W).
    """
    x1 = jnp.transpose(inputs1_nchw, (0, 2, 3, 1))  # NCHW -> NHWC
    x2 = jnp.transpose(inputs2_nchw, (0, 2, 3, 1))
    N, h, w, C1 = x1.shape
    H, W = 2 * h, 2 * w
    if h < 2:
        raise ValueError("need at least 2 rows in the low-resolution input")

    # center-crop the skip connection if it is larger than the upsampled map
    _, H2, W2, C2 = x2.shape
    if (H2, W2) != (H, W):
        d2, d3 = (H2 - H) // 2, (W2 - W) // 2
        x2 = x2[:, d2:d2 + H, d3:d3 + W, :]

    w_up, b_up = params["w_up"], params["b_up"]
    w1, b1 = params["w1"], params["b1"]
    w2, b2 = params["w2"], params["b2"]
    Cup, Cmid, Cout = w_up.shape[-1], w1.shape[-1], w2.shape[-1]
    # conv1 sees cat([in1_up, inputs2_]) along channels: split its weight instead.
    w1a = w1[:, :, :Cup, :]
    w1b = w1[:, :, Cup:, :]

    # ---- row tiling --------------------------------------------------------
    TH = _pick_row_tile(H) if row_tile is None else row_tile
    if H % TH != 0:
        raise ValueError(f"row_tile {TH} must divide H={H}")
    if H // TH > 1 and TH % 4 != 0:
        raise ValueError("row_tile must be a multiple of 4 when tiling rows")
    th = TH // 2
    num_tiles = H // TH

    # ---- BlockSpecs: non-overlapping center blocks + clamped 2-row halo blocks
    x1_c = pl.BlockSpec((1, th, w, C1), lambda n, t: (n, t, 0, 0))
    x1_t = pl.BlockSpec((1, 2, w, C1),
                        lambda n, t: (n, jnp.maximum(t * (th // 2) - 1, 0), 0, 0))
    x1_b = pl.BlockSpec((1, 2, w, C1),
                        lambda n, t: (n, jnp.minimum((t + 1) * (th // 2), h // 2 - 1), 0, 0))
    x2_c = pl.BlockSpec((1, TH, W, C2), lambda n, t: (n, t, 0, 0))
    x2_t = pl.BlockSpec((1, 2, W, C2),
                        lambda n, t: (n, jnp.maximum(t * (TH // 2) - 1, 0), 0, 0))
    x2_b = pl.BlockSpec((1, 2, W, C2),
                        lambda n, t: (n, jnp.minimum((t + 1) * (TH // 2), H // 2 - 1), 0, 0))

    w4 = lambda a: pl.BlockSpec(a.shape, lambda n, t: (0, 0, 0, 0))
    b2d = lambda c: pl.BlockSpec((1, c), lambda n, t: (0, 0))

    # ---- VMEM budget / cost hints -----------------------------------------
    blk_elems = (th * w * C1 + 4 * w * C1 + TH * W * C2 + 4 * W * C2 + TH * W * Cout)
    scratch_elems = ((th + 4) * (w + 2) * C1 + (TH + 4) * (W + 2) * (C2 + Cup)
                     + (TH + 2) * (W + 2) * Cmid)
    weight_elems = int(w_up.size + b_up.size + w1.size + b1.size + w2.size + b2.size)
    vmem_limit = int(min(64 * 2**20,
                         max(16 * 2**20, 4 * 4 * (blk_elems + scratch_elems + weight_elems))))
    flops = 2 * 9 * N * H * W * (C1 * Cup + (Cup + C2) * Cmid + Cmid * Cout)
    bytes_accessed = 4 * int(x1.size + x2.size + weight_elems + N * H * W * Cout)
    cost = pl.CostEstimate(flops=flops, transcendentals=0, bytes_accessed=bytes_accessed)

    out = pl.pallas_call(
        _unet_up_kernel,
        out_shape=jax.ShapeDtypeStruct((N, H, W, Cout), x1.dtype),
        grid_spec=pltpu.PrefetchScalarGridSpec(
            num_scalar_prefetch=0,
            grid=(N, num_tiles),
            in_specs=[x1_c, x1_t, x1_b, x2_c, x2_t, x2_b,
                      w4(w_up), b2d(Cup), w4(w1a), w4(w1b), b2d(Cmid),
                      w4(w2), b2d(Cout)],
            out_specs=pl.BlockSpec((1, TH, W, Cout), lambda n, t: (n, t, 0, 0)),
            scratch_shapes=[
                pltpu.VMEM((th + 4, w + 2, C1), jnp.float32),
                pltpu.VMEM((TH + 4, W + 2, C2), jnp.float32),
                pltpu.VMEM((TH + 4, W + 2, Cup), jnp.float32),
                pltpu.VMEM((TH + 2, W + 2, Cmid), jnp.float32),
            ]),
        compiler_params=pltpu.CompilerParams(
            dimension_semantics=("parallel", "parallel"),
            vmem_limit_bytes=vmem_limit),
        cost_estimate=cost,
    )(x1, x1, x1, x2, x2, x2,
      w_up, b_up.reshape(1, Cup), w1a, w1b, b1.reshape(1, Cmid),
      w2, b2.reshape(1, Cout))

    return jnp.transpose(out, (0, 3, 1, 2))  # NHWC -> NCHW


def init_params(key, out_size, dtype=jnp.float32):
    """PyTorch conv weights (OIHW) converted to HWIO. F = out_size, num_filt = 2F."""
    F = out_size
    ks = jax.random.split(key, 6)

    def conv_w(k, cin, cout):
        w_oihw = jax.random.normal(k, (cout, cin, 3, 3), dtype) * 0.1
        return jnp.transpose(w_oihw, (2, 3, 1, 0))  # OIHW -> HWIO

    return {
        "w_up": conv_w(ks[0], 2 * F, F),   # up: Upsample + 3x3 conv (2F -> F)
        "b_up": jax.random.normal(ks[1], (F,), dtype) * 0.1,
        "w1":   conv_w(ks[2], 2 * F, F),   # unetConv conv1: cat(in1_up, x2) -> F
        "b1":   jax.random.normal(ks[3], (F,), dtype) * 0.1,
        "w2":   conv_w(ks[4], F, F),       # unetConv conv2: F -> F
        "b2":   jax.random.normal(ks[5], (F,), dtype) * 0.1,
    }


def _reference_forward(inputs1_nchw, inputs2_nchw, p):
    """Pure-JAX (lax.conv) reference of the same unetUp forward."""
    def conv(x, w_hwio, b):
        y = jax.lax.conv_general_dilated(
            x, w_hwio, window_strides=(1, 1), padding="SAME",
            dimension_numbers=("NCHW", "HWIO", "NCHW"))
        return y + b[None, :, None, None]

    up = jnp.repeat(jnp.repeat(inputs1_nchw, 2, axis=2), 2, axis=3)  # nearest x2
    in1_up = conv(up, p["w_up"], p["b_up"])                          # no activation
    H, W = in1_up.shape[2], in1_up.shape[3]
    H2, W2 = inputs2_nchw.shape[2], inputs2_nchw.shape[3]
    d2, d3 = (H2 - H) // 2, (W2 - W) // 2
    x2c = inputs2_nchw[:, :, d2:d2 + H, d3:d3 + W]
    x = jnp.concatenate([in1_up, x2c], axis=1)
    x = jnp.maximum(conv(x, p["w1"], p["b1"]), 0.0)
    x = jnp.maximum(conv(x, p["w2"], p["b2"]), 0.0)
    return x


if __name__ == "__main__":
    key = jax.random.PRNGKey(0)
    k1, k2, kp = jax.random.split(key, 3)

    out_size = 16                                   # F; num_filt = 2F (same_num_filt=False)
    N = 2
    inputs1 = jax.random.normal(k1, (N, 2 * out_size, 8, 8), jnp.float32)    # low-res
    inputs2 = jax.random.normal(k2, (N, out_size, 18, 18), jnp.float32)      # skip (gets cropped)
    params = init_params(kp, out_size)

    out = unet_up_forward(inputs1, inputs2, params, row_tile=4)  # 4 row tiles of H=16
    out = jax.block_until_ready(out)

    ref = _reference_forward(inputs1, inputs2, params)
    assert out.shape == (N, out_size, 16, 16), out.shape
    err = float(jnp.max(jnp.abs(out - ref)))
    assert err < 5e-4, err

    print("KERNEL_OK")
</pallas_src>

<mosaic_0001>
module attributes {stable_mosaic.version = 11 : i64} {
  func.func @_unet_up_kernel(%arg0: i32, %arg1: i32, %arg2: memref<1x2x8x32xf32, #tpu.memory_space<vmem>>, %arg3: memref<1x2x8x32xf32, #tpu.memory_space<vmem>>, %arg4: memref<1x2x8x32xf32, #tpu.memory_space<vmem>>, %arg5: memref<1x4x16x16xf32, #tpu.memory_space<vmem>>, %arg6: memref<1x2x16x16xf32, #tpu.memory_space<vmem>>, %arg7: memref<1x2x16x16xf32, #tpu.memory_space<vmem>>, %arg8: memref<3x3x32x16xf32, #tpu.memory_space<vmem>>, %arg9: memref<1x16xf32, #tpu.memory_space<vmem>>, %arg10: memref<3x3x16x16xf32, #tpu.memory_space<vmem>>, %arg11: memref<3x3x16x16xf32, #tpu.memory_space<vmem>>, %arg12: memref<1x16xf32, #tpu.memory_space<vmem>>, %arg13: memref<3x3x16x16xf32, #tpu.memory_space<vmem>>, %arg14: memref<1x16xf32, #tpu.memory_space<vmem>>, %arg15: memref<1x4x16x16xf32, #tpu.memory_space<vmem>>, %arg16: memref<6x10x32xf32, #tpu.memory_space<vmem>>, %arg17: memref<8x18x16xf32, #tpu.memory_space<vmem>>, %arg18: memref<8x18x16xf32, #tpu.memory_space<vmem>>, %arg19: memref<6x18x16xf32, #tpu.memory_space<vmem>>) attributes {dimension_semantics = [#tpu.dimension_semantics<parallel>, #tpu.dimension_semantics<parallel>], iteration_bounds = array<i64: 2, 4>, scalar_prefetch = 0 : i64, scratch_operands = 4 : i64, tpu.core_type = #tpu.core_type<tc>, window_params = [{transform_indices = @transform_0, window_bounds = array<i64: 1, 2, 8, 32>}, {transform_indices = @transform_1, window_bounds = array<i64: 1, 2, 8, 32>}, {transform_indices = @transform_2, window_bounds = array<i64: 1, 2, 8, 32>}, {transform_indices = @transform_3, window_bounds = array<i64: 1, 4, 16, 16>}, {transform_indices = @transform_4, window_bounds = array<i64: 1, 2, 16, 16>}, {transform_indices = @transform_5, window_bounds = array<i64: 1, 2, 16, 16>}, {pipeline_mode = #tpu.pipeline_mode<synchronous>, transform_indices = @transform_6, window_bounds = array<i64: 3, 3, 32, 16>}, {pipeline_mode = #tpu.pipeline_mode<synchronous>, transform_indices = @transform_7, window_bounds = array<i64: 1, 16>}, {pipeline_mode = #tpu.pipeline_mode<synchronous>, transform_indices = @transform_8, window_bounds = array<i64: 3, 3, 16, 16>}, {pipeline_mode = #tpu.pipeline_mode<synchronous>, transform_indices = @transform_9, window_bounds = array<i64: 3, 3, 16, 16>}, {pipeline_mode = #tpu.pipeline_mode<synchronous>, transform_indices = @transform_10, window_bounds = array<i64: 1, 16>}, {pipeline_mode = #tpu.pipeline_mode<synchronous>, transform_indices = @transform_11, window_bounds = array<i64: 3, 3, 16, 16>}, {pipeline_mode = #tpu.pipeline_mode<synchronous>, transform_indices = @transform_12, window_bounds = array<i64: 1, 16>}, {transform_indices = @transform_13, window_bounds = array<i64: 1, 4, 16, 16>}]} {
    %c0_i32 = arith.constant 0 : i32
    %0 = arith.cmpi sgt, %arg1, %c0_i32 : i32
    %1 = arith.extui %0 : i1 to i32
    %2 = arith.sitofp %1 : i32 to f32
    %c3_i32 = arith.constant 3 : i32
    %3 = arith.cmpi slt, %arg1, %c3_i32 : i32
    %4 = arith.extui %3 : i1 to i32
    %5 = arith.sitofp %4 : i32 to f32
    %cst = arith.constant 0.000000e+00 : f32
    %6 = vector.broadcast %cst : f32 to vector<6x1x32xf32>
    %c0 = arith.constant 0 : index
    %c0_0 = arith.constant 0 : index
    %c0_1 = arith.constant 0 : index
    %7 = vector.load %arg16[%c0, %c0_0, %c0_1] : memref<6x10x32xf32, #tpu.memory_space<vmem>>, vector<6x1x32xf32>
    tpu.vector_store %arg16[%c0, %c0_0, %c0_1], %6 {strides = array<i32>} : memref<6x10x32xf32, #tpu.memory_space<vmem>>, vector<6x1x32xf32>,
    %cst_2 = arith.constant 0.000000e+00 : f32
    %8 = vector.broadcast %cst_2 : f32 to vector<6x1x32xf32>
    %c0_3 = arith.constant 0 : index
    %c9 = arith.constant 9 : index
    %c0_4 = arith.constant 0 : index
    %9 = vector.load %arg16[%c0_3, %c9, %c0_4] : memref<6x10x32xf32, #tpu.memory_space<vmem>>, vector<6x1x32xf32>
    tpu.vector_store %arg16[%c0_3, %c9, %c0_4], %8 {strides = array<i32>} : memref<6x10x32xf32, #tpu.memory_space<vmem>>, vector<6x1x32xf32>,
    %c0_5 = arith.constant 0 : index
    %c0_6 = arith.constant 0 : index
    %c0_7 = arith.constant 0 : index
    %c0_8 = arith.constant 0 : index
    %10 = vector.load %arg3[%c0_5, %c0_6, %c0_7, %c0_8] : memref<1x2x8x32xf32, #tpu.memory_space<vmem>>, vector<1x2x8x32xf32>
    %11 = vector.shape_cast %10 : vector<1x2x8x32xf32> to vector<2x8x32xf32>
    %12 = vector.broadcast %2 : f32 to vector<2x8x32xf32>
    %13 = arith.mulf %11, %12 : vector<2x8x32xf32>
    %c0_9 = arith.constant 0 : index
    %c1 = arith.constant 1 : index
    %c0_10 = arith.constant 0 : index
    %14 = vector.load %arg16[%c0_9, %c1, %c0_10] : memref<6x10x32xf32, #tpu.memory_space<vmem>>, vector<2x8x32xf32>
    tpu.vector_store %arg16[%c0_9, %c1, %c0_10], %13 {strides = array<i32>} : memref<6x10x32xf32, #tpu.memory_space<vmem>>, vector<2x8x32xf32>,
    %c0_11 = arith.constant 0 : index
    %c0_12 = arith.constant 0 : index
    %c0_13 = arith.constant 0 : index
    %c0_14 = arith.constant 0 : index
    %15 = vector.load %arg2[%c0_11, %c0_12, %c0_13, %c0_14] : memref<1x2x8x32xf32, #tpu.memory_space<vmem>>, vector<1x2x8x32xf32>
    %16 = vector.shape_cast %15 : vector<1x2x8x32xf32> to vector<2x8x32xf32>
    %c2 = arith.constant 2 : index
    %c1_15 = arith.constant 1 : index
    %c0_16 = arith.constant 0 : index
    %17 = vector.load %arg16[%c2, %c1_15, %c0_16] : memref<6x10x32xf32, #tpu.memory_space<vmem>>, vector<2x8x32xf32>
    tpu.vector_store %arg16[%c2, %c1_15, %c0_16], %16 {strides = array<i32>} : memref<6x10x32xf32, #tpu.memory_space<vmem>>, vector<2x8x32xf32>,
    %c0_17 = arith.constant 0 : index
    %c0_18 = arith.constant 0 : index
    %c0_19 = arith.constant 0 : index
    %c0_20 = arith.constant 0 : index
    %18 = vector.load %arg4[%c0_17, %c0_18, %c0_19, %c0_20] : memref<1x2x8x32xf32, #tpu.memory_space<vmem>>, vector<1x2x8x32xf32>
    %19 = vector.shape_cast %18 : vector<1x2x8x32xf32> to vector<2x8x32xf32>
    %20 = vector.broadcast %5 : f32 to vector<2x8x32xf32>
    %21 = arith.mulf %19, %20 : vector<2x8x32xf32>
    %c4 = arith.constant 4 : index
    %c1_21 = arith.constant 1 : index
    %c0_22 = arith.constant 0 : index
    %22 = vector.load %arg16[%c4, %c1_21, %c0_22] : memref<6x10x32xf32, #tpu.memory_space<vmem>>, vector<2x8x32xf32>
    tpu.vector_store %arg16[%c4, %c1_21, %c0_22], %21 {strides = array<i32>} : memref<6x10x32xf32, #tpu.memory_space<vmem>>, vector<2x8x32xf32>,
    %c0_23 = arith.constant 0 : index
    %c0_24 = arith.constant 0 : index
    %c0_25 = arith.constant 0 : index
    %23 = vector.load %arg16[%c0_23, %c0_24, %c0_25] : memref<6x10x32xf32, #tpu.memory_space<vmem>>, vector<6x10x32xf32>
    %24 = vector.shape_cast %23 : vector<6x10x32xf32> to vector<6x1x10x32xf32>
    %25 = vector.broadcast %24 : vector<6x1x10x32xf32> to vector<6x2x10x32xf32>
    %26 = vector.shape_cast %25 : vector<6x2x10x32xf32> to vector<12x10x32xf32>
    %27 = vector.shape_cast %26 : vector<12x10x32xf32> to vector<12x10x1x32xf32>
    %28 = vector.broadcast %27 : vector<12x10x1x32xf32> to vector<12x10x2x32xf32>
    %29 = vector.shape_cast %28 : vector<12x10x2x32xf32> to vector<12x20x32xf32>
    %cst_26 = arith.constant 0.000000e+00 : f32
    %30 = vector.broadcast %cst_26 : f32 to vector<128x16xf32>
    %31 = vector.extract_strided_slice %29 {offsets = [1, 1, 0], sizes = [8, 16, 32], strides = [1, 1, 1]} : vector<12x20x32xf32> to vector<8x16x32xf32>
    %32 = vector.shape_cast %31 : vector<8x16x32xf32> to vector<128x32xf32>
    %c0_27 = arith.constant 0 : index
    %c0_28 = arith.constant 0 : index
    %c0_29 = arith.constant 0 : index
    %c0_30 = arith.constant 0 : index
    %33 = vector.load %arg8[%c0_27, %c0_28, %c0_29, %c0_30] : memref<3x3x32x16xf32, #tpu.memory_space<vmem>>, vector<1x1x32x16xf32>
    %34 = vector.shape_cast %33 : vector<1x1x32x16xf32> to vector<32x16xf32>
    %cst_31 = arith.constant dense<0.000000e+00> : vector<128x16xf32>
    %35 = tpu.matmul %32, %34, %cst_31 {dimension_numbers = #tpu.dot_dimension_numbers<[1], [0], [0], [1], [0, 0, 1, 1], [], []>} : vector<128x32xf32>, vector<32x16xf32>, vector<128x16xf32> -> vector<128x16xf32>
    %36 = arith.addf %30, %35 : vector<128x16xf32>
    %37 = vector.extract_strided_slice %29 {offsets = [1, 2, 0], sizes = [8, 16, 32], strides = [1, 1, 1]} : vector<12x20x32xf32> to vector<8x16x32xf32>
    %38 = vector.shape_cast %37 : vector<8x16x32xf32> to vector<128x32xf32>
    %c0_32 = arith.constant 0 : index
    %c1_33 = arith.constant 1 : index
    %c0_34 = arith.constant 0 : index
    %c0_35 = arith.constant 0 : index
    %39 = vector.load %arg8[%c0_32, %c1_33, %c0_34, %c0_35] : memref<3x3x32x16xf32, #tpu.memory_space<vmem>>, vector<1x1x32x16xf32>
    %40 = vector.shape_cast %39 : vector<1x1x32x16xf32> to vector<32x16xf32>
    %cst_36 = arith.constant dense<0.000000e+00> : vector<128x16xf32>
    %41 = tpu.matmul %38, %40, %cst_36 {dimension_numbers = #tpu.dot_dimension_numbers<[1], [0], [0], [1], [0, 0, 1, 1], [], []>} : vector<128x32xf32>, vector<32x16xf32>, vector<128x16xf32> -> vector<128x16xf32>
    %42 = arith.addf %36, %41 : vector<128x16xf32>
    %43 = vector.extract_strided_slice %29 {offsets = [1, 3, 0], sizes = [8, 16, 32], strides = [1, 1, 1]} : vector<12x20x32xf32> to vector<8x16x32xf32>
    %44 = vector.shape_cast %43 : vector<8x16x32xf32> to vector<128x32xf32>
    %c0_37 = arith.constant 0 : index
    %c2_38 = arith.constant 2 : index
    %c0_39 = arith.constant 0 : index
    %c0_40 = arith.constant 0 : index
    %45 = vector.load %arg8[%c0_37, %c2_38, %c0_39, %c0_40] : memref<3x3x32x16xf32, #tpu.memory_space<vmem>>, vector<1x1x32x16xf32>
    %46 = vector.shape_cast %45 : vector<1x1x32x16xf32> to vector<32x16xf32>
    %cst_41 = arith.constant dense<0.000000e+00> : vector<128x16xf32>
    %47 = tpu.matmul %44, %46, %cst_41 {dimension_numbers = #tpu.dot_dimension_numbers<[1], [0], [0], [1], [0, 0, 1, 1], [], []>} : vector<128x32xf32>, vector<32x16xf32>, vector<128x16xf32> -> vector<128x16xf32>
    %48 = arith.addf %42, %47 : vector<128x16xf32>
    %49 = vector.extract_strided_slice %29 {offsets = [2, 1, 0], sizes = [8, 16, 32], strides = [1, 1, 1]} : vector<12x20x32xf32> to vector<8x16x32xf32>
    %50 = vector.shape_cast %49 : vector<8x16x32xf32> to vector<128x32xf32>
    %c1_42 = arith.constant 1 : index
    %c0_43 = arith.constant 0 : index
    %c0_44 = arith.constant 0 : index
    %c0_45 = arith.constant 0 : index
    %51 = vector.load %arg8[%c1_42, %c0_43, %c0_44, %c0_45] : memref<3x3x32x16xf32, #tpu.memory_space<vmem>>, vector<1x1x32x16xf32>
    %52 = vector.shape_cast %51 : vector<1x1x32x16xf32> to vector<32x16xf32>
    %cst_46 = arith.constant dense<0.000000e+00> : vector<128x16xf32>
    %53 = tpu.matmul %50, %52, %cst_46 {dimension_numbers = #tpu.dot_dimension_numbers<[1], [0], [0], [1], [0, 0, 1, 1], [], []>} : vector<128x32xf32>, vector<32x16xf32>, vector<128x16xf32> -> vector<128x16xf32>
    %54 = arith.addf %48, %53 : vector<128x16xf32>
    %55 = vector.extract_strided_slice %29 {offsets = [2, 2, 0], sizes = [8, 16, 32], strides = [1, 1, 1]} : vector<12x20x32xf32> to vector<8x16x32xf32>
    %56 = vector.shape_cast %55 : vector<8x16x32xf32> to vector<128x32xf32>
    %c1_47 = arith.constant 1 : index
    %c1_48 = arith.constant 1 : index
    %c0_49 = arith.constant 0 : index
    %c0_50 = arith.constant 0 : index
    %57 = vector.load %arg8[%c1_47, %c1_48, %c0_49, %c0_50] : memref<3x3x32x16xf32, #tpu.memory_space<vmem>>, vector<1x1x32x16xf32>
    %58 = vector.shape_cast %57 : vector<1x1x32x16xf32> to vector<32x16xf32>
    %cst_51 = arith.constant dense<0.000000e+00> : vector<128x16xf32>
    %59 = tpu.matmul %56, %58, %cst_51 {dimension_numbers = #tpu.dot_dimension_numbers<[1], [0], [0], [1], [0, 0, 1, 1], [], []>} : vector<128x32xf32>, vector<32x16xf32>, vector<128x16xf32> -> vector<128x16xf32>
    %60 = arith.addf %54, %59 : vector<128x16xf32>
    %61 = vector.extract_strided_slice %29 {offsets = [2, 3, 0], sizes = [8, 16, 32], strides = [1, 1, 1]} : vector<12x20x32xf32> to vector<8x16x32xf32>
    %62 = vector.shape_cast %61 : vector<8x16x32xf32> to vector<128x32xf32>
    %c1_52 = arith.constant 1 : index
    %c2_53 = arith.constant 2 : index
    %c0_54 = arith.constant 0 : index
    %c0_55 = arith.constant 0 : index
    %63 = vector.load %arg8[%c1_52, %c2_53, %c0_54, %c0_55] : memref<3x3x32x16xf32, #tpu.memory_space<vmem>>, vector<1x1x32x16xf32>
    %64 = vector.shape_cast %63 : vector<1x1x32x16xf32> to vector<32x16xf32>
    %cst_56 = arith.constant dense<0.000000e+00> : vector<128x16xf32>
    %65 = tpu.matmul %62, %64, %cst_56 {dimension_numbers = #tpu.dot_dimension_numbers<[1], [0], [0], [1], [0, 0, 1, 1], [], []>} : vector<128x32xf32>, vector<32x16xf32>, vector<128x16xf32> -> vector<128x16xf32>
    %66 = arith.addf %60, %65 : vector<128x16xf32>
    %67 = vector.extract_strided_slice %29 {offsets = [3, 1, 0], sizes = [8, 16, 32], strides = [1, 1, 1]} : vector<12x20x32xf32> to vector<8x16x32xf32>
    %68 = vector.shape_cast %67 : vector<8x16x32xf32> to vector<128x32xf32>
    %c2_57 = arith.constant 2 : index
    %c0_58 = arith.constant 0 : index
    %c0_59 = arith.constant 0 : index
    %c0_60 = arith.constant 0 : index
    %69 = vector.load %arg8[%c2_57, %c0_58, %c0_59, %c0_60] : memref<3x3x32x16xf32, #tpu.memory_space<vmem>>, vector<1x1x32x16xf32>
    %70 = vector.shape_cast %69 : vector<1x1x32x16xf32> to vector<32x16xf32>
    %cst_61 = arith.constant dense<0.000000e+00> : vector<128x16xf32>
    %71 = tpu.matmul %68, %70, %cst_61 {dimension_numbers = #tpu.dot_dimension_numbers<[1], [0], [0], [1], [0, 0, 1, 1], [], []>} : vector<128x32xf32>, vector<32x16xf32>, vector<128x16xf32> -> vector<128x16xf32>
    %72 = arith.addf %66, %71 : vector<128x16xf32>
    %73 = vector.extract_strided_slice %29 {offsets = [3, 2, 0], sizes = [8, 16, 32], strides = [1, 1, 1]} : vector<12x20x32xf32> to vector<8x16x32xf32>
    %74 = vector.shape_cast %73 : vector<8x16x32xf32> to vector<128x32xf32>
    %c2_62 = arith.constant 2 : index
    %c1_63 = arith.constant 1 : index
    %c0_64 = arith.constant 0 : index
    %c0_65 = arith.constant 0 : index
    %75 = vector.load %arg8[%c2_62, %c1_63, %c0_64, %c0_65] : memref<3x3x32x16xf32, #tpu.memory_space<vmem>>, vector<1x1x32x16xf32>
    %76 = vector.shape_cast %75 : vector<1x1x32x16xf32> to vector<32x16xf32>
    %cst_66 = arith.constant dense<0.000000e+00> : vector<128x16xf32>
    %77 = tpu.matmul %74, %76, %cst_66 {dimension_numbers = #tpu.dot_dimension_numbers<[1], [0], [0], [1], [0, 0, 1, 1], [], []>} : vector<128x32xf32>, vector<32x16xf32>, vector<128x16xf32> -> vector<128x16xf32>
    %78 = arith.addf %72, %77 : vector<128x16xf32>
    %79 = vector.extract_strided_slice %29 {offsets = [3, 3, 0], sizes = [8, 16, 32], strides = [1, 1, 1]} : vector<12x20x32xf32> to vector<8x16x32xf32>
    %80 = vector.shape_cast %79 : vector<8x16x32xf32> to vector<128x32xf32>
    %c2_67 = arith.constant 2 : index
    %c2_68 = arith.constant 2 : index
    %c0_69 = arith.constant 0 : index
    %c0_70 = arith.constant 0 : index
    %81 = vector.load %arg8[%c2_67, %c2_68, %c0_69, %c0_70] : memref<3x3x32x16xf32, #tpu.memory_space<vmem>>, vector<1x1x32x16xf32>
    %82 = vector.shape_cast %81 : vector<1x1x32x16xf32> to vector<32x16xf32>
    %cst_71 = arith.constant dense<0.000000e+00> : vector<128x16xf32>
    %83 = tpu.matmul %80, %82, %cst_71 {dimension_numbers = #tpu.dot_dimension_numbers<[1], [0], [0], [1], [0, 0, 1, 1], [], []>} : vector<128x32xf32>, vector<32x16xf32>, vector<128x16xf32> -> vector<128x16xf32>
    %84 = arith.addf %78, %83 : vector<128x16xf32>
    %c0_72 = arith.constant 0 : index
    %c0_73 = arith.constant 0 : index
    %85 = vector.load %arg9[%c0_72, %c0_73] : memref<1x16xf32, #tpu.memory_space<vmem>>, vector<1x16xf32>
    %86 = vector.shape_cast %85 : vector<1x16xf32> to vector<16xf32>
    %87 = vector.shape_cast %86 : vector<16xf32> to vector<1x16xf32>
    %88 = vector.broadcast %87 : vector<1x16xf32> to vector<128x16xf32>
    %89 = arith.addf %84, %88 : vector<128x16xf32>
    %90 = vector.shape_cast %89 : vector<128x16xf32> to vector<8x16x16xf32>
    %cst_74 = arith.constant 0.000000e+00 : f32
    %91 = vector.broadcast %cst_74 : f32 to vector<8x1x16xf32>
    %c0_75 = arith.constant 0 : index
    %c0_76 = arith.constant 0 : index
    %c0_77 = arith.constant 0 : index
    %92 = vector.load %arg18[%c0_75, %c0_76, %c0_77] : memref<8x18x16xf32, #tpu.memory_space<vmem>>, vector<8x1x16xf32>
    tpu.vector_store %arg18[%c0_75, %c0_76, %c0_77], %91 {strides = array<i32>} : memref<8x18x16xf32, #tpu.memory_space<vmem>>, vector<8x1x16xf32>,
    %cst_78 = arith.constant 0.000000e+00 : f32
    %93 = vector.broadcast %cst_78 : f32 to vector<8x1x16xf32>
    %c0_79 = arith.constant 0 : index
    %c17 = arith.constant 17 : index
    %c0_80 = arith.constant 0 : index
    %94 = vector.load %arg18[%c0_79, %c17, %c0_80] : memref<8x18x16xf32, #tpu.memory_space<vmem>>, vector<8x1x16xf32>
    tpu.vector_store %arg18[%c0_79, %c17, %c0_80], %93 {strides = array<i32>} : memref<8x18x16xf32, #tpu.memory_space<vmem>>, vector<8x1x16xf32>,
    %95 = vector.extract_strided_slice %90 {offsets = [0, 0, 0], sizes = [2, 16, 16], strides = [1, 1, 1]} : vector<8x16x16xf32> to vector<2x16x16xf32>
    %96 = vector.broadcast %2 : f32 to vector<2x16x16xf32>
    %97 = arith.mulf %95, %96 : vector<2x16x16xf32>
    %c0_81 = arith.constant 0 : index
    %c1_82 = arith.constant 1 : index
    %c0_83 = arith.constant 0 : index
    %98 = vector.load %arg18[%c0_81, %c1_82, %c0_83] : memref<8x18x16xf32, #tpu.memory_space<vmem>>, vector<2x16x16xf32>
    tpu.vector_store %arg18[%c0_81, %c1_82, %c0_83], %97 {strides = array<i32>} : memref<8x18x16xf32, #tpu.memory_space<vmem>>, vector<2x16x16xf32>,
    %99 = vector.extract_strided_slice %90 {offsets = [2, 0, 0], sizes = [4, 16, 16], strides = [1, 1, 1]} : vector<8x16x16xf32> to vector<4x16x16xf32>
    %c2_84 = arith.constant 2 : index
    %c1_85 = arith.constant 1 : index
    %c0_86 = arith.constant 0 : index
    %100 = vector.load %arg18[%c2_84, %c1_85, %c0_86] : memref<8x18x16xf32, #tpu.memory_space<vmem>>, vector<4x16x16xf32>
    tpu.vector_store %arg18[%c2_84, %c1_85, %c0_86], %99 {strides = array<i32>} : memref<8x18x16xf32, #tpu.memory_space<vmem>>, vector<4x16x16xf32>,
    %101 = vector.extract_strided_slice %90 {offsets = [6, 0, 0], sizes = [2, 16, 16], strides = [1, 1, 1]} : vector<8x16x16xf32> to vector<2x16x16xf32>
    %102 = vector.broadcast %5 : f32 to vector<2x16x16xf32>
    %103 = arith.mulf %101, %102 : vector<2x16x16xf32>
    %c6 = arith.constant 6 : index
    %c1_87 = arith.constant 1 : index
    %c0_88 = arith.constant 0 : index
    %104 = vector.load %arg18[%c6, %c1_87, %c0_88] : memref<8x18x16xf32, #tpu.memory_space<vmem>>, vector<2x16x16xf32>
    tpu.vector_store %arg18[%c6, %c1_87, %c0_88], %103 {strides = array<i32>} : memref<8x18x16xf32, #tpu.memory_space<vmem>>, vector<2x16x16xf32>,
    %cst_89 = arith.constant 0.000000e+00 : f32
    %105 = vector.broadcast %cst_89 : f32 to vector<8x1x16xf32>
    %c0_90 = arith.constant 0 : index
    %c0_91 = arith.constant 0 : index
    %c0_92 = arith.constant 0 : index
    %106 = vector.load %arg17[%c0_90, %c0_91, %c0_92] : memref<8x18x16xf32, #tpu.memory_space<vmem>>, vector<8x1x16xf32>
    tpu.vector_store %arg17[%c0_90, %c0_91, %c0_92], %105 {strides = array<i32>} : memref<8x18x16xf32, #tpu.memory_space<vmem>>, vector<8x1x16xf32>,
    %cst_93 = arith.constant 0.000000e+00 : f32
    %107 = vector.broadcast %cst_93 : f32 to vector<8x1x16xf32>
    %c0_94 = arith.constant 0 : index
    %c17_95 = arith.constant 17 : index
    %c0_96 = arith.constant 0 : index
    %108 = vector.load %arg17[%c0_94, %c17_95, %c0_96] : memref<8x18x16xf32, #tpu.memory_space<vmem>>, vector<8x1x16xf32>
    tpu.vector_store %arg17[%c0_94, %c17_95, %c0_96], %107 {strides = array<i32>} : memref<8x18x16xf32, #tpu.memory_space<vmem>>, vector<8x1x16xf32>,
    %c0_97 = arith.constant 0 : index
    %c0_98 = arith.constant 0 : index
    %c0_99 = arith.constant 0 : index
    %c0_100 = arith.constant 0 : index
    %109 = vector.load %arg6[%c0_97, %c0_98, %c0_99, %c0_100] : memref<1x2x16x16xf32, #tpu.memory_space<vmem>>, vector<1x2x16x16xf32>
    %110 = vector.shape_cast %109 : vector<1x2x16x16xf32> to vector<2x16x16xf32>
    %111 = vector.broadcast %2 : f32 to vector<2x16x16xf32>
    %112 = arith.mulf %110, %111 : vector<2x16x16xf32>
    %c0_101 = arith.constant 0 : index
    %c1_102 = arith.constant 1 : index
    %c0_103 = arith.constant 0 : index
    %113 = vector.load %arg17[%c0_101, %c1_102, %c0_103] : memref<8x18x16xf32, #tpu.memory_space<vmem>>, vector<2x16x16xf32>
    tpu.vector_store %arg17[%c0_101, %c1_102, %c0_103], %112 {strides = array<i32>} : memref<8x18x16xf32, #tpu.memory_space<vmem>>, vector<2x16x16xf32>,
    %c0_104 = arith.constant 0 : index
    %c0_105 = arith.constant 0 : index
    %c0_106 = arith.constant 0 : index
    %c0_107 = arith.constant 0 : index
    %114 = vector.load %arg5[%c0_104, %c0_105, %c0_106, %c0_107] : memref<1x4x16x16xf32, #tpu.memory_space<vmem>>, vector<1x4x16x16xf32>
    %115 = vector.shape_cast %114 : vector<1x4x16x16xf32> to vector<4x16x16xf32>
    %c2_108 = arith.constant 2 : index
    %c1_109 = arith.constant 1 : index
    %c0_110 = arith.constant 0 : index
    %116 = vector.load %arg17[%c2_108, %c1_109, %c0_110] : memref<8x18x16xf32, #tpu.memory_space<vmem>>, vector<4x16x16xf32>
    tpu.vector_store %arg17[%c2_108, %c1_109, %c0_110], %115 {strides = array<i32>} : memref<8x18x16xf32, #tpu.memory_space<vmem>>, vector<4x16x16xf32>,
    %c0_111 = arith.constant 0 : index
    %c0_112 = arith.constant 0 : index
    %c0_113 = arith.constant 0 : index
    %c0_114 = arith.constant 0 : index
    %117 = vector.load %arg7[%c0_111, %c0_112, %c0_113, %c0_114] : memref<1x2x16x16xf32, #tpu.memory_space<vmem>>, vector<1x2x16x16xf32>
    %118 = vector.shape_cast %117 : vector<1x2x16x16xf32> to vector<2x16x16xf32>
    %119 = vector.broadcast %5 : f32 to vector<2x16x16xf32>
    %120 = arith.mulf %118, %119 : vector<2x16x16xf32>
    %c6_115 = arith.constant 6 : index
    %c1_116 = arith.constant 1 : index
    %c0_117 = arith.constant 0 : index
    %121 = vector.load %arg17[%c6_115, %c1_116, %c0_117] : memref<8x18x16xf32, #tpu.memory_space<vmem>>, vector<2x16x16xf32>
    tpu.vector_store %arg17[%c6_115, %c1_116, %c0_117], %120 {strides = array<i32>} : memref<8x18x16xf32, #tpu.memory_space<vmem>>, vector<2x16x16xf32>,
    %cst_118 = arith.constant 0.000000e+00 : f32
    %122 = vector.broadcast %cst_118 : f32 to vector<96x16xf32>
    %c0_119 = arith.constant 0 : index
    %c0_120 = arith.constant 0 : index
    %c0_121 = arith.constant 0 : index
    %123 = vector.load %arg18[%c0_119, %c0_120, %c0_121] : memref<8x18x16xf32, #tpu.memory_space<vmem>>, vector<6x16x16xf32>
    %124 = vector.shape_cast %123 : vector<6x16x16xf32> to vector<96x16xf32>
    %c0_122 = arith.constant 0 : index
    %c0_123 = arith.constant 0 : index
    %c0_124 = arith.constant 0 : index
    %125 = vector.load %arg17[%c0_122, %c0_123, %c0_124] : memref<8x18x16xf32, #tpu.memory_space<vmem>>, vector<6x16x16xf32>
    %126 = vector.shape_cast %125 : vector<6x16x16xf32> to vector<96x16xf32>
    %c0_125 = arith.constant 0 : index
    %c0_126 = arith.constant 0 : index
    %c0_127 = arith.constant 0 : index
    %c0_128 = arith.constant 0 : index
    %127 = vector.load %arg10[%c0_125, %c0_126, %c0_127, %c0_128] : memref<3x3x16x16xf32, #tpu.memory_space<vmem>>, vector<1x1x16x16xf32>
    %128 = vector.shape_cast %127 : vector<1x1x16x16xf32> to vector<16x16xf32>
    %cst_129 = arith.constant dense<0.000000e+00> : vector<96x16xf32>
    %129 = tpu.matmul %124, %128, %cst_129 {dimension_numbers = #tpu.dot_dimension_numbers<[1], [0], [0], [1], [0, 0, 1, 1], [], []>} : vector<96x16xf32>, vector<16x16xf32>, vector<96x16xf32> -> vector<96x16xf32>
    %130 = arith.addf %122, %129 : vector<96x16xf32>
    %c0_130 = arith.constant 0 : index
    %c0_131 = arith.constant 0 : index
    %c0_132 = arith.constant 0 : index
    %c0_133 = arith.constant 0 : index
    %131 = vector.load %arg11[%c0_130, %c0_131, %c0_132, %c0_133] : memref<3x3x16x16xf32, #tpu.memory_space<vmem>>, vector<1x1x16x16xf32>
    %132 = vector.shape_cast %131 : vector<1x1x16x16xf32> to vector<16x16xf32>
    %cst_134 = arith.constant dense<0.000000e+00> : vector<96x16xf32>
    %133 = tpu.matmul %126, %132, %cst_134 {dimension_numbers = #tpu.dot_dimension_numbers<[1], [0], [0], [1], [0, 0, 1, 1], [], []>} : vector<96x16xf32>, vector<16x16xf32>, vector<96x16xf32> -> vector<96x16xf32>
    %134 = arith.addf %130, %133 : vector<96x16xf32>
    %c0_135 = arith.constant 0 : index
    %c1_136 = arith.constant 1 : index
    %c0_137 = arith.constant 0 : index
    %135 = vector.load %arg18[%c0_135, %c1_136, %c0_137] : memref<8x18x16xf32, #tpu.memory_space<vmem>>, vector<6x16x16xf32>
    %136 = vector.shape_cast %135 : vector<6x16x16xf32> to vector<96x16xf32>
    %c0_138 = arith.constant 0 : index
    %c1_139 = arith.constant 1 : index
    %c0_140 = arith.constant 0 : index
    %137 = vector.load %arg17[%c0_138, %c1_139, %c0_140] : memref<8x18x16xf32, #tpu.memory_space<vmem>>, vector<6x16x16xf32>
    %138 = vector.shape_cast %137 : vector<6x16x16xf32> to vector<96x16xf32>
    %c0_141 = arith.constant 0 : index
    %c1_142 = arith.constant 1 : index
    %c0_143 = arith.constant 0 : index
    %c0_144 = arith.constant 0 : index
    %139 = vector.load %arg10[%c0_141, %c1_142, %c0_143, %c0_144] : memref<3x3x16x16xf32, #tpu.memory_space<vmem>>, vector<1x1x16x16xf32>
    %140 = vector.shape_cast %139 : vector<1x1x16x16xf32> to vector<16x16xf32>
    %cst_145 = arith.constant dense<0.000000e+00> : vector<96x16xf32>
    %141 = tpu.matmul %136, %140, %cst_145 {dimension_numbers = #tpu.dot_dimension_numbers<[1], [0], [0], [1], [0, 0, 1, 1], [], []>} : vector<96x16xf32>, vector<16x16xf32>, vector<96x16xf32> -> vector<96x16xf32>
    %142 = arith.addf %134, %141 : vector<96x16xf32>
    %c0_146 = arith.constant 0 : index
    %c1_147 = arith.constant 1 : index
    %c0_148 = arith.constant 0 : index
    %c0_149 = arith.constant 0 : index
    %143 = vector.load %arg11[%c0_146, %c1_147, %c0_148, %c0_149] : memref<3x3x16x16xf32, #tpu.memory_space<vmem>>, vector<1x1x16x16xf32>
    %144 = vector.shape_cast %143 : vector<1x1x16x16xf32> to vector<16x16xf32>
    %cst_150 = arith.constant dense<0.000000e+00> : vector<96x16xf32>
    %145 = tpu.matmul %138, %144, %cst_150 {dimension_numbers = #tpu.dot_dimension_numbers<[1], [0], [0], [1], [0, 0, 1, 1], [], []>} : vector<96x16xf32>, vector<16x16xf32>, vector<96x16xf32> -> vector<96x16xf32>
    %146 = arith.addf %142, %145 : vector<96x16xf32>
    %c0_151 = arith.constant 0 : index
    %c2_152 = arith.constant 2 : index
    %c0_153 = arith.constant 0 : index
    %147 = vector.load %arg18[%c0_151, %c2_152, %c0_153] : memref<8x18x16xf32, #tpu.memory_space<vmem>>, vector<6x16x16xf32>
    %148 = vector.shape_cast %147 : vector<6x16x16xf32> to vector<96x16xf32>
    %c0_154 = arith.constant 0 : index
    %c2_155 = arith.constant 2 : index
    %c0_156 = arith.constant 0 : index
    %149 = vector.load %arg17[%c0_154, %c2_155, %c0_156] : memref<8x18x16xf32, #tpu.memory_space<vmem>>, vector<6x16x16xf32>
    %150 = vector.shape_cast %149 : vector<6x16x16xf32> to vector<96x16xf32>
    %c0_157 = arith.constant 0 : index
    %c2_158 = arith.constant 2 : index
    %c0_159 = arith.constant 0 : index
    %c0_160 = arith.constant 0 : index
    %151 = vector.load %arg10[%c0_157, %c2_158, %c0_159, %c0_160] : memref<3x3x16x16xf32, #tpu.memory_space<vmem>>, vector<1x1x16x16xf32>
    %152 = vector.shape_cast %151 : vector<1x1x16x16xf32> to vector<16x16xf32>
    %cst_161 = arith.constant dense<0.000000e+00> : vector<96x16xf32>
    %153 = tpu.matmul %148, %152, %cst_161 {dimension_numbers = #tpu.dot_dimension_numbers<[1], [0], [0], [1], [0, 0, 1, 1], [], []>} : vector<96x16xf32>, vector<16x16xf32>, vector<96x16xf32> -> vector<96x16xf32>
    %154 = arith.addf %146, %153 : vector<96x16xf32>
    %c0_162 = arith.constant 0 : index
    %c2_163 = arith.constant 2 : index
    %c0_164 = arith.constant 0 : index
    %c0_165 = arith.constant 0 : index
    %155 = vector.load %arg11[%c0_162, %c2_163, %c0_164, %c0_165] : memref<3x3x16x16xf32, #tpu.memory_space<vmem>>, vector<1x1x16x16xf32>
    %156 = vector.shape_cast %155 : vector<1x1x16x16xf32> to vector<16x16xf32>
    %cst_166 = arith.constant dense<0.000000e+00> : vector<96x16xf32>
    %157 = tpu.matmul %150, %156, %cst_166 {dimension_numbers = #tpu.dot_dimension_numbers<[1], [0], [0], [1], [0, 0, 1, 1], [], []>} : vector<96x16xf32>, vector<16x16xf32>, vector<96x16xf32> -> vector<96x16xf32>
    %158 = arith.addf %154, %157 : vector<96x16xf32>
    %c1_167 = arith.constant 1 : index
    %c0_168 = arith.constant 0 : index
    %c0_169 = arith.constant 0 : index
    %159 = vector.load %arg18[%c1_167, %c0_168, %c0_169] : memref<8x18x16xf32, #tpu.memory_space<vmem>>, vector<6x16x16xf32>
    %160 = vector.shape_cast %159 : vector<6x16x16xf32> to vector<96x16xf32>
    %c1_170 = arith.constant 1 : index
    %c0_171 = arith.constant 0 : index
    %c0_172 = arith.constant 0 : index
    %161 = vector.load %arg17[%c1_170, %c0_171, %c0_172] : memref<8x18x16xf32, #tpu.memory_space<vmem>>, vector<6x16x16xf32>
    %162 = vector.shape_cast %161 : vector<6x16x16xf32> to vector<96x16xf32>
    %c1_173 = arith.constant 1 : index
    %c0_174 = arith.constant 0 : index
    %c0_175 = arith.constant 0 : index
    %c0_176 = arith.constant 0 : index
    %163 = vector.load %arg10[%c1_173, %c0_174, %c0_175, %c0_176] : memref<3x3x16x16xf32, #tpu.memory_space<vmem>>, vector<1x1x16x16xf32>
    %164 = vector.shape_cast %163 : vector<1x1x16x16xf32> to vector<16x16xf32>
    %cst_177 = arith.constant dense<0.000000e+00> : vector<96x16xf32>
    %165 = tpu.matmul %160, %164, %cst_177 {dimension_numbers = #tpu.dot_dimension_numbers<[1], [0], [0], [1], [0, 0, 1, 1], [], []>} : vector<96x16xf32>, vector<16x16xf32>, vector<96x16xf32> -> vector<96x16xf32>
    %166 = arith.addf %158, %165 : vector<96x16xf32>
    %c1_178 = arith.constant 1 : index
    %c0_179 = arith.constant 0 : index
    %c0_180 = arith.constant 0 : index
    %c0_181 = arith.constant 0 : index
    %167 = vector.load %arg11[%c1_178, %c0_179, %c0_180, %c0_181] : memref<3x3x16x16xf32, #tpu.memory_space<vmem>>, vector<1x1x16x16xf32>
    %168 = vector.shape_cast %167 : vector<1x1x16x16xf32> to vector<16x16xf32>
    %cst_182 = arith.constant dense<0.000000e+00> : vector<96x16xf32>
    %169 = tpu.matmul %162, %168, %cst_182 {dimension_numbers = #tpu.dot_dimension_numbers<[1], [0], [0], [1], [0, 0, 1, 1], [], []>} : vector<96x16xf32>, vector<16x16xf32>, vector<96x16xf32> -> vector<96x16xf32>
    %170 = arith.addf %166, %169 : vector<96x16xf32>
    %c1_183 = arith.constant 1 : index
    %c1_184 = arith.constant 1 : index
    %c0_185 = arith.constant 0 : index
    %171 = vector.load %arg18[%c1_183, %c1_184, %c0_185] : memref<8x18x16xf32, #tpu.memory_space<vmem>>, vector<6x16x16xf32>
    %172 = vector.shape_cast %171 : vector<6x16x16xf32> to vector<96x16xf32>
    %c1_186 = arith.constant 1 : index
    %c1_187 = arith.constant 1 : index
    %c0_188 = arith.constant 0 : index
    %173 = vector.load %arg17[%c1_186, %c1_187, %c0_188] : memref<8x18x16xf32, #tpu.memory_space<vmem>>, vector<6x16x16xf32>
    %174 = vector.shape_cast %173 : vector<6x16x16xf32> to vector<96x16xf32>
    %c1_189 = arith.constant 1 : index
    %c1_190 = arith.constant 1 : index
    %c0_191 = arith.constant 0 : index
    %c0_192 = arith.constant 0 : index
    %175 = vector.load %arg10[%c1_189, %c1_190, %c0_191, %c0_192] : memref<3x3x16x16xf32, #tpu.memory_space<vmem>>, vector<1x1x16x16xf32>
    %176 = vector.shape_cast %175 : vector<1x1x16x16xf32> to vector<16x16xf32>
    %cst_193 = arith.constant dense<0.000000e+00> : vector<96x16xf32>
    %177 = tpu.matmul %172, %176, %cst_193 {dimension_numbers = #tpu.dot_dimension_numbers<[1], [0], [0], [1], [0, 0, 1, 1], [], []>} : vector<96x16xf32>, vector<16x16xf32>, vector<96x16xf32> -> vector<96x16xf32>
    %178 = arith.addf %170, %177 : vector<96x16xf32>
    %c1_194 = arith.constant 1 : index
    %c1_195 = arith.constant 1 : index
    %c0_196 = arith.constant 0 : index
    %c0_197 = arith.constant 0 : index
    %179 = vector.load %arg11[%c1_194, %c1_195, %c0_196, %c0_197] : memref<3x3x16x16xf32, #tpu.memory_space<vmem>>, vector<1x1x16x16xf32>
    %180 = vector.shape_cast %179 : vector<1x1x16x16xf32> to vector<16x16xf32>
    %cst_198 = arith.constant dense<0.000000e+00> : vector<96x16xf32>
    %181 = tpu.matmul %174, %180, %cst_198 {dimension_numbers = #tpu.dot_dimension_numbers<[1], [0], [0], [1], [0, 0, 1, 1], [], []>} : vector<96x16xf32>, vector<16x16xf32>, vector<96x16xf32> -> vector<96x16xf32>
    %182 = arith.addf %178, %181 : vector<96x16xf32>
    %c1_199 = arith.constant 1 : index
    %c2_200 = arith.constant 2 : index
    %c0_201 = arith.constant 0 : index
    %183 = vector.load %arg18[%c1_199, %c2_200, %c0_201] : memref<8x18x16xf32, #tpu.memory_space<vmem>>, vector<6x16x16xf32>
    %184 = vector.shape_cast %183 : vector<6x16x16xf32> to vector<96x16xf32>
    %c1_202 = arith.constant 1 : index
    %c2_203 = arith.constant 2 : index
    %c0_204 = arith.constant 0 : index
    %185 = vector.load %arg17[%c1_202, %c2_203, %c0_204] : memref<8x18x16xf32, #tpu.memory_space<vmem>>, vector<6x16x16xf32>
    %186 = vector.shape_cast %185 : vector<6x16x16xf32> to vector<96x16xf32>
    %c1_205 = arith.constant 1 : index
    %c2_206 = arith.constant 2 : index
    %c0_207 = arith.constant 0 : index
    %c0_208 = arith.constant 0 : index
    %187 = vector.load %arg10[%c1_205, %c2_206, %c0_207, %c0_208] : memref<3x3x16x16xf32, #tpu.memory_space<vmem>>, vector<1x1x16x16xf32>
    %188 = vector.shape_cast %187 : vector<1x1x16x16xf32> to vector<16x16xf32>
    %cst_209 = arith.constant dense<0.000000e+00> : vector<96x16xf32>
    %189 = tpu.matmul %184, %188, %cst_209 {dimension_numbers = #tpu.dot_dimension_numbers<[1], [0], [0], [1], [0, 0, 1, 1], [], []>} : vector<96x16xf32>, vector<16x16xf32>, vector<96x16xf32> -> vector<96x16xf32>
    %190 = arith.addf %182, %189 : vector<96x16xf32>
    %c1_210 = arith.constant 1 : index
    %c2_211 = arith.constant 2 : index
    %c0_212 = arith.constant 0 : index
    %c0_213 = arith.constant 0 : index
    %191 = vector.load %arg11[%c1_210, %c2_211, %c0_212, %c0_213] : memref<3x3x16x16xf32, #tpu.memory_space<vmem>>, vector<1x1x16x16xf32>
    %192 = vector.shape_cast %191 : vector<1x1x16x16xf32> to vector<16x16xf32>
    %cst_214 = arith.constant dense<0.000000e+00> : vector<96x16xf32>
    %193 = tpu.matmul %186, %192, %cst_214 {dimension_numbers = #tpu.dot_dimension_numbers<[1], [0], [0], [1], [0, 0, 1, 1], [], []>} : vector<96x16xf32>, vector<16x16xf32>, vector<96x16xf32> -> vector<96x16xf32>
    %194 = arith.addf %190, %193 : vector<96x16xf32>
    %c2_215 = arith.constant 2 : index
    %c0_216 = arith.constant 0 : index
    %c0_217 = arith.constant 0 : index
    %195 = vector.load %arg18[%c2_215, %c0_216, %c0_217] : memref<8x18x16xf32, #tpu.memory_space<vmem>>, vector<6x16x16xf32>
    %196 = vector.shape_cast %195 : vector<6x16x16xf32> to vector<96x16xf32>
    %c2_218 = arith.constant 2 : index
    %c0_219 = arith.constant 0 : index
    %c0_220 = arith.constant 0 : index
    %197 = vector.load %arg17[%c2_218, %c0_219, %c0_220] : memref<8x18x16xf32, #tpu.memory_space<vmem>>, vector<6x16x16xf32>
    %198 = vector.shape_cast %197 : vector<6x16x16xf32> to vector<96x16xf32>
    %c2_221 = arith.constant 2 : index
    %c0_222 = arith.constant 0 : index
    %c0_223 = arith.constant 0 : index
    %c0_224 = arith.constant 0 : index
    %199 = vector.load %arg10[%c2_221, %c0_222, %c0_223, %c0_224] : memref<3x3x16x16xf32, #tpu.memory_space<vmem>>, vector<1x1x16x16xf32>
    %200 = vector.shape_cast %199 : vector<1x1x16x16xf32> to vector<16x16xf32>
    %cst_225 = arith.constant dense<0.000000e+00> : vector<96x16xf32>
    %201 = tpu.matmul %196, %200, %cst_225 {dimension_numbers = #tpu.dot_dimension_numbers<[1], [0], [0], [1], [0, 0, 1, 1], [], []>} : vector<96x16xf32>, vector<16x16xf32>, vector<96x16xf32> -> vector<96x16xf32>
    %202 = arith.addf %194, %201 : vector<96x16xf32>
    %c2_226 = arith.constant 2 : index
    %c0_227 = arith.constant 0 : index
    %c0_228 = arith.constant 0 : index
    %c0_229 = arith.constant 0 : index
    %203 = vector.load %arg11[%c2_226, %c0_227, %c0_228, %c0_229] : memref<3x3x16x16xf32, #tpu.memory_space<vmem>>, vector<1x1x16x16xf32>
    %204 = vector.shape_cast %203 : vector<1x1x16x16xf32> to vector<16x16xf32>
    %cst_230 = arith.constant dense<0.000000e+00> : vector<96x16xf32>
    %205 = tpu.matmul %198, %204, %cst_230 {dimension_numbers = #tpu.dot_dimension_numbers<[1], [0], [0], [1], [0, 0, 1, 1], [], []>} : vector<96x16xf32>, vector<16x16xf32>, vector<96x16xf32> -> vector<96x16xf32>
    %206 = arith.addf %202, %205 : vector<96x16xf32>
    %c2_231 = arith.constant 2 : index
    %c1_232 = arith.constant 1 : index
    %c0_233 = arith.constant 0 : index
    %207 = vector.load %arg18[%c2_231, %c1_232, %c0_233] : memref<8x18x16xf32, #tpu.memory_space<vmem>>, vector<6x16x16xf32>
    %208 = vector.shape_cast %207 : vector<6x16x16xf32> to vector<96x16xf32>
    %c2_234 = arith.constant 2 : index
    %c1_235 = arith.constant 1 : index
    %c0_236 = arith.constant 0 : index
    %209 = vector.load %arg17[%c2_234, %c1_235, %c0_236] : memref<8x18x16xf32, #tpu.memory_space<vmem>>, vector<6x16x16xf32>
    %210 = vector.shape_cast %209 : vector<6x16x16xf32> to vector<96x16xf32>
    %c2_237 = arith.constant 2 : index
    %c1_238 = arith.constant 1 : index
    %c0_239 = arith.constant 0 : index
    %c0_240 = arith.constant 0 : index
    %211 = vector.load %arg10[%c2_237, %c1_238, %c0_239, %c0_240] : memref<3x3x16x16xf32, #tpu.memory_space<vmem>>, vector<1x1x16x16xf32>
    %212 = vector.shape_cast %211 : vector<1x1x16x16xf32> to vector<16x16xf32>
    %cst_241 = arith.constant dense<0.000000e+00> : vector<96x16xf32>
    %213 = tpu.matmul %208, %212, %cst_241 {dimension_numbers = #tpu.dot_dimension_numbers<[1], [0], [0], [1], [0, 0, 1, 1], [], []>} : vector<96x16xf32>, vector<16x16xf32>, vector<96x16xf32> -> vector<96x16xf32>
    %214 = arith.addf %206, %213 : vector<96x16xf32>
    %c2_242 = arith.constant 2 : index
    %c1_243 = arith.constant 1 : index
    %c0_244 = arith.constant 0 : index
    %c0_245 = arith.constant 0 : index
    %215 = vector.load %arg11[%c2_242, %c1_243, %c0_244, %c0_245] : memref<3x3x16x16xf32, #tpu.memory_space<vmem>>, vector<1x1x16x16xf32>
    %216 = vector.shape_cast %215 : vector<1x1x16x16xf32> to vector<16x16xf32>
    %cst_246 = arith.constant dense<0.000000e+00> : vector<96x16xf32>
    %217 = tpu.matmul %210, %216, %cst_246 {dimension_numbers = #tpu.dot_dimension_numbers<[1], [0], [0], [1], [0, 0, 1, 1], [], []>} : vector<96x16xf32>, vector<16x16xf32>, vector<96x16xf32> -> vector<96x16xf32>
    %218 = arith.addf %214, %217 : vector<96x16xf32>
    %c2_247 = arith.constant 2 : index
    %c2_248 = arith.constant 2 : index
    %c0_249 = arith.constant 0 : index
    %219 = vector.load %arg18[%c2_247, %c2_248, %c0_249] : memref<8x18x16xf32, #tpu.memory_space<vmem>>, vector<6x16x16xf32>
    %220 = vector.shape_cast %219 : vector<6x16x16xf32> to vector<96x16xf32>
    %c2_250 = arith.constant 2 : index
    %c2_251 = arith.constant 2 : index
    %c0_252 = arith.constant 0 : index
    %221 = vector.load %arg17[%c2_250, %c2_251, %c0_252] : memref<8x18x16xf32, #tpu.memory_space<vmem>>, vector<6x16x16xf32>
    %222 = vector.shape_cast %221 : vector<6x16x16xf32> to vector<96x16xf32>
    %c2_253 = arith.constant 2 : index
    %c2_254 = arith.constant 2 : index
    %c0_255 = arith.constant 0 : index
    %c0_256 = arith.constant 0 : index
    %223 = vector.load %arg10[%c2_253, %c2_254, %c0_255, %c0_256] : memref<3x3x16x16xf32, #tpu.memory_space<vmem>>, vector<1x1x16x16xf32>
    %224 = vector.shape_cast %223 : vector<1x1x16x16xf32> to vector<16x16xf32>
    %cst_257 = arith.constant dense<0.000000e+00> : vector<96x16xf32>
    %225 = tpu.matmul %220, %224, %cst_257 {dimension_numbers = #tpu.dot_dimension_numbers<[1], [0], [0], [1], [0, 0, 1, 1], [], []>} : vector<96x16xf32>, vector<16x16xf32>, vector<96x16xf32> -> vector<96x16xf32>
    %226 = arith.addf %218, %225 : vector<96x16xf32>
    %c2_258 = arith.constant 2 : index
    %c2_259 = arith.constant 2 : index
    %c0_260 = arith.constant 0 : index
    %c0_261 = arith.constant 0 : index
    %227 = vector.load %arg11[%c2_258, %c2_259, %c0_260, %c0_261] : memref<3x3x16x16xf32, #tpu.memory_space<vmem>>, vector<1x1x16x16xf32>
    %228 = vector.shape_cast %227 : vector<1x1x16x16xf32> to vector<16x16xf32>
    %cst_262 = arith.constant dense<0.000000e+00> : vector<96x16xf32>
    %229 = tpu.matmul %222, %228, %cst_262 {dimension_numbers = #tpu.dot_dimension_numbers<[1], [0], [0], [1], [0, 0, 1, 1], [], []>} : vector<96x16xf32>, vector<16x16xf32>, vector<96x16xf32> -> vector<96x16xf32>
    %230 = arith.addf %226, %229 : vector<96x16xf32>
    %c0_263 = arith.constant 0 : index
    %c0_264 = arith.constant 0 : index
    %231 = vector.load %arg12[%c0_263, %c0_264] : memref<1x16xf32, #tpu.memory_space<vmem>>, vector<1x16xf32>
    %232 = vector.shape_cast %231 : vector<1x16xf32> to vector<16xf32>
    %233 = vector.shape_cast %232 : vector<16xf32> to vector<1x16xf32>
    %234 = vector.broadcast %233 : vector<1x16xf32> to vector<96x16xf32>
    %235 = arith.addf %230, %234 : vector<96x16xf32>
    %cst_265 = arith.constant 0.000000e+00 : f32
    %236 = vector.broadcast %cst_265 : f32 to vector<96x16xf32>
    %237 = arith.maximumf %235, %236 : vector<96x16xf32>
    %238 = vector.shape_cast %237 : vector<96x16xf32> to vector<6x16x16xf32>
    %cst_266 = arith.constant 0.000000e+00 : f32
    %239 = vector.broadcast %cst_266 : f32 to vector<6x1x16xf32>
    %c0_267 = arith.constant 0 : index
    %c0_268 = arith.constant 0 : index
    %c0_269 = arith.constant 0 : index
    %240 = vector.load %arg19[%c0_267, %c0_268, %c0_269] : memref<6x18x16xf32, #tpu.memory_space<vmem>>, vector<6x1x16xf32>
    tpu.vector_store %arg19[%c0_267, %c0_268, %c0_269], %239 {strides = array<i32>} : memref<6x18x16xf32, #tpu.memory_space<vmem>>, vector<6x1x16xf32>,
    %cst_270 = arith.constant 0.000000e+00 : f32
    %241 = vector.broadcast %cst_270 : f32 to vector<6x1x16xf32>
    %c0_271 = arith.constant 0 : index
    %c17_272 = arith.constant 17 : index
    %c0_273 = arith.constant 0 : index
    %242 = vector.load %arg19[%c0_271, %c17_272, %c0_273] : memref<6x18x16xf32, #tpu.memory_space<vmem>>, vector<6x1x16xf32>
    tpu.vector_store %arg19[%c0_271, %c17_272, %c0_273], %241 {strides = array<i32>} : memref<6x18x16xf32, #tpu.memory_space<vmem>>, vector<6x1x16xf32>,
    %243 = vector.extract_strided_slice %238 {offsets = [0, 0, 0], sizes = [1, 16, 16], strides = [1, 1, 1]} : vector<6x16x16xf32> to vector<1x16x16xf32>
    %244 = vector.broadcast %2 : f32 to vector<1x16x16xf32>
    %245 = arith.mulf %243, %244 : vector<1x16x16xf32>
    %c0_274 = arith.constant 0 : index
    %c1_275 = arith.constant 1 : index
    %c0_276 = arith.constant 0 : index
    %246 = vector.load %arg19[%c0_274, %c1_275, %c0_276] : memref<6x18x16xf32, #tpu.memory_space<vmem>>, vector<1x16x16xf32>
    tpu.vector_store %arg19[%c0_274, %c1_275, %c0_276], %245 {strides = array<i32>} : memref<6x18x16xf32, #tpu.memory_space<vmem>>, vector<1x16x16xf32>,
    %247 = vector.extract_strided_slice %238 {offsets = [1, 0, 0], sizes = [4, 16, 16], strides = [1, 1, 1]} : vector<6x16x16xf32> to vector<4x16x16xf32>
    %c1_277 = arith.constant 1 : index
    %c1_278 = arith.constant 1 : index
    %c0_279 = arith.constant 0 : index
    %248 = vector.load %arg19[%c1_277, %c1_278, %c0_279] : memref<6x18x16xf32, #tpu.memory_space<vmem>>, vector<4x16x16xf32>
    tpu.vector_store %arg19[%c1_277, %c1_278, %c0_279], %247 {strides = array<i32>} : memref<6x18x16xf32, #tpu.memory_space<vmem>>, vector<4x16x16xf32>,
    %249 = vector.extract_strided_slice %238 {offsets = [5, 0, 0], sizes = [1, 16, 16], strides = [1, 1, 1]} : vector<6x16x16xf32> to vector<1x16x16xf32>
    %250 = vector.broadcast %5 : f32 to vector<1x16x16xf32>
    %251 = arith.mulf %249, %250 : vector<1x16x16xf32>
    %c5 = arith.constant 5 : index
    %c1_280 = arith.constant 1 : index
    %c0_281 = arith.constant 0 : index
    %252 = vector.load %arg19[%c5, %c1_280, %c0_281] : memref<6x18x16xf32, #tpu.memory_space<vmem>>, vector<1x16x16xf32>
    tpu.vector_store %arg19[%c5, %c1_280, %c0_281], %251 {strides = array<i32>} : memref<6x18x16xf32, #tpu.memory_space<vmem>>, vector<1x16x16xf32>,
    %cst_282 = arith.constant 0.000000e+00 : f32
    %253 = vector.broadcast %cst_282 : f32 to vector<64x16xf32>
    %c0_283 = arith.constant 0 : index
    %c0_284 = arith.constant 0 : index
    %c0_285 = arith.constant 0 : index
    %254 = vector.load %arg19[%c0_283, %c0_284, %c0_285] : memref<6x18x16xf32, #tpu.memory_space<vmem>>, vector<4x16x16xf32>
    %255 = vector.shape_cast %254 : vector<4x16x16xf32> to vector<64x16xf32>
    %c0_286 = arith.constant 0 : index
    %c0_287 = arith.constant 0 : index
    %c0_288 = arith.constant 0 : index
    %c0_289 = arith.constant 0 : index
    %256 = vector.load %arg13[%c0_286, %c0_287, %c0_288, %c0_289] : memref<3x3x16x16xf32, #tpu.memory_space<vmem>>, vector<1x1x16x16xf32>
    %257 = vector.shape_cast %256 : vector<1x1x16x16xf32> to vector<16x16xf32>
    %cst_290 = arith.constant dense<0.000000e+00> : vector<64x16xf32>
    %258 = tpu.matmul %255, %257, %cst_290 {dimension_numbers = #tpu.dot_dimension_numbers<[1], [0], [0], [1], [0, 0, 1, 1], [], []>} : vector<64x16xf32>, vector<16x16xf32>, vector<64x16xf32> -> vector<64x16xf32>
    %259 = arith.addf %253, %258 : vector<64x16xf32>
    %c0_291 = arith.constant 0 : index
    %c1_292 = arith.constant 1 : index
    %c0_293 = arith.constant 0 : index
    %260 = vector.load %arg19[%c0_291, %c1_292, %c0_293] : memref<6x18x16xf32, #tpu.memory_space<vmem>>, vector<4x16x16xf32>
    %261 = vector.shape_cast %260 : vector<4x16x16xf32> to vector<64x16xf32>
    %c0_294 = arith.constant 0 : index
    %c1_295 = arith.constant 1 : index
    %c0_296 = arith.constant 0 : index
    %c0_297 = arith.constant 0 : index
    %262 = vector.load %arg13[%c0_294, %c1_295, %c0_296, %c0_297] : memref<3x3x16x16xf32, #tpu.memory_space<vmem>>, vector<1x1x16x16xf32>
    %263 = vector.shape_cast %262 : vector<1x1x16x16xf32> to vector<16x16xf32>
    %cst_298 = arith.constant dense<0.000000e+00> : vector<64x16xf32>
    %264 = tpu.matmul %261, %263, %cst_298 {dimension_numbers = #tpu.dot_dimension_numbers<[1], [0], [0], [1], [0, 0, 1, 1], [], []>} : vector<64x16xf32>, vector<16x16xf32>, vector<64x16xf32> -> vector<64x16xf32>
    %265 = arith.addf %259, %264 : vector<64x16xf32>
    %c0_299 = arith.constant 0 : index
    %c2_300 = arith.constant 2 : index
    %c0_301 = arith.constant 0 : index
    %266 = vector.load %arg19[%c0_299, %c2_300, %c0_301] : memref<6x18x16xf32, #tpu.memory_space<vmem>>, vector<4x16x16xf32>
    %267 = vector.shape_cast %266 : vector<4x16x16xf32> to vector<64x16xf32>
    %c0_302 = arith.constant 0 : index
    %c2_303 = arith.constant 2 : index
    %c0_304 = arith.constant 0 : index
    %c0_305 = arith.constant 0 : index
    %268 = vector.load %arg13[%c0_302, %c2_303, %c0_304, %c0_305] : memref<3x3x16x16xf32, #tpu.memory_space<vmem>>, vector<1x1x16x16xf32>
    %269 = vector.shape_cast %268 : vector<1x1x16x16xf32> to vector<16x16xf32>
    %cst_306 = arith.constant dense<0.000000e+00> : vector<64x16xf32>
    %270 = tpu.matmul %267, %269, %cst_306 {dimension_numbers = #tpu.dot_dimension_numbers<[1], [0], [0], [1], [0, 0, 1, 1], [], []>} : vector<64x16xf32>, vector<16x16xf32>, vector<64x16xf32> -> vector<64x16xf32>
    %271 = arith.addf %265, %270 : vector<64x16xf32>
    %c1_307 = arith.constant 1 : index
    %c0_308 = arith.constant 0 : index
    %c0_309 = arith.constant 0 : index
    %272 = vector.load %arg19[%c1_307, %c0_308, %c0_309] : memref<6x18x16xf32, #tpu.memory_space<vmem>>, vector<4x16x16xf32>
    %273 = vector.shape_cast %272 : vector<4x16x16xf32> to vector<64x16xf32>
    %c1_310 = arith.constant 1 : index
    %c0_311 = arith.constant 0 : index
    %c0_312 = arith.constant 0 : index
    %c0_313 = arith.constant 0 : index
    %274 = vector.load %arg13[%c1_310, %c0_311, %c0_312, %c0_313] : memref<3x3x16x16xf32, #tpu.memory_space<vmem>>, vector<1x1x16x16xf32>
    %275 = vector.shape_cast %274 : vector<1x1x16x16xf32> to vector<16x16xf32>
    %cst_314 = arith.constant dense<0.000000e+00> : vector<64x16xf32>
    %276 = tpu.matmul %273, %275, %cst_314 {dimension_numbers = #tpu.dot_dimension_numbers<[1], [0], [0], [1], [0, 0, 1, 1], [], []>} : vector<64x16xf32>, vector<16x16xf32>, vector<64x16xf32> -> vector<64x16xf32>
    %277 = arith.addf %271, %276 : vector<64x16xf32>
    %c1_315 = arith.constant 1 : index
    %c1_316 = arith.constant 1 : index
    %c0_317 = arith.constant 0 : index
    %278 = vector.load %arg19[%c1_315, %c1_316, %c0_317] : memref<6x18x16xf32, #tpu.memory_space<vmem>>, vector<4x16x16xf32>
    %279 = vector.shape_cast %278 : vector<4x16x16xf32> to vector<64x16xf32>
    %c1_318 = arith.constant 1 : index
    %c1_319 = arith.constant 1 : index
    %c0_320 = arith.constant 0 : index
    %c0_321 = arith.constant 0 : index
    %280 = vector.load %arg13[%c1_318, %c1_319, %c0_320, %c0_321] : memref<3x3x16x16xf32, #tpu.memory_space<vmem>>, vector<1x1x16x16xf32>
    %281 = vector.shape_cast %280 : vector<1x1x16x16xf32> to vector<16x16xf32>
    %cst_322 = arith.constant dense<0.000000e+00> : vector<64x16xf32>
    %282 = tpu.matmul %279, %281, %cst_322 {dimension_numbers = #tpu.dot_dimension_numbers<[1], [0], [0], [1], [0, 0, 1, 1], [], []>} : vector<64x16xf32>, vector<16x16xf32>, vector<64x16xf32> -> vector<64x16xf32>
    %283 = arith.addf %277, %282 : vector<64x16xf32>
    %c1_323 = arith.constant 1 : index
    %c2_324 = arith.constant 2 : index
    %c0_325 = arith.constant 0 : index
    %284 = vector.load %arg19[%c1_323, %c2_324, %c0_325] : memref<6x18x16xf32, #tpu.memory_space<vmem>>, vector<4x16x16xf32>
    %285 = vector.shape_cast %284 : vector<4x16x16xf32> to vector<64x16xf32>
    %c1_326 = arith.constant 1 : index
    %c2_327 = arith.constant 2 : index
    %c0_328 = arith.constant 0 : index
    %c0_329 = arith.constant 0 : index
    %286 = vector.load %arg13[%c1_326, %c2_327, %c0_328, %c0_329] : memref<3x3x16x16xf32, #tpu.memory_space<vmem>>, vector<1x1x16x16xf32>
    %287 = vector.shape_cast %286 : vector<1x1x16x16xf32> to vector<16x16xf32>
    %cst_330 = arith.constant dense<0.000000e+00> : vector<64x16xf32>
    %288 = tpu.matmul %285, %287, %cst_330 {dimension_numbers = #tpu.dot_dimension_numbers<[1], [0], [0], [1], [0, 0, 1, 1], [], []>} : vector<64x16xf32>, vector<16x16xf32>, vector<64x16xf32> -> vector<64x16xf32>
    %289 = arith.addf %283, %288 : vector<64x16xf32>
    %c2_331 = arith.constant 2 : index
    %c0_332 = arith.constant 0 : index
    %c0_333 = arith.constant 0 : index
    %290 = vector.load %arg19[%c2_331, %c0_332, %c0_333] : memref<6x18x16xf32, #tpu.memory_space<vmem>>, vector<4x16x16xf32>
    %291 = vector.shape_cast %290 : vector<4x16x16xf32> to vector<64x16xf32>
    %c2_334 = arith.constant 2 : index
    %c0_335 = arith.constant 0 : index
    %c0_336 = arith.constant 0 : index
    %c0_337 = arith.constant 0 : index
    %292 = vector.load %arg13[%c2_334, %c0_335, %c0_336, %c0_337] : memref<3x3x16x16xf32, #tpu.memory_space<vmem>>, vector<1x1x16x16xf32>
    %293 = vector.shape_cast %292 : vector<1x1x16x16xf32> to vector<16x16xf32>
    %cst_338 = arith.constant dense<0.000000e+00> : vector<64x16xf32>
    %294 = tpu.matmul %291, %293, %cst_338 {dimension_numbers = #tpu.dot_dimension_numbers<[1], [0], [0], [1], [0, 0, 1, 1], [], []>} : vector<64x16xf32>, vector<16x16xf32>, vector<64x16xf32> -> vector<64x16xf32>
    %295 = arith.addf %289, %294 : vector<64x16xf32>
    %c2_339 = arith.constant 2 : index
    %c1_340 = arith.constant 1 : index
    %c0_341 = arith.constant 0 : index
    %296 = vector.load %arg19[%c2_339, %c1_340, %c0_341] : memref<6x18x16xf32, #tpu.memory_space<vmem>>, vector<4x16x16xf32>
    %297 = vector.shape_cast %296 : vector<4x16x16xf32> to vector<64x16xf32>
    %c2_342 = arith.constant 2 : index
    %c1_343 = arith.constant 1 : index
    %c0_344 = arith.constant 0 : index
    %c0_345 = arith.constant 0 : index
    %298 = vector.load %arg13[%c2_342, %c1_343, %c0_344, %c0_345] : memref<3x3x16x16xf32, #tpu.memory_space<vmem>>, vector<1x1x16x16xf32>
    %299 = vector.shape_cast %298 : vector<1x1x16x16xf32> to vector<16x16xf32>
    %cst_346 = arith.constant dense<0.000000e+00> : vector<64x16xf32>
    %300 = tpu.matmul %297, %299, %cst_346 {dimension_numbers = #tpu.dot_dimension_numbers<[1], [0], [0], [1], [0, 0, 1, 1], [], []>} : vector<64x16xf32>, vector<16x16xf32>, vector<64x16xf32> -> vector<64x16xf32>
    %301 = arith.addf %295, %300 : vector<64x16xf32>
    %c2_347 = arith.constant 2 : index
    %c2_348 = arith.constant 2 : index
    %c0_349 = arith.constant 0 : index
    %302 = vector.load %arg19[%c2_347, %c2_348, %c0_349] : memref<6x18x16xf32, #tpu.memory_space<vmem>>, vector<4x16x16xf32>
    %303 = vector.shape_cast %302 : vector<4x16x16xf32> to vector<64x16xf32>
    %c2_350 = arith.constant 2 : index
    %c2_351 = arith.constant 2 : index
    %c0_352 = arith.constant 0 : index
    %c0_353 = arith.constant 0 : index
    %304 = vector.load %arg13[%c2_350, %c2_351, %c0_352, %c0_353] : memref<3x3x16x16xf32, #tpu.memory_space<vmem>>, vector<1x1x16x16xf32>
    %305 = vector.shape_cast %304 : vector<1x1x16x16xf32> to vector<16x16xf32>
    %cst_354 = arith.constant dense<0.000000e+00> : vector<64x16xf32>
    %306 = tpu.matmul %303, %305, %cst_354 {dimension_numbers = #tpu.dot_dimension_numbers<[1], [0], [0], [1], [0, 0, 1, 1], [], []>} : vector<64x16xf32>, vector<16x16xf32>, vector<64x16xf32> -> vector<64x16xf32>
    %307 = arith.addf %301, %306 : vector<64x16xf32>
    %c0_355 = arith.constant 0 : index
    %c0_356 = arith.constant 0 : index
    %308 = vector.load %arg14[%c0_355, %c0_356] : memref<1x16xf32, #tpu.memory_space<vmem>>, vector<1x16xf32>
    %309 = vector.shape_cast %308 : vector<1x16xf32> to vector<16xf32>
    %310 = vector.shape_cast %309 : vector<16xf32> to vector<1x16xf32>
    %311 = vector.broadcast %310 : vector<1x16xf32> to vector<64x16xf32>
    %312 = arith.addf %307, %311 : vector<64x16xf32>
    %cst_357 = arith.constant 0.000000e+00 : f32
    %313 = vector.broadcast %cst_357 : f32 to vector<64x16xf32>
    %314 = arith.maximumf %312, %313 : vector<64x16xf32>
    %315 = vector.shape_cast %314 : vector<64x16xf32> to vector<4x16x16xf32>
    %c0_358 = arith.constant 0 : index
    %c0_359 = arith.constant 0 : index
    %c0_360 = arith.constant 0 : index
    %c0_361 = arith.constant 0 : index
    %316 = vector.load %arg15[%c0_358, %c0_359, %c0_360, %c0_361] : memref<1x4x16x16xf32, #tpu.memory_space<vmem>>, vector<1x4x16x16xf32>
    %317 = vector.shape_cast %316 : vector<1x4x16x16xf32> to vector<4x16x16xf32>
    %318 = vector.shape_cast %315 : vector<4x16x16xf32> to vector<1x4x16x16xf32>
    tpu.vector_store %arg15[%c0_358, %c0_359, %c0_360, %c0_361], %318 {strides = array<i32>} : memref<1x4x16x16xf32, #tpu.memory_space<vmem>>, vector<1x4x16x16xf32>,
    return
  }
  func.func @transform_0(%arg0: i32, %arg1: i32) -> (i32, i32, i32, i32) {
    %c0_i32 = arith.constant 0 : i32
    %c0_i32_0 = arith.constant 0 : i32
    %c0_i32_1 = arith.constant 0 : i32
    return %arg0, %arg1, %c0_i32, %c0_i32_0 : i32, i32, i32, i32
  }
  func.func @transform_1(%arg0: i32, %arg1: i32) -> (i32, i32, i32, i32) {
    %c1_i32 = arith.constant 1 : i32
    %0 = arith.muli %arg1, %c1_i32 : i32
    %c1_i32_0 = arith.constant 1 : i32
    %1 = arith.subi %0, %c1_i32_0 : i32
    %c0_i32 = arith.constant 0 : i32
    %2 = arith.maxsi %1, %c0_i32 : i32
    %c0_i32_1 = arith.constant 0 : i32
    %c0_i32_2 = arith.constant 0 : i32
    %c0_i32_3 = arith.constant 0 : i32
    return %arg0, %2, %c0_i32_1, %c0_i32_2 : i32, i32, i32, i32
  }
  func.func @transform_2(%arg0: i32, %arg1: i32) -> (i32, i32, i32, i32) {
    %c1_i32 = arith.constant 1 : i32
    %0 = arith.addi %arg1, %c1_i32 : i32
    %c1_i32_0 = arith.constant 1 : i32
    %1 = arith.muli %0, %c1_i32_0 : i32
    %c3_i32 = arith.constant 3 : i32
    %2 = arith.minsi %1, %c3_i32 : i32
    %c0_i32 = arith.constant 0 : i32
    %c0_i32_1 = arith.constant 0 : i32
    %c0_i32_2 = arith.constant 0 : i32
    return %arg0, %2, %c0_i32, %c0_i32_1 : i32, i32, i32, i32
  }
  func.func @transform_3(%arg0: i32, %arg1: i32) -> (i32, i32, i32, i32) {
    %c0_i32 = arith.constant 0 : i32
    %c0_i32_0 = arith.constant 0 : i32
    %c0_i32_1 = arith.constant 0 : i32
    return %arg0, %arg1, %c0_i32, %c0_i32_0 : i32, i32, i32, i32
  }
  func.func @transform_4(%arg0: i32, %arg1: i32) -> (i32, i32, i32, i32) {
    %c2_i32 = arith.constant 2 : i32
    %0 = arith.muli %arg1, %c2_i32 : i32
    %c1_i32 = arith.constant 1 : i32
    %1 = arith.subi %0, %c1_i32 : i32
    %c0_i32 = arith.constant 0 : i32
    %2 = arith.maxsi %1, %c0_i32 : i32
    %c0_i32_0 = arith.constant 0 : i32
    %c0_i32_1 = arith.constant 0 : i32
    %c0_i32_2 = arith.constant 0 : i32
    return %arg0, %2, %c0_i32_0, %c0_i32_1 : i32, i32, i32, i32
  }
  func.func @transform_5(%arg0: i32, %arg1: i32) -> (i32, i32, i32, i32) {
    %c1_i32 = arith.constant 1 : i32
    %0 = arith.addi %arg1, %c1_i32 : i32
    %c2_i32 = arith.constant 2 : i32
    %1 = arith.muli %0, %c2_i32 : i32
    %c7_i32 = arith.constant 7 : i32
    %2 = arith.minsi %1, %c7_i32 : i32
    %c0_i32 = arith.constant 0 : i32
    %c0_i32_0 = arith.constant 0 : i32
    %c0_i32_1 = arith.constant 0 : i32
    return %arg0, %2, %c0_i32, %c0_i32_0 : i32, i32, i32, i32
  }
  func.func @transform_6(%arg0: i32, %arg1: i32) -> (i32, i32, i32, i32) {
    %c0_i32 = arith.constant 0 : i32
    %c0_i32_0 = arith.constant 0 : i32
    %c0_i32_1 = arith.constant 0 : i32
    %c0_i32_2 = arith.constant 0 : i32
    %c0_i32_3 = arith.constant 0 : i32
    return %c0_i32, %c0_i32_0, %c0_i32_1, %c0_i32_2 : i32, i32, i32, i32
  }
  func.func @transform_7(%arg0: i32, %arg1: i32) -> (i32, i32) {
    %c0_i32 = arith.constant 0 : i32
    %c0_i32_0 = arith.constant 0 : i32
    %c0_i32_1 = arith.constant 0 : i32
    return %c0_i32, %c0_i32_0 : i32, i32
  }
  func.func @transform_8(%arg0: i32, %arg1: i32) -> (i32, i32, i32, i32) {
    %c0_i32 = arith.constant 0 : i32
    %c0_i32_0 = arith.constant 0 : i32
    %c0_i32_1 = arith.constant 0 : i32
    %c0_i32_2 = arith.constant 0 : i32
    %c0_i32_3 = arith.constant 0 : i32
    return %c0_i32, %c0_i32_0, %c0_i32_1, %c0_i32_2 : i32, i32, i32, i32
  }
  func.func @transform_9(%arg0: i32, %arg1: i32) -> (i32, i32, i32, i32) {
    %c0_i32 = arith.constant 0 : i32
    %c0_i32_0 = arith.constant 0 : i32
    %c0_i32_1 = arith.constant 0 : i32
    %c0_i32_2 = arith.constant 0 : i32
    %c0_i32_3 = arith.constant 0 : i32
    return %c0_i32, %c0_i32_0, %c0_i32_1, %c0_i32_2 : i32, i32, i32, i32
  }
  func.func @transform_10(%arg0: i32, %arg1: i32) -> (i32, i32) {
    %c0_i32 = arith.constant 0 : i32
    %c0_i32_0 = arith.constant 0 : i32
    %c0_i32_1 = arith.constant 0 : i32
    return %c0_i32, %c0_i32_0 : i32, i32
  }
  func.func @transform_11(%arg0: i32, %arg1: i32) -> (i32, i32, i32, i32) {
    %c0_i32 = arith.constant 0 : i32
    %c0_i32_0 = arith.constant 0 : i32
    %c0_i32_1 = arith.constant 0 : i32
    %c0_i32_2 = arith.constant 0 : i32
    %c0_i32_3 = arith.constant 0 : i32
    return %c0_i32, %c0_i32_0, %c0_i32_1, %c0_i32_2 : i32, i32, i32, i32
  }
  func.func @transform_12(%arg0: i32, %arg1: i32) -> (i32, i32) {
    %c0_i32 = arith.constant 0 : i32
    %c0_i32_0 = arith.constant 0 : i32
    %c0_i32_1 = arith.constant 0 : i32
    return %c0_i32, %c0_i32_0 : i32, i32
  }
  func.func @transform_13(%arg0: i32, %arg1: i32) -> (i32, i32, i32, i32) {
    %c0_i32 = arith.constant 0 : i32
    %c0_i32_0 = arith.constant 0 : i32
    %c0_i32_1 = arith.constant 0 : i32
    return %arg0, %arg1, %c0_i32, %c0_i32_0 : i32, i32, i32, i32
  }
}

</mosaic_0001>

<bundles_post_ra>
// kernel: tpu_custom_call.1
= control target key start
LH: loop header
LB: loop body
LE: loop exit
PB: predicated region body
PF: predicated region fallthrough
CT: control target
= control target key end

     0   :  { %s15316_s0 = inlined_call_operand.hbm [shape: f32[2,8,8,32], index: 0, kind: input, shape index: {}]   ;;  %s15317_s1 = inlined_call_operand.hbm [shape: f32[2,8,8,32], index: 1, kind: input, shape index: {}]   ;;  %s15318_s2 = inlined_call_operand.hbm [shape: f32[2,8,8,32], index: 2, kind: input, shape index: {}]   ;;  %s15319_s3 = inlined_call_operand.hbm [shape: f32[2,16,16,16], index: 3, kind: input, shape index: {}]   ;;  %s15320_s4 = inlined_call_operand.hbm [shape: f32[2,16,16,16], index: 4, kind: input, shape index: {}]   ;;  %s15321_s5 = inlined_call_operand.hbm [shape: f32[2,16,16,16], index: 5, kind: input, shape index: {}]   ;;  %s15322_s6 = inlined_call_operand.vmem [shape: f32[3,3,32,16], index: 6, kind: input, shape index: {}]   ;;  %s15323_s7 = inlined_call_operand.vmem [shape: f32[1,16], index: 7, kind: input, shape index: {}]   ;;  %s15324_s8 = inlined_call_operand.vmem [shape: f32[3,3,16,16], index: 8, kind: input, shape index: {}]   ;;  %s15325_s9 = inlined_call_operand.vmem [shape: f32[3,3,16,16], index: 9, kind: input, shape index: {}]   ;;  %s15326_s10 = inlined_call_operand.vmem [shape: f32[1,16], index: 10, kind: input, shape index: {}]   ;;  %s15327_s11 = inlined_call_operand.vmem [shape: f32[3,3,16,16], index: 11, kind: input, shape index: {}]   ;;  %s15328_s12 = inlined_call_operand.vmem [shape: f32[1,16], index: 12, kind: input, shape index: {}]   ;;  %s15329_s13 = inlined_call_operand.hbm [shape: f32[2,16,16,16], index: 13, kind: output, shape index: {}]  }
   0x1   :  { %15427 = sst [smem:[#allocation72_spill]] %s15316_s0 }
   0x2   :  { %15428 = sst [smem:[#allocation73_spill]] %s15317_s1 }
   0x3   :  { %15429 = sst [smem:[#allocation74_spill]] %s15318_s2 }
   0x4   :  { %15430 = sst [smem:[#allocation75_spill]] %s15319_s3 }
   0x5   :  { %15431 = sst [smem:[#allocation76_spill]] %s15320_s4 }
   0x6   :  { %15432 = sst [smem:[#allocation77_spill]] %s15321_s5 }
   0x7   :  { %15433 = sst [smem:[#allocation78_spill]] %s15322_s6 }
   0x8   :  { %15434 = sst [smem:[#allocation79_spill]] %s15323_s7 }
   0x9   :  { %15435 = sst [smem:[#allocation80_spill]] %s15324_s8 }
   0xa   :  { %15436 = sst [smem:[#allocation81_spill]] %s15325_s9 }
   0xb   :  { %15437 = sst [smem:[#allocation82_spill]] %s15326_s10 }
   0xc   :  { %15438 = sst [smem:[#allocation83_spill]] %s15327_s11 }
   0xd   :  { %15439 = sst [smem:[#allocation84_spill]] %s15328_s12 }
   0xe   :  { %15440 = sst [smem:[#allocation85_spill]] %s15329_s13 }
   0xf   :  { %18 = vsyncpa [#allocation7], 0 }
  0x10   :  { %20 = vsyncpa [#allocation7 + $0x1], 0 }
  0x11   :  { %21 = vsyncpa [#allocation10], 0 }
  0x12   :  { %23 = vsyncpa [#allocation10 + $0x1], 0 }
  0x13   :  { %24 = vsyncpa [#allocation13], 0 }
  0x14   :  { %26 = vsyncpa [#allocation13 + $0x1], 0 }
  0x15   :  { %27 = vsyncpa [#allocation16], 0 }
  0x16   :  { %29 = vsyncpa [#allocation16 + $0x1], 0 }
  0x17   :  { %30 = vsyncpa [#allocation8], 0 }
  0x18   :  { %32 = vsyncpa [#allocation8 + $0x1], 0  ;;  %s12144_s25 = smov 0   ;;  %s12146_s26 = smov 0  }
  0x19   :  { %s12148_s27 = smov 0   ;;  %s12150_s28 = smov 0  }
  0x1a   :  { %s12152_s29 = smov 0   ;;  %s12154_s30 = smov 0  }
  0x1b   :  { %s12156_s14 = smov 0   ;;  %s12158_s15 = smov 0  }
  0x1c   :  { %s12160_s16 = smov 0   ;;  %s12162_s17 = smov 0  }
  0x1d   :  { %s12164_s18 = smov 0   ;;  %s12166_s19 = smov 0  }
  0x1e   :  { %s12168_s20 = smov 0   ;;  %s12170_s21 = smov 0  }
  0x1f   :  { %s12172_s22 = smov 0   ;;  %s12174_s23 = smov 0  }
  0x20   :  { %s12176_s24 = smov 0   ;;  %s12178_s13 = smov 0  }
  0x21   :  { %s12180_s12 = smov 0   ;;  %s12182_s10 = smov 0  }
  0x22 LB: > { %15441 = sst [smem:[#allocation25_spill]] %s11982_s25  ;;  %s12245_s11 = sadd.s32 4294967295, %s12058_s10   ;;  %s12058_s10 = sphi %s12182_s10, %s38_s10   ;;  %s12054_s12 = sphi %s12180_s12, %s15692_s12   ;;  %s12050_s13 = sphi %s12178_s13, %s15690_s13   ;;  %s12046_s24 = sphi %s12176_s24, %s15689_s24   ;;  %s12042_s23 = sphi %s12174_s23, %s15688_s23   ;;  %s12038_s22 = sphi %s12172_s22, %s15699_s22   ;;  %s12034_s21 = sphi %s12170_s21, %s15686_s21   ;;  %s12030_s20 = sphi %s12168_s20, %s15685_s20   ;;  %s12026_s19 = sphi %s12166_s19, %s15684_s19   ;;  %s12022_s18 = sphi %s12164_s18, %s15683_s18   ;;  %s12018_s17 = sphi %s12162_s17, %s15682_s17   ;;  %s12014_s16 = sphi %s12160_s16, %s15698_s16   ;;  %s12010_s15 = sphi %s12158_s15, %s15697_s15   ;;  %s12006_s14 = sphi %s12156_s14, %s15696_s14   ;;  %s12002_s30 = sphi %s12154_s30, %s15695_s30   ;;  %s11998_s29 = sphi %s12152_s29, %s15680_s29   ;;  %s11994_s28 = sphi %s12150_s28, %s15693_s28   ;;  %s11990_s27 = sphi %s12148_s27, %s15691_s27   ;;  %s11986_s26 = sphi %s12146_s26, %s15678_s26   ;;  %s11982_s25 = sphi %s12144_s25, %s15677_s25  }
  0x23   : > { %15442 = sst [smem:[#allocation26_spill]] %s11986_s26  ;;  %s12248_s7 = sadd.s32 1, %s12050_s13 }
  0x24   : > { %15443 = sst [smem:[#allocation27_spill]] %s11990_s27  ;;  %p48_p0 = scmp.ge.s32.totalorder %s12248_s7, 4 }
  0x25   : > { %15444 = sst [smem:[#allocation28_spill]] %s11994_s28  ;;  %p15350_p1 = scmp.eq.s32.totalorder %s12058_s10, 0 }
  0x26   : > { %15445 = sst [smem:[#allocation29_spill]] %s11998_s29  ;;  %p15349_p2 = scmp.eq.s32.totalorder %s12245_s11, 0 }
  0x27   : > { %15446 = sst [smem:[#allocation30_spill]] %s12002_s30  ;;  %s8933_s9 = sadd.s32 4294967295, %s12050_s13 }
  0x28   : > { %15447 = sst [smem:[#allocation31_spill]] %s12006_s14  ;;  %p83_p4 = scmp.gt.s32.totalorder %s8933_s9, 0 }
  0x29   : > { %15448 = sst [smem:[#allocation32_spill]] %s12010_s15  ;;  %p100_p6 = scmp.ne.s32.totalorder %s12026_s19, %s12022_s18 }
  0x2a   : > { %15449 = sst [smem:[#allocation33_spill]] %s12022_s18  ;;  %s15705_s9 = smov (!%p83_p4, %s8933_s9), 0 }
  0x2b   : > { %15450 = sst [smem:[#allocation34_spill]] %s12026_s19  ;;  %p12271_p7 = por %p100_p6, %p15350_p1 }
  0x2c   : > { %15451 = sst [smem:[#allocation35_spill]] %s12030_s20  ;;  %p106_p8 = scmp.ne.s32.totalorder %s12022_s18, %s12018_s17 }
  0x2d   : > { %15452 = sst [smem:[#allocation36_spill]] %s12034_s21  ;;  %p15348_p11 = scmp.lt.s32.totalorder %s12058_s10, 8 }
  0x2e   : > { %15453 = sst [smem:[#allocation37_spill]] %s12038_s22  ;;  %p12280_p9 = por %p106_p8, %p15349_p2 }
  0x2f   : > { %15454 = sst [smem:[#allocation38_spill]] %s12042_s23  ;;  %s93_s23 = sadd.s32 1, %s12026_s19 }
  0x30   : > { %15455 = sst [smem:[#allocation39_spill]] %s12046_s24  ;;  %s50_s24 = sadd.s32 1, %s12054_s12 }
  0x31   : > { %15456 = sst [smem:[#allocation40_spill]] %s12050_s13  ;;  %s15701_s24 = smov (!%p48_p0, %s50_s24), %s12054_s12 }
  0x32   : > { %15457 = sst [smem:[#allocation41_spill]] %s12054_s12  ;;  %p52_p3 = scmp.ge.s32.totalorder %s15701_s24, 2 }
  0x33   : > { %s12255_s8 = scalar_select %p48_p0, 0, %s12248_s7  }
  0x34   : > { %s15703_s24 = smov (%p52_p3, %s15701_s24), 0  ;;  %s15355_s17 = sand.u32 1, %s12058_s10  }
  0x35   : > { %15458 = sst [smem:[#allocation42_spill]] %s12255_s8  ;;  %s8934_s6 = sadd.s32 4294967295, %s12255_s8 }
  0x36   : > { %p86_p5 = scmp.gt.s32.totalorder %s8934_s6, 0  ;;  %15459 = sst [smem:[#allocation43_spill]] %s15703_s24 }
  0x37   : > { %s12265_s5 = ssub.s32 %s12054_s12, %s15703_s24  ;;  %s12286_s24 = sshll.u32 %s12054_s12, 3 }
  0x38   : > { %s15707_s6 = smov (!%p86_p5, %s8934_s6), 0  ;;  %s8949_s18 = sshll.u32 %s15705_s9, 1 }
  0x39   : > { %s89_s27 = ssub.s32 %s15705_s9, %s15707_s6  ;;  %s485_s6 = sand.u32 1, %s12026_s19  }
  0x3a   : > { %s90_s26 = sor.u32 %s89_s27, %s12265_s5  ;;  %s8947_s27 = sshll.u32 %s485_s6, 4 }
  0x3b   : > { %s15461_s4 = scalar_select %p12280_p9, 1, 0 }
  0x3c   : > { %p91_p10 = scmp.eq.s32.totalorder %s90_s26, 0  ;;  %s496_s29 = sadd.s32 %s8949_s18, %s12286_s24 }
  0x3d   : > { %15462 = sst [smem:[#allocation44_spill]] %s15461_s4  ;;  %s8951_s30 = sshll.u32 %s496_s29, 7 }
  0x3e   : > { %s12289_s28 = scalar_select %p91_p10, %s12026_s19, %s93_s23  }
  0x3f   : > { %s487_s2 = scalar_lea.vmem [#allocation9], %s8947_s27  ;;  %s15464_s1 = sld [smem:[#allocation73_spill]] }
  0x40   : > { %15463 = sst [smem:[#allocation45_spill]] %s12289_s28  ;;  %s499_s14 = sshll.u32 %s487_s2, 4  ;;  %s12299_s14 = int_to_ptr.vmem [resolvable:$true] %s499_s14 }
  0x41   : > { %p12305_p12 = pnand %p15348_p11, %p12271_p7  ;;  %s12313_s2 = scalar_lea.sflag [#allocation10], %s15355_s17 }
  0x43   : > { %p11666_p4 = pneg %p12305_p12 }
  0x45   : > { %s12297_s26 = scalar_lea.hbm %s15464_s1, %s8951_s30  ;;  %s11669_s29 = scalar_lea.hbm %s15464_s1, 2048 }
  0x46   : > { %s11664_s4 = scalar_lea.hbm %s12297_s26, 256  ;;  %p11670_p7 = scmp.lt.u32.totalorder %s12297_s26, %s15464_s1 }
  0x47   : > { %p11665_p3 = scmp.ne.s32.totalorder %s12297_s26, %s11664_s4  ;;  %p11671_p8 = scmp.lt.u32.totalorder %s11669_s29, %s11664_s4 }
  0x48   : > { %p11673_p11 = scmp.lt.u32.totalorder %s11664_s4, %s12297_s26 }
  0x49   : > { %p11667_p5 = pnand %p11666_p4, %p11665_p3  ;;  %p11672_p10 = por %p11671_p8, %p11670_p7 }
  0x4b   : > { %p11668_p6 = pneg %p11667_p5  ;;  %p11674_p2 = por %p11673_p11, %p11672_p10 }
  0x4d   : > { %p11675_p1 = pnand %p11674_p2, %p11668_p6 }
  0x4f   : > { %11678 = shalt.err (!%p11675_p1)
}
  0x50   : > { %s11679_s18 = scalar_lea.vmem %s12299_s14, 256  ;;  %s12060_s6 = smov [#allocation9]  }
  0x51   : > { %p11680_p3 = scmp.ne.s32.totalorder %s12299_s14, %s11679_s18  ;;  %s11684_s27 = sshll.u32 %s12060_s6, 4  ;;  %s11685_s27 = int_to_ptr.vmem [resolvable:$false] %s11684_s27 }
  0x52   : > { %s11686_s9 = scalar_lea.vmem %s11685_s27, 512  ;;  %p11687_p0 = scmp.lt.s32.totalorder %s12299_s14, %s11685_s27 }
  0x53   : > { %p11682_p5 = pnand %p11680_p3, %p11666_p4  ;;  %p11688_p7 = scmp.lt.s32.totalorder %s11686_s9, %s11679_s18 }
  0x55   : > { %p11683_p13 = pneg %p11682_p5  ;;  %p11689_p8 = por %p11688_p7, %p11687_p0 }
  0x57   : > { %p11690_p11 = pnand %p11689_p8, %p11683_p13 }
  0x59   : > { %11693 = shalt.err (!%p11690_p11)
}
  0x5a   : > { %s15351_s4 = smov 128   ;;  %s15353_s25 = smov 8  }
  0x5b   : > { %11472 = dma.hbm_to_vmem [thread:$0]  (!%p12305_p12), %s12297_s26, 256, %s12299_s14, %s12313_s2, %s15351_s4, %s15351_s4, %s15353_s25  }
  0x5c   : > { %p15466_p1 = scmp.lt.s32.totalorder %s12058_s10, 9  ;;  %p15467_p2 = scmp.ge.s32.totalorder %s12058_s10, 1 }
  0x5d   : > { %s8932_s30 = sadd.s32 4294967294, %s12058_s10   ;;  %s55_s15 = ssub.s32 %s12050_s13, %s12255_s8 }
  0x5e   : > { %p12348_p13 = pnand %p15467_p2, %p15466_p1  ;;  %s59_s18 = sadd.s32 1, %s12038_s22 }
  0x5f   : > { %s56_s6 = sor.u32 %s55_s15, %s12265_s5  ;;  %p66_p0 = scmp.ne.s32.totalorder %s12038_s22, %s12034_s21 }
  0x60   : > { %p57_p4 = scmp.eq.s32.totalorder %s56_s6, 0  ;;  %p72_p6 = scmp.ne.s32.totalorder %s12034_s21, %s12030_s20 }
  0x61   : > { %p15469_p10 = scmp.eq.s32.totalorder %s12058_s10, 0  ;;  %p413_p5 = scmp.eq.s32.totalorder %s12245_s11, 7 }
  0x62   : > { %s12365_s14 = scalar_select %p57_p4, %s12038_s22, %s59_s18  }
  0x63   : > { %p68_p3 = por %p15469_p10, %p66_p0  ;;  %p15471_p12 = scmp.eq.s32.totalorder %s12245_s11, 0 }
  0x64   : > { %15470 = sst [smem:[#allocation46_spill]] %s12365_s14  ;;  %p12373_p8 = por %p413_p5, %p66_p0 }
  0x65   : > { %p12369_p7 = por %p15471_p12, %p72_p6  ;;  %p419_p11 = scmp.eq.s32.totalorder %s8932_s30, 7 }
  0x66   : > { %s15474_s23 = scalar_select %p12373_p8, 1, 0 }
  0x67   : > { %s15472_s26 = scalar_select %p12369_p7, 1, 0 }
  0x68   : > { %15475 = sst [smem:[#allocation48_spill]] %s15474_s23  ;;  %s12378_s27 = sand.u32 1, %s12038_s22  }
  0x69   : > { %15473 = sst [smem:[#allocation47_spill]] %s15472_s26  ;;  %p15476_p1 = scmp.lt.s32.totalorder %s12058_s10, 8 }
  0x6a   : > { %p12386_p4 = por %p419_p11, %p72_p6  ;;  %s8956_s18 = sshll.u32 %s12378_s27, 6 }
  0x6b   : > { %p12382_p2 = pnand %p15476_p1, %p68_p3  ;;  %s9520_s6 = sshll.u32 %s12050_s13, 3 }
  0x6c   : > { %s15478_s15 = scalar_select %p12386_p4, 1, 0 }
  0x6d   : > { %s12393_s4 = sshll.u32 %s12054_s12, 5  ;;  %s539_s25 = scalar_lea.vmem [#allocation12], %s8956_s18 }
  0x6e   : > { %15479 = sst [smem:[#allocation49_spill]] %s15478_s15  ;;  %s546_s30 = sadd.s32 %s9520_s6, %s12393_s4 }
  0x6f   : > { %s549_s17 = sshll.u32 %s539_s25, 4  ;;  %s8960_s1 = sshll.u32 %s546_s30, 7  ;;  %s12396_s17 = int_to_ptr.vmem [resolvable:$true] %s549_s17 }
  0x70   : > { %s15480_s3 = sld [smem:[#allocation75_spill]]  ;;  %s15481_s19 = sand.u32 1, %s12058_s10  }
  0x71   : > { %s12405_s15 = scalar_lea.sflag [#allocation13], %s15481_s19  ;;  %p11696_p6 = pneg %p12382_p2 }
  0x76   : > { %s12401_s28 = scalar_lea.hbm %s15480_s3, %s8960_s1  ;;  %s11699_s1 = scalar_lea.hbm %s15480_s3, 8192 }
  0x77   : > { %s11694_s12 = scalar_lea.hbm %s12401_s28, 1024  ;;  %p11700_p5 = scmp.lt.u32.totalorder %s12401_s28, %s15480_s3 }
  0x78   : > { %p11695_p0 = scmp.ne.s32.totalorder %s12401_s28, %s11694_s12  ;;  %p11701_p12 = scmp.lt.u32.totalorder %s11699_s1, %s11694_s12 }
  0x79   : > { %p11703_p1 = scmp.lt.u32.totalorder %s11694_s12, %s12401_s28 }
  0x7a   : > { %p11697_p10 = pnand %p11696_p6, %p11695_p0  ;;  %p11702_p11 = por %p11701_p12, %p11700_p5 }
  0x7c   : > { %p11698_p3 = pneg %p11697_p10  ;;  %p11704_p4 = por %p11703_p1, %p11702_p11 }
  0x7e   : > { %p11705_p8 = pnand %p11704_p4, %p11698_p3 }
  0x80   : > { %11708 = shalt.err (!%p11705_p8)
}
  0x81   : > { %s11709_s19 = scalar_lea.vmem %s12396_s17, 1024  ;;  %s12063_s6 = smov [#allocation12]  }
  0x82   : > { %p11710_p0 = scmp.ne.s32.totalorder %s12396_s17, %s11709_s19  ;;  %s11714_s30 = sshll.u32 %s12063_s6, 4  ;;  %s11715_s30 = int_to_ptr.vmem [resolvable:$false] %s11714_s30 }
  0x83   : > { %s11716_s25 = scalar_lea.vmem %s11715_s30, 2048  ;;  %p11717_p7 = scmp.lt.s32.totalorder %s12396_s17, %s11715_s30 }
  0x84   : > { %p11712_p10 = pnand %p11710_p0, %p11696_p6  ;;  %p11718_p5 = scmp.lt.s32.totalorder %s11716_s25, %s11709_s19 }
  0x86   : > { %p11713_p9 = pneg %p11712_p10  ;;  %p11719_p12 = por %p11718_p5, %p11717_p7 }
  0x88   : > { %p11720_p11 = pnand %p11719_p12, %p11713_p9 }
  0x8a   : > { %11723 = shalt.err (!%p11720_p11)
}
  0x8b   : > { %s15482_s12 = smov 8   ;;  %s15483_s18 = smov 128  }
  0x8c   : > { %11478 = dma.hbm_to_vmem [thread:$0]  (!%p12382_p2), %s12401_s28, 1024, %s12396_s17, %s12405_s15, %s15483_s18, %s15483_s18, %s15482_s12  }
  0x8d   : > { %s12437_s1 = sshll.u32 %s12050_s13, 1  ;;  %s15365_s14 = sshll.u32 %s12255_s8, 1 }
  0x8e   : > { %s8936_s22 = sadd.s32 4294967295, %s12437_s1  ;;  %s8938_s19 = sadd.s32 4294967295, %s15365_s14 }
  0x8f   : > { %p180_p9 = scmp.gt.s32.totalorder %s8936_s22, 0  ;;  %p184_p7 = scmp.gt.s32.totalorder %s8938_s19, 0 }
  0x90   : > { %s8943_s6 = sshll.u32 %s12378_s27, 4  ;;  %s470_s30 = sadd.s32 %s12286_s24, %s12437_s1 }
  0x91   : > { %s15709_s22 = smov (!%p180_p9, %s8936_s22), 0  ;;  %s15711_s19 = smov (!%p184_p7, %s8938_s19), 0 }
  0x92   : > { %s187_s25 = ssub.s32 %s15709_s22, %s15711_s19  ;;  %s8946_s17 = sshll.u32 %s470_s30, 7 }
  0x93   : > { %s12450_s28 = sor.u32 %s187_s25, %s12265_s5  ;;  %s15484_s0 = sld [smem:[#allocation72_spill]] }
  0x94   : > { %s464_s14 = scalar_lea.vmem [#allocation6], %s8943_s6  ;;  %s461_s26 = scalar_lea.sflag [#allocation7], %s12378_s27 }
  0x95   : > { %s473_s23 = sshll.u32 %s464_s14, 4  ;;  %s12458_s23 = int_to_ptr.vmem [resolvable:$true] %s473_s23 }
  0x99   : > { %s12456_s20 = scalar_lea.hbm %s15484_s0, %s8946_s17  ;;  %s11729_s3 = scalar_lea.hbm %s15484_s0, 2048 }
  0x9a   : > { %s11724_s19 = scalar_lea.hbm %s12456_s20, 256  ;;  %p11730_p0 = scmp.lt.u32.totalorder %s12456_s20, %s15484_s0 }
  0x9b   : > { %p11725_p4 = scmp.ne.s32.totalorder %s12456_s20, %s11724_s19  ;;  %p11731_p10 = scmp.lt.u32.totalorder %s11729_s3, %s11724_s19 }
  0x9c   : > { %p11733_p12 = scmp.lt.u32.totalorder %s11724_s19, %s12456_s20 }
  0x9d   : > { %p11727_p3 = pnand %p11725_p4, %p11696_p6  ;;  %p11732_p5 = por %p11731_p10, %p11730_p0 }
  0x9f   : > { %p11728_p1 = pneg %p11727_p3  ;;  %p11734_p11 = por %p11733_p12, %p11732_p5 }
  0xa1   : > { %p11735_p9 = pnand %p11734_p11, %p11728_p1 }
  0xa3   : > { %11738 = shalt.err (!%p11735_p9)
}
  0xa4   : > { %s11739_s14 = scalar_lea.vmem %s12458_s23, 256  ;;  %s12064_s6 = smov [#allocation6]  }
  0xa5   : > { %p11740_p7 = scmp.ne.s32.totalorder %s12458_s23, %s11739_s14  ;;  %s11744_s30 = sshll.u32 %s12064_s6, 4  ;;  %s11745_s30 = int_to_ptr.vmem [resolvable:$false] %s11744_s30 }
  0xa6   : > { %s11746_s25 = scalar_lea.vmem %s11745_s30, 512  ;;  %p11747_p8 = scmp.lt.s32.totalorder %s12458_s23, %s11745_s30 }
  0xa7   : > { %p11742_p4 = pnand %p11740_p7, %p11696_p6  ;;  %p11748_p0 = scmp.lt.s32.totalorder %s11746_s25, %s11739_s14 }
  0xa9   : > { %p11743_p3 = pneg %p11742_p4  ;;  %p11749_p10 = por %p11748_p0, %p11747_p8 }
  0xab   : > { %p11750_p5 = pnand %p11749_p10, %p11743_p3 }
  0xad   : > { %11753 = shalt.err (!%p11750_p5)
}
  0xae   : > { %s15485_s19 = sld [smem:[#allocation32_spill]]  ;;  %s15486_s3 = sld [smem:[#allocation31_spill]] }
  0xaf   : > { %11469 = dma.hbm_to_vmem [thread:$0]  (!%p12382_p2), %s12456_s20, 256, %s12458_s23, %s461_s26, %s15483_s18, %s15483_s18, %s15482_s12  }
  0xb0   : > { %p117_p6 = scmp.lt.s32.totalorder %s12248_s7, 3  ;;  %s119_s9 = sadd.s32 1, %s12255_s8 }
  0xb1   : > { %p120_p8 = scmp.lt.s32.totalorder %s119_s9, 3  ;;  %s127_s27 = sadd.s32 1, %s12014_s16 }
  0xb2   : > { %s15713_s7 = smov (!%p117_p6, %s12248_s7), 3  ;;  %s511_s17 = sand.u32 1, %s12014_s16  }
  0xb3   : > { %s15715_s9 = smov (!%p120_p8, %s119_s9), 3  ;;  %p15487_p11 = scmp.eq.s32.totalorder %s12058_s10, 0 }
  0xb4   : > { %p134_p1 = scmp.ne.s32.totalorder %s12014_s16, %s15485_s19  ;;  %p140_p12 = scmp.ne.s32.totalorder %s15485_s19, %s15486_s3 }
  0xb5   : > { %s123_s13 = ssub.s32 %s15713_s7, %s15715_s9  ;;  %p15488_p4 = scmp.eq.s32.totalorder %s12245_s11, 0 }
  0xb6   : > { %s124_s14 = sor.u32 %s123_s13, %s12265_s5  ;;  %p136_p9 = por %p134_p1, %p15487_p11 }
  0xb7   : > { %p125_p7 = scmp.eq.s32.totalorder %s124_s14, 0  ;;  %p12503_p3 = por %p140_p12, %p15488_p4 }
  0xb8   : > { %s8952_s26 = sshll.u32 %s511_s17, 4  ;;  %s8953_s23 = sshll.u32 %s15713_s7, 1 }
  0xb9   : > { %s15489_s20 = scalar_select %p12503_p3, 1, 0 }
  0xba   : > { %s12508_s6 = scalar_select %p125_p7, %s12014_s16, %s127_s27  }
  0xbb   : > { %s522_s30 = sadd.s32 %s8953_s23, %s12286_s24  ;;  %s513_s0 = scalar_lea.vmem [#allocation11], %s8952_s26 }
  0xbc   : > { %s8955_s25 = sshll.u32 %s522_s30, 7  ;;  %s525_s19 = sshll.u32 %s513_s0, 4  ;;  %s12516_s19 = int_to_ptr.vmem [resolvable:$true] %s525_s19 }
  0xbd   : > { %s15490_s21 = sld [smem:[#allocation74_spill]]  ;;  %p15492_p2 = scmp.lt.s32.totalorder %s12058_s10, 8 }
  0xbf   : > { %p12520_p0 = pnand %p15492_p2, %p136_p9 }
  0xc1   : > { %p11756_p5 = pneg %p12520_p0 }
  0xc3   : > { %s15491_s8 = smov %s15490_s21  ;;  %s12514_s13 = scalar_lea.hbm %s15490_s21, %s8955_s25 }
  0xc4   : > { %s11754_s24 = scalar_lea.hbm %s12514_s13, 256  ;;  %s11759_s27 = scalar_lea.hbm %s15491_s8, 2048 }
  0xc5   : > { %p11755_p10 = scmp.ne.s32.totalorder %s12514_s13, %s11754_s24  ;;  %p11760_p1 = scmp.lt.u32.totalorder %s12514_s13, %s15491_s8 }
  0xc6   : > { %p11761_p12 = scmp.lt.u32.totalorder %s11759_s27, %s11754_s24  ;;  %p11763_p9 = scmp.lt.u32.totalorder %s11754_s24, %s12514_s13 }
  0xc7   : > { %p11757_p6 = pnand %p11756_p5, %p11755_p10 }
  0xc8   : > { %p11762_p11 = por %p11761_p12, %p11760_p1 }
  0xc9   : > { %p11758_p8 = pneg %p11757_p6 }
  0xca   : > { %p11764_p7 = por %p11763_p9, %p11762_p11 }
  0xcc   : > { %p11765_p4 = pnand %p11764_p7, %p11758_p8 }
  0xce   : > { %11768 = shalt.err (!%p11765_p4)
}
  0xcf   : > { %s11769_s26 = scalar_lea.vmem %s12516_s19, 256  ;;  %s12065_s23 = smov [#allocation11]  }
  0xd0   : > { %p11770_p2 = scmp.ne.s32.totalorder %s12516_s19, %s11769_s26  ;;  %s11774_s30 = sshll.u32 %s12065_s23, 4  ;;  %s11775_s30 = int_to_ptr.vmem [resolvable:$false] %s11774_s30 }
  0xd1   : > { %s11776_s25 = scalar_lea.vmem %s11775_s30, 512  ;;  %p11777_p3 = scmp.lt.s32.totalorder %s12516_s19, %s11775_s30 }
  0xd2   : > { %p11772_p10 = pnand %p11770_p2, %p11756_p5  ;;  %p11778_p1 = scmp.lt.s32.totalorder %s11776_s25, %s11769_s26 }
  0xd4   : > { %p11773_p6 = pneg %p11772_p10  ;;  %p11779_p12 = por %p11778_p1, %p11777_p3 }
  0xd6   : > { %p11780_p11 = pnand %p11779_p12, %p11773_p6 }
  0xd8   : > { %11783 = shalt.err (!%p11780_p11)
}
  0xd9   : > { %s15494_s3 = sld [smem:[#allocation30_spill]]  ;;  %s15495_s9 = sld [smem:[#allocation29_spill]] }
  0xda   : > { %s15496_s24 = sld [smem:[#allocation28_spill]]  ;;  %p15497_p5 = scmp.eq.s32.totalorder %s12450_s28, 0 }
  0xdb   : > { %11475 = dma.hbm_to_vmem [thread:$0]  (!%p12520_p0), %s12514_s13, 256, %s12516_s19, %s12313_s2, %s15483_s18, %s15483_s18, %s15482_s12  }
  0xdc   : > { %p15498_p8 = scmp.eq.s32.totalorder %s12058_s10, 0  ;;  %s9521_s27 = sshll.u32 %s15709_s22, 2 }
  0xdd   : > { %p15499_p4 = scmp.eq.s32.totalorder %s12245_s11, 0  ;;  %s574_s26 = sadd.s32 %s9521_s27, %s12393_s4 }
  0xde   : > { %s8967_s23 = sshll.u32 %s574_s26, 7  ;;  %s15501_s28 = sld [smem:[#allocation76_spill]] }
  0xdf   : > { %s191_s7 = sadd.s32 1, %s15494_s3  ;;  %p198_p3 = scmp.ne.s32.totalorder %s15494_s3, %s15495_s9 }
  0xe0   : > { %s12559_s0 = scalar_select %p15497_p5, %s15494_s3, %s191_s7  }
  0xe1   : > { %p200_p9 = por %p198_p3, %p15498_p8  ;;  %p204_p7 = scmp.ne.s32.totalorder %s15495_s9, %s15496_s24 }
  0xe2   : > { %s561_s21 = sand.u32 1, %s15494_s3   ;;  %p15503_p0 = scmp.lt.s32.totalorder %s12058_s10, 8 }
  0xe3   : > { %p12569_p2 = por %p204_p7, %p15499_p4  ;;  %s8961_s14 = sshll.u32 %s561_s21, 5 }
  0xe4   : > { %s563_s2 = scalar_lea.vmem [#allocation14], %s8961_s14  ;;  %s15502_s8 = smov %s15501_s28 }
  0xe5   : > { %s15500_s17 = scalar_select %p12569_p2, 1, 0 }
  0xe6   : > { %s577_s19 = sshll.u32 %s563_s2, 4  ;;  %s12577_s25 = scalar_lea.hbm %s15501_s28, %s8967_s23  ;;  %s12579_s19 = int_to_ptr.vmem [resolvable:$true] %s577_s19 }
  0xe7   : > { %p12583_p10 = pnand %p15503_p0, %p200_p9  ;;  %s11784_s3 = scalar_lea.hbm %s12577_s25, 512 }
  0xe8   : > { %p11785_p6 = scmp.ne.s32.totalorder %s12577_s25, %s11784_s3  ;;  %s11789_s7 = scalar_lea.hbm %s15502_s8, 8192 }
  0xe9   : > { %p11786_p1 = pneg %p12583_p10  ;;  %p11790_p3 = scmp.lt.u32.totalorder %s12577_s25, %s15502_s8 }
  0xea   : > { %p11791_p5 = scmp.lt.u32.totalorder %s11789_s7, %s11784_s3  ;;  %p11793_p9 = scmp.lt.u32.totalorder %s11784_s3, %s12577_s25 }
  0xeb   : > { %p11787_p12 = pnand %p11786_p1, %p11785_p6 }
  0xec   : > { %p11792_p8 = por %p11791_p5, %p11790_p3 }
  0xed   : > { %p11788_p11 = pneg %p11787_p12 }
  0xee   : > { %p11794_p7 = por %p11793_p9, %p11792_p8 }
  0xf0   : > { %p11795_p4 = pnand %p11794_p7, %p11788_p11 }
  0xf2   : > { %11798 = shalt.err (!%p11795_p4)
}
  0xf3   : > { %s11799_s14 = scalar_lea.vmem %s12579_s19, 512  ;;  %s12066_s26 = smov [#allocation14]  }
  0xf4   : > { %p11800_p0 = scmp.ne.s32.totalorder %s12579_s19, %s11799_s14  ;;  %s11804_s23 = sshll.u32 %s12066_s26, 4  ;;  %s11805_s23 = int_to_ptr.vmem [resolvable:$false] %s11804_s23 }
  0xf5   : > { %s11806_s2 = scalar_lea.vmem %s11805_s23, 1024  ;;  %p11807_p2 = scmp.lt.s32.totalorder %s12579_s19, %s11805_s23 }
  0xf6   : > { %p11802_p6 = pnand %p11800_p0, %p11786_p1  ;;  %p11808_p3 = scmp.lt.s32.totalorder %s11806_s2, %s11799_s14 }
  0xf8   : > { %p11803_p12 = pneg %p11802_p6  ;;  %p11809_p5 = por %p11808_p3, %p11807_p2 }
  0xfa   : > { %p11810_p8 = pnand %p11809_p5, %p11803_p12 }
  0xfc   : > { %11813 = shalt.err (!%p11810_p8)
}
  0xfd   : > { %s15505_s13 = sld [smem:[#allocation42_spill]]  ;;  %s15506_s30 = sld [smem:[#allocation26_spill]] }
  0xfe   : > { %s15507_s28 = sld [smem:[#allocation27_spill]]  ;;  %s15508_s3 = sld [smem:[#allocation25_spill]] }
  0xff   : > { %11481 = dma.hbm_to_vmem [thread:$0]  (!%p12583_p10), %s12577_s25, 512, %s12579_s19, %s12405_s15, %s15483_s18, %s15483_s18, %s15482_s12  }
 0x100   : > { %s9517_s9 = sadd.s32 2, %s12437_s1  ;;  %p15510_p7 = scmp.eq.s32.totalorder %s12245_s11, 0 }
 0x101   : > { %p216_p2 = scmp.lt.s32.totalorder %s9517_s9, 7  ;;  %p15512_p0 = scmp.eq.s32.totalorder %s12058_s10, 0 }
 0x102   : > { %p15514_p12 = scmp.lt.s32.totalorder %s12058_s10, 8 }
 0x103   : > { %s15509_s22 = sshll.u32 %s15505_s13, 1  ;;  %s15717_s9 = smov (!%p216_p2, %s9517_s9), 7 }
 0x104   : > { %s9519_s24 = sadd.s32 2, %s15509_s22  ;;  %p234_p11 = scmp.ne.s32.totalorder %s15507_s28, %s15506_s30 }
 0x105   : > { %p220_p1 = scmp.lt.s32.totalorder %s9519_s24, 7  ;;  %s227_s7 = sadd.s32 1, %s15507_s28 }
 0x106   : > { %p240_p9 = scmp.ne.s32.totalorder %s15506_s30, %s15508_s3  ;;  %s587_s27 = sand.u32 1, %s15507_s28  }
 0x107   : > { %s15719_s24 = smov (!%p220_p1, %s9519_s24), 7  ;;  %p236_p6 = por %p234_p11, %p15512_p0 }
 0x108   : > { %s223_s21 = ssub.s32 %s15717_s9, %s15719_s24  ;;  %p12628_p4 = por %p240_p9, %p15510_p7 }
 0x109   : > { %s224_s14 = sor.u32 %s223_s21, %s12265_s5  ;;  %s8968_s15 = sshll.u32 %s587_s27, 5 }
 0x10a   : > { %s15511_s26 = scalar_select %p12628_p4, 1, 0 }
 0x10b   : > { %p225_p10 = scmp.eq.s32.totalorder %s224_s14, 0  ;;  %s9524_s1 = sshll.u32 %s15717_s9, 2 }
 0x10c   : > { %s602_s19 = sadd.s32 %s9524_s1, %s12393_s4  ;;  %s591_s23 = scalar_lea.vmem [#allocation15], %s8968_s15 }
 0x10d   : > { %s15721_s28 = smov (!%p225_p10, %s15507_s28), %s227_s7  ;;  %s8973_s25 = sshll.u32 %s602_s19, 7 }
 0x10e   : > { %s605_s2 = sshll.u32 %s591_s23, 4  ;;  %s15513_s3 = sld [smem:[#allocation77_spill]]  ;;  %s12643_s2 = int_to_ptr.vmem [resolvable:$true] %s605_s2 }
 0x10f   : > { %p12647_p3 = pnand %p15514_p12, %p236_p6  ;;  %s12651_s4 = scalar_lea.sflag [#allocation16], %s587_s27 }
 0x111   : > { %p11816_p8 = pneg %p12647_p3 }
 0x114   : > { %s12641_s5 = scalar_lea.hbm %s15513_s3, %s8973_s25  ;;  %s11819_s21 = scalar_lea.hbm %s15513_s3, 8192 }
 0x115   : > { %s11814_s22 = scalar_lea.hbm %s12641_s5, 512  ;;  %p11820_p11 = scmp.lt.u32.totalorder %s12641_s5, %s15513_s3 }
 0x116   : > { %p11815_p5 = scmp.ne.s32.totalorder %s12641_s5, %s11814_s22  ;;  %p11821_p9 = scmp.lt.u32.totalorder %s11819_s21, %s11814_s22 }
 0x117   : > { %p11823_p10 = scmp.lt.u32.totalorder %s11814_s22, %s12641_s5 }
 0x118   : > { %p11817_p2 = pnand %p11816_p8, %p11815_p5  ;;  %p11822_p7 = por %p11821_p9, %p11820_p11 }
 0x11a   : > { %p11818_p1 = pneg %p11817_p2  ;;  %p11824_p0 = por %p11823_p10, %p11822_p7 }
 0x11c   : > { %p11825_p6 = pnand %p11824_p0, %p11818_p1 }
 0x11e   : > { %11828 = shalt.err (!%p11825_p6)
}
 0x11f   : > { %s11829_s27 = scalar_lea.vmem %s12643_s2, 512  ;;  %s12067_s1 = smov [#allocation15]  }
 0x120   : > { %p11830_p12 = scmp.ne.s32.totalorder %s12643_s2, %s11829_s27  ;;  %s11834_s19 = sshll.u32 %s12067_s1, 4  ;;  %s11835_s19 = int_to_ptr.vmem [resolvable:$false] %s11834_s19 }
 0x121   : > { %s11836_s25 = scalar_lea.vmem %s11835_s19, 1024  ;;  %p11837_p4 = scmp.lt.s32.totalorder %s12643_s2, %s11835_s19 }
 0x122   : > { %p11832_p5 = pnand %p11830_p12, %p11816_p8  ;;  %p11838_p11 = scmp.lt.s32.totalorder %s11836_s25, %s11829_s27 }
 0x124   : > { %p11833_p2 = pneg %p11832_p5  ;;  %p11839_p9 = por %p11838_p11, %p11837_p4 }
 0x126   : > { %p11840_p7 = pnand %p11839_p9, %p11833_p2 }
 0x128   : > { %11843 = shalt.err (!%p11840_p7)
}
 0x129   : > { %11484 = dma.hbm_to_vmem [thread:$0]  (!%p12647_p3), %s12641_s5, 512, %s12643_s2, %s12651_s4, %s15483_s18, %s15483_s18, %s15482_s12  }
 0x12a   : > { %617 = sbr.rel (%p12348_p13) target bundleno = 1891 (0x763), region = 72 }
 0x131   : > { %s15516_s23 = sld [smem:[#allocation36_spill]]  ;;  %s15517_s13 = sld [smem:[#allocation47_spill]] }
 0x137   : > { %s12685_s30 = sand.u32 1, %s15516_s23   ;;  %p15518_p4 = scmp.ne.s32.totalorder %s15517_s13, 0 }
 0x138   : > { %s8975_s22 = sshll.u32 %s12685_s30, 4  ;;  %s620_s24 = scalar_lea.sflag [#allocation7], %s12685_s30 }
 0x139   : > { %s12689_s7 = scalar_lea.vmem [#allocation6], %s8975_s22 }
 0x13a   : > { %11953 = dma.done.wait (%p15518_p4), %s620_s24, 256  }
 0x13b   : > { %11955 = vsyncadd (%p15518_p4), %s620_s24, 4294967040  ;;  %s15519_s12 = sld [smem:[#allocation33_spill]]  ;;  %s628_s29 = sand.u32 1, %s12245_s11  }
 0x13c   : > { %s15520_s18 = sld [smem:[#allocation44_spill]]  ;;  %s629_s9 = scalar_lea.sflag [#allocation10], %s628_s29 }
 0x141   : > { %s630_s2 = sand.u32 1, %s15519_s12  }
 0x142   : > { %s12697_s5 = sshll.u32 %s630_s2, 4  ;;  %p15521_p13 = scmp.ne.s32.totalorder %s15520_s18, 0 }
 0x143   : > { %s632_s4 = scalar_lea.vmem [#allocation9], %s12697_s5 }
 0x144   : > { %11957 = dma.done.wait (%p15521_p13), %s629_s9, 256  }
 0x145   : > { %11959 = vsyncadd (%p15521_p13), %s629_s9, 4294967040  ;;  %s15522_s21 = sld [smem:[#allocation32_spill]]  ;;  %p15523_p3 = scmp.ne.s32.totalorder %s15489_s20, 0 }
 0x14b   : > { %s639_s14 = sand.u32 1, %s15522_s21  }
 0x14c   : > { %s12705_s15 = sshll.u32 %s639_s14, 4 }
 0x14d   : > { %s641_s27 = scalar_lea.vmem [#allocation11], %s12705_s15 }
 0x14e   : > { %11961 = dma.done.wait (%p15523_p3), %s629_s9, 256  }
 0x14f   : > { %11963 = vsyncadd (%p15523_p3), %s629_s9, 4294967040  ;;  %s15376_s11 = sshll.u32 %s12685_s30, 6  ;;  %s647_s1 = scalar_lea.sflag [#allocation13], %s628_s29 }
 0x150   : > { %s12715_s19 = scalar_lea.vmem [#allocation12], %s15376_s11 }
 0x151   : > { %11965 = dma.done.wait (%p15518_p4), %s647_s1, 1024  }
 0x152   : > { %11967 = vsyncadd (%p15518_p4), %s647_s1, 4294966272  ;;  %s15524_s25 = sld [smem:[#allocation29_spill]]  ;;  %p15525_p8 = scmp.ne.s32.totalorder %s15500_s17, 0 }
 0x158   : > { %s657_s23 = sand.u32 1, %s15524_s25  }
 0x159   : > { %s8979_s22 = sshll.u32 %s657_s23, 5 }
 0x15a   : > { %s12722_s24 = scalar_lea.vmem [#allocation14], %s8979_s22 }
 0x15b   : > { %11969 = dma.done.wait (%p15525_p8), %s647_s1, 512  }
 0x15c   : > { %11971 = vsyncadd (%p15525_p8), %s647_s1, 4294966784  ;;  %s15526_s20 = sld [smem:[#allocation26_spill]]  ;;  %p15527_p1 = scmp.ne.s32.totalorder %s15511_s26, 0 }
 0x162   : > { %s664_s12 = sand.u32 1, %s15526_s20  }
 0x163   : > { %s8980_s18 = sshll.u32 %s664_s12, 5  ;;  %s665_s29 = scalar_lea.sflag [#allocation16], %s664_s12 }
 0x164   : > { %s12729_s2 = scalar_lea.vmem [#allocation15], %s8980_s18 }
 0x165   : > { %11973 = dma.done.wait (%p15527_p1), %s665_s29, 512  }
 0x166   : > { %11975 = vsyncadd (%p15527_p1), %s665_s29, 4294966784  ;;  %s15528_s13 = sld [smem:[#allocation38_spill]]  ;;  %vm763_vm0 = vcmask 253952   ;;  %v15377_v0 = vmov 0.0   ;;  %s15530_s25 = sld [smem:[#allocation78_spill]]  ;;  %v824_v7 = vlaneseq  ;;  %v776_v10 = vld [vmem:[%s632_s4] sm:$0xff] }
 0x167   : > { %764 = vst.msk [vmem:[#allocation2] sm:$0x1] %vm763_vm0, %v15377_v0  ;;  %765 = vst.msk [vmem:[#allocation2 + $0x10] sm:$0x1] %vm763_vm0, %v15377_v0  ;;  %v12069_v5 = vmov 1966171168  }
 0x168   : > { %766 = vst.msk [vmem:[#allocation2 + $0x20] sm:$0x1] %vm763_vm0, %v15377_v0  ;;  %767 = vst.msk [vmem:[#allocation2 + $0x30] sm:$0x1] %vm763_vm0, %v15377_v0  ;;  %v822_v6 = vunpack.c.l.s4 %v12069_v5  ;;  %vm781_vm1 = vcmask 261120   ;;  %v777_v15 = vld [vmem:[%s632_s4 + $0x8] sm:$0xff] }
 0x169   : > { %768 = vst.msk [vmem:[#allocation2 + $0x40] sm:$0x1] %vm763_vm0, %v15377_v0  ;;  %769 = vst.msk [vmem:[#allocation2 + $0x50] sm:$0x1] %vm763_vm0, %v15377_v0  ;;  %v784_v16 = vld [vmem:[%s12689_s7] sm:$0xff]  ;;  %v785_v21 = vld [vmem:[%s12689_s7 + $0x8] sm:$0xff] }
 0x16a   : > { %770 = vst.msk [vmem:[#allocation2 + $0x9] sm:$0x1] %vm763_vm0, %v15377_v0  ;;  %771 = vst.msk [vmem:[#allocation2 + $0x19] sm:$0x1] %vm763_vm0, %v15377_v0  ;;  %v12070_v18 = vmov 1983009808   ;;  %v823_v22 = vunpack.c.0.s8 %v822_v6 }
 0x16b   : > { %772 = vst.msk [vmem:[#allocation2 + $0x29] sm:$0x1] %vm763_vm0, %v15377_v0  ;;  %773 = vst.msk [vmem:[#allocation2 + $0x39] sm:$0x1] %vm763_vm0, %v15377_v0  ;;  %v1631_v19 = vunpack.c.l.s4 %v12070_v18  ;;  %v825_v23 = vshrl.u32 %v824_v7, 7  ;;  %v789_v24 = vld [vmem:[%s641_s27] sm:$0xff] }
 0x16c   : > { %p757_p10 = scmp.gt.s32.totalorder %s15528_s13, 0  ;;  %p760_p0 = scmp.lt.s32.totalorder %s15528_s13, 3  ;;  %774 = vst.msk [vmem:[#allocation2 + $0x49] sm:$0x1] %vm763_vm0, %v15377_v0  ;;  %775 = vst.msk [vmem:[#allocation2 + $0x59] sm:$0x1] %vm763_vm0, %v15377_v0 }
 0x16d   : > { %s15531_s11 = smov %s15530_s25  ;;  %v8993_v2 = vld [vmem:[%s15530_s25 + $0x20] sm:$0xff]  ;;  %787 = vst.msk [vmem:[#allocation2 + $0x21] sm:$0xff] %vm781_vm1, %v784_v16  ;;  %788 = vst.msk [vmem:[#allocation2 + $0x31] sm:$0xff] %vm781_vm1, %v785_v21  ;;  %v1632_v27 = vunpack.c.0.s8 %v1631_v19  ;;  %v12793_v28 = vsub.s32 %v823_v22, %v825_v23  ;;  %v12811_v34 = vsub.s32 0, %v825_v23  ;;  %vm1487_vm2 = vcmask 1040384   ;;  %s15644_s18 = sld [smem:[#allocation81_spill]] }
 0x16e   : > { %s758_s17 = scalar_select %p757_p10, 1, 0  ;;  %v8994_v3 = vld [vmem:[%s15531_s11 + $0x28] sm:$0xff]  ;;  %v8995_v4 = vld [vmem:[%s15531_s11 + $0x30] sm:$0xff]  ;;  %v8996_v9 = vld [vmem:[%s15531_s11 + $0x38] sm:$0xff]  ;;  %vm1488_vm3 = vcmask 1042434  }
 0x16f   : > { %s761_s26 = scalar_select %p760_p0, 1, 0  ;;  %v10876_v8 = vpack.c.bf16 %v8994_v3, %v8993_v2  ;;  %v1619_v11 = vld [vmem:[%s15531_s11] sm:$0xff]  ;;  %v10880_v12 = vpack.c.bf16 %v8996_v9, %v8995_v4  ;;  %v1620_v14 = vld [vmem:[%s15531_s11 + $0x8] sm:$0xff]  ;;  %v1621_v29 = vld [vmem:[%s15531_s11 + $0x10] sm:$0xff]  ;;  %v12822_v39 = vsub.s32 %v1632_v27, %v825_v23  ;;  %vm1490_vm4 = vcmask 1044484  }
 0x170   : > { %s759_s9 = scvt.s32.f32 %s758_s17  ;;  %v12788_v25 = vpack.c.bf16 %v1620_v14, %v1619_v11  ;;  %v1622_v30 = vld [vmem:[%s15531_s11 + $0x18] sm:$0xff]  ;;  %v9029_v31 = vld [vmem:[%s15531_s11 + $0x40] sm:$0xff]  ;;  %v9030_v32 = vld [vmem:[%s15531_s11 + $0x48] sm:$0xff]  ;;  %vm1492_vm5 = vcmask 1046534   ;;  %vm3830_vm9 = vcmask 122880   ;;  %vm3851_vm10 = vcmask 130048  }
 0x171   : > { %s762_s21 = scvt.s32.f32 %s761_s26  ;;  %10877 = vmatprep.subr.bf16.mxu0 %v10876_v8  ;;  %v9031_v33 = vld [vmem:[%s15531_s11 + $0x50] sm:$0xff]  ;;  %v9032_v35 = vld [vmem:[%s15531_s11 + $0x58] sm:$0xff]  ;;  %v9049_v36 = vld [vmem:[%s15531_s11 + $0x60] sm:$0xff]  ;;  %v12826_v42 = vpack.c.bf16 %v1622_v30, %v1621_v29  ;;  %v12831_v48 = vpack.c.bf16 %v9030_v32, %v9029_v31  ;;  %s15648_s7 = sld [smem:[#allocation80_spill]] }
 0x172   : > { %v12753_v1 = vstv %s759_s9  ;;  %10879 = vmatpush3.bf16.msra.mxu0 %v10876_v8  ;;  %v9050_v37 = vld [vmem:[%s15531_s11 + $0x68] sm:$0xff]  ;;  %v12834_v51 = vpack.c.bf16 %v9032_v35, %v9031_v33  ;;  %vm1489_vm6 = vmor %vm1487_vm2, %vm1488_vm3  ;;  %s15664_s23 = sld [smem:[#allocation82_spill]]  ;;  %s9525_s25 = sshll.u32 %s15528_s13, 3 }
 0x173   : > { %15529 = vst [vmem:[#allocation50_spill] sm:$0xff] %v12753_v1  ;;  %v779_v13 = vmul.f32 %v12753_v1, %v776_v10  ;;  %v12779_v17 = vstv %s762_s21  ;;  %v780_v20 = vmul.f32 %v12753_v1, %v777_v15  ;;  %10881 = vmatprep.subr.bf16.mxu0 %v10880_v12  ;;  %v12836_v52 = vpack.c.bf16 %v9050_v37, %v9049_v36  ;;  %vm1491_vm7 = vmor %vm1489_vm6, %vm1490_vm4  ;;  %s15645_s9 = smov %s15644_s18  ;;  %s15658_s21 = sld [smem:[#allocation83_spill]] }
 0x174   : > { %15532 = vst [vmem:[#allocation51_spill] sm:$0xff] %v12779_v17  ;;  %v792_v26 = vmul.f32 %v12779_v17, %v789_v24  ;;  %v12824_v41 = vld [vmem:[#allocation2 + $0x20] sm:$0xff]  ;;  %v12829_v47 = vld.sshfl [vmem:[#allocation2 + $0x28] sm:$0x11 pattern:$0x75316420]  ;;  %vm12903_vm8 = vmor %vm1491_vm7, %vm1492_vm5 }
 0x175   : > { %782 = vst.msk [vmem:[#allocation2 + $0x1] sm:$0xff] %vm781_vm1, %v779_v13  ;;  %783 = vst.msk [vmem:[#allocation2 + $0x11] sm:$0xff] %vm781_vm1, %v780_v20  ;;  %v963_v57 = vcombine.high %v12824_v41, %v12824_v41  ;;  %v12850_v60 = vrot.slane %v12824_v41, %v12793_v28  ;;  %v1026_v61 = vrot.slane %v12829_v47, %v12793_v28  ;;  %s15667_s4 = sld [smem:[#allocation39_spill]]  ;;  %s15669_s22 = sld [smem:[#allocation48_spill]] }
 0x176   : > { %795 = vst.msk [vmem:[#allocation2 + $0x41] sm:$0xff] %vm781_vm1, %v792_v26  ;;  %10883 = vmatpush3.bf16.msra.mxu0 %v10880_v12  ;;  %15533 = vst [vmem:[#allocation52_spill] sm:$0xff] %v12829_v47  ;;  %s15670_s12 = sld [smem:[#allocation85_spill]]  ;;  %s8701_s29 = scalar_lea.sflag [#allocation8], %s12685_s30 }
 0x177   : > { %10885 = vmatprep.subr.bf16.mxu0 %v12788_v25  ;;  %s12071_s26 = smov [#allocation17]  }
 0x178   : > { %s11848_s14 = sshll.u32 %s12071_s26, 4  ;;  %s11849_s14 = int_to_ptr.vmem [resolvable:$false] %s11848_s14 }
 0x17b   : > { %p15672_p12 = scmp.ne.s32.totalorder %s15669_s22, 0 }
 0x17c   : > { %v797_v38 = vld [vmem:[#allocation2] sm:$0xff]  ;;  %v8982_v40 = vld.sshfl [vmem:[#allocation2 + $0x8] sm:$0x11 pattern:$0x75316420]  ;;  %v799_v46 = vld [vmem:[#allocation2 + $0x10] sm:$0xff]  ;;  %s15671_s5 = smov %s15670_s12 }
 0x17d   : > { %v827_v43 = vrot.slane %v797_v38, %v12793_v28  ;;  %v849_v44 = vcombine.high %v797_v38, %v797_v38  ;;  %v884_v45 = vcombine.high %v8982_v40, %v8982_v40  ;;  %v848_v49 = vrot.slane %v8982_v40, %v12793_v28  ;;  %v12840_v56 = vld.sshfl [vmem:[#allocation2 + $0x18] sm:$0x11 pattern:$0x75316420] }
 0x17e   : > { %v892_v50 = vcombine.high %v799_v46, %v799_v46  ;;  %15534 = vst [vmem:[#allocation53_spill] sm:$0xff] %v12840_v56  ;;  %v899_v59 = vrot.slane %v799_v46, %v12793_v28  ;;  %v955_v7 = vrot.slane %v12840_v56, %v12793_v28 }
 0x17f   : > { %v834_v53 = vrot.slane %v827_v43, %v12793_v28  ;;  %v856_v54 = vrot.slane %v849_v44, %v12793_v28  ;;  %v857_v55 = vcombine.high %v827_v43, %v827_v43  ;;  %v12845_v58 = vrot.slane %v884_v45, %v12793_v28 }
 0x180   : > { %v1282_v5 = vrot.slane %v848_v49, %v12811_v34  ;;  %v12859_v6 = vrot.slane %v892_v50, %v12793_v28  ;;  %v907_v14 = vcombine.high %v899_v59, %v899_v59  ;;  %v12876_v15 = vrot.slane %v899_v59, %v12793_v28 }
 0x181   : > { %v858_v62 = vcombine.high %v856_v54, %v856_v54  ;;  %v865_v63 = vrot.slane %v856_v54, %v12793_v28  ;;  %v872_v2 = vrot.slane %v857_v55, %v12793_v28  ;;  %v880_v3 = vcombine.high %v834_v53, %v834_v53 }
 0x182   : > { %v1250_v4 = vrot.slane %v834_v53, %v12811_v34  ;;  %v1286_v19 = vrot.slane %v12845_v58, %v12811_v34  ;;  %v1517_v20 = vrot.slane %v1282_v5, 7  ;;  %v922_v30 = vrot.slane %v12859_v6, %v12793_v28 }
 0x183   : > { %v881_v8 = vcombine.high %v865_v63, %v865_v63  ;;  %v882_v9 = vcombine.high %v872_v2, %v872_v2  ;;  %v12864_v10 = vrot.slane %v872_v2, %v12811_v34  ;;  %v12867_v11 = vrot.slane %v880_v3, %v12811_v34 }
 0x184   : > { %v12870_v12 = vrot.slane %v865_v63, %v12811_v34  ;;  %v879_v13 = vrot.slane %v858_v62, %v12793_v28  ;;  %v12888_v26 = vrot.slane %v1250_v4, 9  ;;  %v12907_v49 = vrot.slane %v1517_v20, 2 }
 0x185   : > { %v12879_v16 = vrot.slane %v882_v9, %v12811_v34  ;;  %v1628_v18 = vcombine.low %v12864_v10, %v12867_v11  ;;  %v1274_v24 = vrot.slane %v881_v8, %v12811_v34  ;;  %v15382_v27 = vrot.slane %v12864_v10, 7 }
 0x186   : > { %v15379_v21 = vrot.slane %v12870_v12, 7  ;;  %v883_v22 = vcombine.high %v879_v13, %v879_v13  ;;  %v1270_v23 = vrot.slane %v879_v13, %v12811_v34  ;;  %v15381_v31 = vrot.slane %v12867_v11, 7  ;;  %15537 = vst [vmem:[#allocation54_spill] sm:$0xff] %v12907_v49 }
 0x187   : > { %v1629_v29 = vcombine.low %v12879_v16, %v12870_v12  ;;  %v1636_v32 = vrot.slane %v1628_v18, %v12822_v39  ;;  %v1511_v38 = vrot.slane %v1274_v24, 7  ;;  %v15380_v50 = vrot.slane %v12879_v16, 7 }
 0x188   : > { %v1278_v33 = vrot.slane %v883_v22, %v12811_v34  ;;  %v1508_v35 = vrot.slane %v1270_v23, 7  ;;  %v1507_v36 = vrot.slane %v15379_v21, 2  ;;  %v1645_v40 = vcombine.low %v1270_v23, %v1274_v24 }
 0x189   : > { %v1643_v37 = vrot.slane %v1629_v29, %v12822_v39  ;;  %v1513_v54 = vrot.slane %v1511_v38, 2  ;;  %v12913_v58 = vrot.slane %v15382_v27, 2  ;;  %v929_v63 = vrot.slane %v907_v14, %v12793_v28 }
 0x18a   : > { %v1510_v44 = vrot.slane %v1508_v35, 2  ;;  %v1514_v45 = vrot.slane %v1278_v33, 7  ;;  %v1646_v46 = vcombine.low %v1278_v33, %v1282_v5  ;;  %v1653_v55 = vrot.slane %v1645_v40, %v12822_v39 }
 0x18b   : > { %v1644_v53 = vcombine.low %v1636_v32, %v1643_v37  ;;  %v12919_v2 = vrot.slane %v15381_v31, 2  ;;  %v12924_v3 = vsel %vm12903_vm8, %v1507_v36, %v1508_v35  ;;  %v937_v5 = vcombine.high %v12876_v15, %v12876_v15 }
 0x18c   : > { %v1516_v59 = vrot.slane %v1514_v45, 2  ;;  %v1660_v62 = vrot.slane %v1646_v46, %v12822_v39  ;;  %v12928_v4 = vsel %vm12903_vm8, %v1510_v44, %v1511_v38  ;;  %v12934_v8 = vsel %vm12903_vm8, %v1513_v54, %v1514_v45 }
 0x18d   : > { %10056 = vmatprep.mubr.msk.f32.mxu0 %vm781_vm1, %v1644_v53  ;;  %v939_v14 = vcombine.high %v929_v63, %v929_v63  ;;  %v12942_v18 = vrot.slane %v15380_v50, 2  ;;  %v12944_v22 = vrot.slane %v1286_v19, 7  ;;  %v12947_v23 = vrot.slane %v929_v63, %v12811_v34 }
 0x18e   : > { %v12938_v9 = vsel %vm12903_vm8, %v1516_v59, %v1517_v20  ;;  %v1661_v13 = vcombine.low %v1653_v55, %v1660_v62  ;;  %v12950_v24 = vrot.slane %v937_v5, %v12811_v34  ;;  %v12957_v20 = vrot.slane %v922_v30, %v12811_v34 }
 0x18f   : > { %15538 = vst [vmem:[#allocation55_spill] sm:$0xff] %v12944_v22  ;;  %v12954_v29 = vrot.slane %v939_v14, %v12811_v34  ;;  %v908_v32 = vcombine.high %v12859_v6, %v12859_v6  ;;  %v938_v33 = vcombine.high %v922_v30, %v922_v30  ;;  %v12977_v30 = vrot.slane %v955_v7, %v12811_v34 }
 0x190   : > { %10057 = vmatmul.mubr.msk.f32.vlgmr.msra.gmra.mrb[0].mxu0 %vm781_vm1, %v1661_v13  ;;  %v1662_v37 = vcombine.low %v12947_v23, %v12950_v24  ;;  %v977_v46 = vrot.slane %v963_v57, %v12793_v28  ;;  %v978_v55 = vcombine.high %v12850_v60, %v12850_v60  ;;  %v12998_v62 = vrot.slane %v12850_v60, %v12793_v28 }
 0x191   : > { %10887 = vmatpush3.bf16.msra.mxu0 %v12788_v25  ;;  %v1663_v40 = vcombine.low %v12954_v29, %v12957_v20  ;;  %v936_v6 = vrot.slane %v908_v32, %v12793_v28  ;;  %v12983_v45 = vrot.slane %v938_v33, %v12811_v34 }
 0x192   : > { %10889 = vmatprep.subr.bf16.mxu0 %v12826_v42  ;;  %v1670_v44 = vrot.slane %v1662_v37, %v12822_v39  ;;  %v993_v63 = vrot.slane %v977_v46, %v12793_v28  ;;  %v979_v5 = vcombine.high %v977_v46, %v977_v46  ;;  %v1000_v32 = vrot.slane %v978_v55, %v12793_v28 }
 0x193   : > { %v1677_v53 = vrot.slane %v1663_v40, %v12822_v39  ;;  %v940_v54 = vcombine.high %v936_v6, %v936_v6  ;;  %v12991_v7 = vrot.slane %v936_v6, %v12811_v34  ;;  %v1008_v33 = vcombine.high %v12998_v62, %v12998_v62 }
 0x194   : > { %v1010_v46 = vcombine.high %v1000_v32, %v1000_v32  ;;  %v13029_v55 = vrot.slane %v993_v63, %v12811_v34 }
 0x195   : > { %10891 = vmatpush3.bf16.msra.mxu0 %v12826_v42  ;;  %v13002_v41 = vcombine.low %v1670_v44, %v1677_v53  ;;  %v13005_v57 = vrot.slane %v940_v54, %v12811_v34  ;;  %v1679_v14 = vcombine.low %v12991_v7, %v12983_v45  ;;  %v1007_v42 = vrot.slane %v979_v5, %v12793_v28 }
 0x196   : > { %10893 = vmatprep.subr.bf16.mxu0 %v12831_v48  ;;  %v1009_v44 = vcombine.high %v993_v63, %v993_v63  ;;  %v13023_v53 = vrot.slane %v1000_v32, %v12811_v34  ;;  %v13026_v54 = vrot.slane %v1008_v33, %v12811_v34  ;;  %v13040_v32 = vrot.slane %v1010_v46, %v12811_v34  ;;  %v803_v46 = vld [vmem:[#allocation2 + $0x30] sm:$0xff] }
 0x197   : > { %15539 = vst [vmem:[#allocation56_spill] sm:$0xff] %v13002_v41  ;;  %10059 = vmatprep.mubr.msk.f32.mxu0 %vm781_vm1, %v13002_v41  ;;  %v1680_v40 = vcombine.low %v13005_v57, %v12977_v30  ;;  %v1687_v6 = vrot.slane %v1679_v14, %v12822_v39  ;;  %v1011_v0 = vcombine.high %v1007_v42, %v1007_v42  ;;  %v13057_v14 = vld.sshfl [vmem:[#allocation2 + $0x38] sm:$0x11 pattern:$0x75316420] }
 0x198   : > { %v13033_v13 = vrot.slane %v1007_v42, %v12811_v34  ;;  %v13036_v60 = vrot.slane %v1009_v44, %v12811_v34  ;;  %v1696_v63 = vcombine.low %v13023_v53, %v13026_v54  ;;  %v13055_v44 = vrot.slane %v1026_v61, %v12811_v34  ;;  %15541 = vst [vmem:[#allocation58_spill] sm:$0xff] %v13057_v14 }
 0x199   : > { %v1694_v5 = vrot.slane %v1680_v40, %v12822_v39  ;;  %v13049_v42 = vrot.slane %v1011_v0, %v12811_v34  ;;  %v805_v0 = vld [vmem:[#allocation2 + $0x40] sm:$0xff]  ;;  %v1034_v38 = vcombine.high %v803_v46, %v803_v46  ;;  %v1041_v36 = vrot.slane %v803_v46, %v12793_v28 }
 0x19a   : > { %v1713_v25 = vcombine.low %v13033_v13, %v13036_v60  ;;  %v1097_v35 = vrot.slane %v13057_v14, %v12793_v28  ;;  %v1105_v19 = vcombine.high %v805_v0, %v805_v0  ;;  %v1112_v40 = vrot.slane %v805_v0, %v12793_v28 }
 0x19b   : > { %v13045_v37 = vcombine.low %v1687_v6, %v1694_v5  ;;  %v1697_v6 = vcombine.low %v13040_v32, %v13029_v55  ;;  %v1704_v5 = vrot.slane %v1696_v63, %v12822_v39  ;;  %v1714_v33 = vcombine.low %v13049_v42, %v13055_v44 }
 0x19c   : > { %v1721_v59 = vrot.slane %v1713_v25, %v12822_v39  ;;  %v1048_v50 = vrot.slane %v1034_v38, %v12793_v28  ;;  %v1049_v31 = vcombine.high %v1041_v36, %v1041_v36 }
 0x19d   : > { %15540 = vst [vmem:[#allocation57_spill] sm:$0xff] %v13045_v37  ;;  %10060 = vmatmul.mubr.msk.f32.gmra.mrb[2].mxu0 %vm781_vm1, %v13045_v37  ;;  %v1711_v63 = vrot.slane %v1697_v6, %v12822_v39  ;;  %v1728_v61 = vrot.slane %v1714_v33, %v12822_v39  ;;  %v13085_v6 = vrot.slane %v1041_v36, %v12793_v28 }
 0x19e   : > { %10062 = vmatprep.mubr.msk.f32.mxu0 %vm781_vm1, %v13002_v41  ;;  %v13093_v33 = vrot.slane %v1097_v35, %v12811_v34  ;;  %v1064_v38 = vrot.slane %v1048_v50, %v12793_v28  ;;  %v1071_v36 = vrot.slane %v1049_v31, %v12793_v28  ;;  %v13105_v35 = vrot.slane %v1112_v40, %v12793_v28 }
 0x19f   : > { %v13081_v21 = vcombine.low %v1704_v5, %v1711_v63  ;;  %v13090_v25 = vcombine.low %v1721_v59, %v1728_v61  ;;  %v1079_v5 = vcombine.high %v13085_v6, %v13085_v6  ;;  %v1050_v63 = vcombine.high %v1048_v50, %v1048_v50 }
 0x1a0   : > { %15544 = vst [vmem:[#allocation61_spill] sm:$0xff] %v13093_v33  ;;  %v1119_v59 = vrot.slane %v1105_v19, %v12793_v28  ;;  %v1120_v61 = vcombine.high %v1112_v40, %v1112_v40  ;;  %15545 = vst [vmem:[#allocation62_spill] sm:$0xff] %v13105_v35  ;;  %v1081_v0 = vcombine.high %v1071_v36, %v1071_v36 }
 0x1a1   : > { %15542 = vst [vmem:[#allocation59_spill] sm:$0xff] %v13081_v21  ;;  %10063 = vmatmul.mubr.msk.f32.gmra.mrb[4].mxu0 %vm781_vm1, %v13045_v37  ;;  %15543 = vst [vmem:[#allocation60_spill] sm:$0xff] %v13090_v25  ;;  %v13108_v27 = vrot.slane %v1071_v36, %v12811_v34  ;;  %v13111_v1 = vrot.slane %v1079_v5, %v12811_v34  ;;  %v13114_v31 = vrot.slane %v1064_v38, %v12811_v34 }
 0x1a2   : > { %10065 = vmatprep.mubr.msk.f32.mxu0 %vm781_vm1, %v13081_v21  ;;  %v1078_v50 = vrot.slane %v1050_v63, %v12793_v28  ;;  %v1080_v19 = vcombine.high %v1064_v38, %v1064_v38  ;;  %v1135_v46 = vrot.slane %v1119_v59, %v12793_v28  ;;  %v1142_v40 = vrot.slane %v1120_v61, %v12793_v28 }
 0x1a3   : > { %v13124_v36 = vrot.slane %v1081_v0, %v12811_v34  ;;  %v1150_v41 = vcombine.high %v13105_v35, %v13105_v35  ;;  %v1730_v38 = vcombine.low %v13108_v27, %v13111_v1 }
 0x1a4   : > { %v1082_v63 = vcombine.high %v1078_v50, %v1078_v50  ;;  %v13133_v17 = vrot.slane %v1078_v50, %v12811_v34  ;;  %v13136_v61 = vrot.slane %v1080_v19, %v12811_v34  ;;  %v1152_v5 = vcombine.high %v1142_v40, %v1142_v40 }
 0x1a5   : > { %10066 = vmatmul.mubr.msk.f32.gmra.mrb[6].mxu0 %vm781_vm1, %v13090_v25  ;;  %v1731_v37 = vcombine.low %v13124_v36, %v13114_v31  ;;  %v1738_v14 = vrot.slane %v1730_v38, %v12822_v39  ;;  %v13150_v19 = vrot.slane %v1142_v40, %v12811_v34  ;;  %v13156_v49 = vrot.slane %v1150_v41, %v12811_v34 }
 0x1a6   : > { %10068 = vmatprep.mubr.msk.f32.mxu0 %vm781_vm1, %v13081_v21  ;;  %v13146_v47 = vrot.slane %v1082_v63, %v12811_v34  ;;  %v1747_v21 = vcombine.low %v13133_v17, %v13136_v61  ;;  %v13166_v40 = vrot.slane %v1135_v46, %v12811_v34 }
 0x1a7   : > { %15546 = vst [vmem:[#allocation63_spill] sm:$0xff] %v13150_v19  ;;  %v1745_v0 = vrot.slane %v1731_v37, %v12822_v39  ;;  %15547 = vst [vmem:[#allocation64_spill] sm:$0xff] %v13156_v49  ;;  %v13168_v37 = vld.sshfl [vmem:[#allocation2 + $0x48] sm:$0x11 pattern:$0x75316420] }
 0x1a8   : > { %v1748_v50 = vcombine.low %v13146_v47, %v13093_v33  ;;  %v1755_v41 = vrot.slane %v1747_v21, %v12822_v39  ;;  %v1764_v33 = vcombine.low %v13150_v19, %v13156_v49  ;;  %v1121_v21 = vcombine.high %v1119_v59, %v1119_v59 }
 0x1a9   : > { %10069 = vmatmul.mubr.msk.f32.gmra.mrb[8].mxu0 %vm781_vm1, %v13090_v25  ;;  %v13159_v25 = vrot.slane %v1152_v5, %v12811_v34  ;;  %v13170_v22 = vcombine.low %v1738_v14, %v1745_v0  ;;  %v1151_v0 = vcombine.high %v1135_v46, %v1135_v46  ;;  %v1168_v5 = vrot.slane %v13168_v37, %v12793_v28 }
 0x1aa   : > { %v1762_v38 = vrot.slane %v1748_v50, %v12822_v39  ;;  %v1772_v50 = vrot.slane %v1764_v33, %v12822_v39  ;;  %v15551_v49 = vrot.slane %v12864_v10, 7  ;;  %v1149_v19 = vrot.slane %v1121_v21, %v12793_v28 }
 0x1ab   : > { %15548 = vst [vmem:[#allocation65_spill] sm:$0xff] %v13159_v25  ;;  %15549 = vst [vmem:[#allocation66_spill] sm:$0xff] %v13170_v22  ;;  %v1765_v35 = vcombine.low %v13159_v25, %v13166_v40  ;;  %10071 = vmatprep.mubr.msk.f32.mxu0 %vm781_vm1, %v13170_v22  ;;  %v13197_v59 = vrot.slane %v1151_v0, %v12811_v34  ;;  %v13200_v46 = vrot.slane %v1168_v5, %v12811_v34 }
 0x1ac   : > { %v13186_v56 = vcombine.low %v1755_v41, %v1762_v38  ;;  %v1497_v25 = vsel %vm12903_vm8, %v12888_v26, %v15551_v49  ;;  %v15552_v38 = vrot.slane %v12867_v11, 7  ;;  %v15554_v26 = vrot.slane %v12879_v16, 7 }
 0x1ad   : > { %v1779_v63 = vrot.slane %v1765_v35, %v12822_v39  ;;  %v15555_v35 = vrot.slane %v12870_v12, 7  ;;  %v13231_v16 = vrot.slane %v1149_v19, %v12811_v34  ;;  %v15557_v21 = vcombine.low %v12934_v8, %v12938_v9 }
 0x1ae   : > { %15550 = vst [vmem:[#allocation67_spill] sm:$0xff] %v13186_v56  ;;  %v13207_v33 = vsel %vm12903_vm8, %v12913_v58, %v15552_v38  ;;  %10072 = vmatmul.mubr.msk.f32.gmra.mrb[10].mxu0 %vm781_vm1, %v13186_v56  ;;  %v13218_v49 = vsel %vm12903_vm8, %v12919_v2, %v15554_v26  ;;  %v1290_v26 = vrot.slane %v12876_v15, %v12811_v34 }
 0x1af   : > { %v13211_v10 = vcombine.low %v1772_v50, %v1779_v63  ;;  %v13225_v11 = vsel %vm12903_vm8, %v12942_v18, %v15555_v35  ;;  %v1963_v58 = vcombine.low %v1497_v25, %v13207_v33  ;;  %10074 = vmatprep.mubr.msk.f32.mxu0 %vm781_vm1, %v13170_v22  ;;  %v1153_v63 = vcombine.high %v1149_v19, %v1149_v19 }
 0x1b0   : > { %v1964_v12 = vcombine.low %v13218_v49, %v13225_v11  ;;  %v15556_v18 = vcombine.low %v12924_v3, %v12928_v4  ;;  %v1995_v19 = vrot.slane %v15557_v21, %v12822_v39  ;;  %v1781_v38 = vcombine.low %v13231_v16, %v13197_v59 }
 0x1b1   : > { %15553 = vst [vmem:[#allocation68_spill] sm:$0xff] %v13211_v10  ;;  %v1971_v5 = vrot.slane %v1963_v58, %v12822_v39  ;;  %v13247_v0 = vrot.slane %v1153_v63, %v12811_v34  ;;  %v15559_v63 = vrot.slane %v12950_v24, 7  ;;  %v8989_v14 = vrot.slane %v1290_v26, 9 }
 0x1b2   : > { %v1988_v25 = vrot.slane %v15556_v18, %v12822_v39  ;;  %10075 = vmatmul.mubr.msk.f32.gmra.mrb[12].mxu0 %vm781_vm1, %v13186_v56  ;;  %v1978_v35 = vrot.slane %v1964_v12, %v12822_v39  ;;  %v15558_v18 = vrot.slane %v12947_v23, 7  ;;  %v1789_v50 = vrot.slane %v1781_v38, %v12822_v39 }
 0x1b3   : > { %v1526_v2 = vrot.slane %v15559_v63, 2  ;;  %10077 = vmatprep.mubr.msk.f32.mxu0 %vm781_vm1, %v13211_v10  ;;  %v1782_v15 = vcombine.low %v13247_v0, %v13200_v46  ;;  %v15560_v12 = vmov %v15559_v63  ;;  %v15563_v38 = vrot.slane %v12947_v23, 7 }
 0x1b4   : > { %v1996_v58 = vcombine.low %v1988_v25, %v1995_v19  ;;  %v1523_v21 = vrot.slane %v15558_v18, 2  ;;  %v1979_v56 = vcombine.low %v1971_v5, %v1978_v35  ;;  %v15561_v19 = vrot.slane %v12954_v29, 7 }
 0x1b5   : > { %v1796_v10 = vrot.slane %v1782_v15, %v12822_v39  ;;  %v1522_v24 = vsel %vm12903_vm8, %v8989_v14, %v15563_v38  ;;  %v15564_v5 = vrot.slane %v12957_v20, 7  ;;  %v15565_v35 = vrot.slane %v12991_v7, 7 }
 0x1b6   : > { %v13271_v25 = vsel %vm12903_vm8, %v1523_v21, %v15560_v12  ;;  %v13277_v18 = vsel %vm12903_vm8, %v1526_v2, %v15561_v19  ;;  %v15562_v63 = vmov %v15561_v19  ;;  %v15567_v15 = vrot.slane %v12983_v45, 7 }
 0x1b7   : > { %v1529_v41 = vrot.slane %v15562_v63, 2  ;;  %v1532_v26 = vrot.slane %v15564_v5, 2  ;;  %v1535_v21 = vrot.slane %v15565_v35, 2  ;;  %v15566_v12 = vmov %v15564_v5 }
 0x1b8   : > { %v1997_v29 = vcombine.low %v1522_v24, %v13271_v25  ;;  %v1538_v23 = vrot.slane %v15567_v15, 2  ;;  %v15568_v19 = vrot.slane %v13005_v57, 7  ;;  %v13301_v63 = vcombine.low %v1789_v50, %v1796_v10 }
 0x1b9   : > { %v13294_v2 = vsel %vm12903_vm8, %v1529_v41, %v15566_v12  ;;  %v15570_v5 = vmov %v15565_v35  ;;  %v15571_v41 = vmov %v15567_v15  ;;  %v15573_v7 = vrot.slane %v12977_v30, 7 }
 0x1ba   : > { %v1541_v14 = vrot.slane %v15568_v19, 2  ;;  %15569 = vst [vmem:[#allocation69_spill] sm:$0xff] %v13301_v63  ;;  %v1998_v38 = vcombine.low %v13277_v18, %v13294_v2  ;;  %v13309_v20 = vsel %vm12903_vm8, %v1532_v26, %v15570_v5  ;;  %v13315_v24 = vsel %vm12903_vm8, %v1535_v21, %v15571_v41  ;;  %10078 = vmatmul.mubr.msk.f32.gmra.mrb[14].mxu0 %vm781_vm1, %v13301_v63 }
 0x1bb   : > { %v2005_v35 = vrot.slane %v1997_v29, %v12822_v39  ;;  %v15572_v10 = vmov %v15568_v19  ;;  %v2014_v45 = vcombine.low %v13309_v20, %v13315_v24  ;;  %v1330_v12 = vrot.slane %v12998_v62, %v12811_v34  ;;  %10088 = vmatprep.mubr.msk.f32.mxu0 %vm781_vm1, %v1979_v56 }
 0x1bc   : > { %v13322_v50 = vsel %vm12903_vm8, %v1538_v23, %v15572_v10  ;;  %v13328_v26 = vsel %vm12903_vm8, %v1541_v14, %v15573_v7  ;;  %v2012_v21 = vrot.slane %v1998_v38, %v12822_v39  ;;  %v15574_v29 = vrot.slane %v13023_v53, 7 }
 0x1bd   : > { %v2015_v57 = vcombine.low %v13322_v50, %v13328_v26  ;;  %v2022_v23 = vrot.slane %v2014_v45, %v12822_v39  ;;  %v15575_v19 = vrot.slane %v13026_v54, 7  ;;  %v15576_v5 = vrot.slane %v13040_v32, 7 }
 0x1be   : > { %v1548_v15 = vrot.slane %v15574_v29, 2  ;;  %v15577_v38 = vrot.slane %v13029_v55, 7  ;;  %v13349_v7 = vcombine.low %v2005_v35, %v2012_v21  ;;  %v8990_v63 = vrot.slane %v1330_v12, 9  ;;  %10089 = vmatmul.mubr.msk.f32.vlgmr.msra.gmra.mrb[0].mxu0 %vm781_vm1, %v1996_v58 }
 0x1bf   : > { %v1551_v14 = vrot.slane %v15575_v19, 2  ;;  %v1554_v41 = vrot.slane %v15576_v5, 2  ;;  %v2029_v62 = vrot.slane %v2015_v57, %v12822_v39  ;;  %v15578_v29 = vmov %v15575_v19  ;;  %10895 = vmatpush3.bf16.msra.mxu0 %v12831_v48 }
 0x1c0   : > { %v1557_v10 = vrot.slane %v15577_v38, 2  ;;  %v13356_v56 = vsel %vm12903_vm8, %v1548_v15, %v15578_v29  ;;  %v15579_v45 = vmov %v15576_v5  ;;  %v15580_v5 = vmov %v15577_v38  ;;  %10091 = vmatprep.mubr.msk.f32.mxu0 %vm781_vm1, %v13349_v7  ;;  %10897 = vmatprep.subr.bf16.mxu0 %v12834_v51 }
 0x1c1   : > { %v13362_v19 = vsel %vm12903_vm8, %v1551_v14, %v15579_v45  ;;  %v13368_v35 = vsel %vm12903_vm8, %v1554_v41, %v15580_v5  ;;  %v15581_v21 = vrot.slane %v13033_v13, 7  ;;  %v13379_v32 = vcombine.low %v2022_v23, %v2029_v62 }
 0x1c2   : > { %v15584_v15 = vrot.slane %v13023_v53, 7  ;;  %v2032_v14 = vcombine.low %v13362_v19, %v13368_v35  ;;  %v15585_v41 = vrot.slane %v13036_v60, 7  ;;  %v15589_v45 = vrot.slane %v13108_v27, 7 }
 0x1c3   : > { %v13374_v54 = vsel %vm12903_vm8, %v1557_v10, %v15581_v21  ;;  %v15582_v57 = vmov %v15581_v21  ;;  %15583 = vst [vmem:[#allocation70_spill] sm:$0xff] %v13379_v32  ;;  %v1370_v10 = vrot.slane %v13085_v6, %v12811_v34  ;;  %v15590_v6 = vrot.slane %v13055_v44, 7  ;;  %10092 = vmatmul.mubr.msk.f32.gmra.mrb[2].mxu0 %vm781_vm1, %v13379_v32 }
 0x1c4   : > { %v1560_v12 = vrot.slane %v15582_v57, 2  ;;  %v1547_v55 = vsel %vm12903_vm8, %v8990_v63, %v15584_v15  ;;  %v1563_v38 = vrot.slane %v15585_v41, 2  ;;  %v15586_v58 = vmov %v15585_v41  ;;  %10094 = vmatprep.mubr.msk.f32.mxu0 %vm781_vm1, %v13349_v7  ;;  %10899 = vmatpush3.bf16.msra.mxu0 %v12834_v51 }
 0x1c5   : > { %v2031_v13 = vcombine.low %v1547_v55, %v13356_v56  ;;  %v15587_v63 = vrot.slane %v13049_v42, 7  ;;  %v2046_v62 = vrot.slane %v2032_v14, %v12822_v39  ;;  %v1573_v5 = vrot.slane %v15589_v45, 2  ;;  %10901 = vmatprep.subr.bf16.mxu0 %v12836_v52 }
 0x1c6   : > { %v13397_v53 = vsel %vm12903_vm8, %v1560_v12, %v15586_v58  ;;  %v8991_v42 = vrot.slane %v1370_v10, 9  ;;  %v15591_v12 = vrot.slane %v13111_v1, 7  ;;  %v15614_v22 = vrot.slane %v13166_v40, 7 }
 0x1c7   : > { %v1566_v23 = vrot.slane %v15587_v63, 2  ;;  %v15588_v48 = vmov %v15587_v63  ;;  %v2048_v60 = vcombine.low %v13374_v54, %v13397_v53  ;;  %v2039_v21 = vrot.slane %v2031_v13, %v12822_v39  ;;  %10095 = vmatmul.mubr.msk.f32.gmra.mrb[4].mxu0 %vm781_vm1, %v13379_v32 }
 0x1c8   : > { %v13408_v29 = vsel %vm12903_vm8, %v1563_v38, %v15588_v48  ;;  %v1576_v15 = vrot.slane %v15591_v12, 2  ;;  %v15592_v41 = vmov %v15591_v12  ;;  %v15593_v13 = vrot.slane %v13124_v36, 7 }
 0x1c9   : > { %v13420_v57 = vsel %vm12903_vm8, %v1566_v23, %v15590_v6  ;;  %v2056_v14 = vrot.slane %v2048_v60, %v12822_v39  ;;  %v13433_v38 = vsel %vm12903_vm8, %v1573_v5, %v15592_v41  ;;  %v13439_v63 = vcombine.low %v2039_v21, %v2046_v62 }
 0x1ca   : > { %v2049_v55 = vcombine.low %v13408_v29, %v13420_v57  ;;  %v1579_v58 = vrot.slane %v15593_v13, 2  ;;  %v15595_v23 = vmov %v15589_v45  ;;  %v15596_v1 = vmov %v15593_v13 }
 0x1cb   : > { %15594 = vst [vmem:[#allocation71_spill] sm:$0xff] %v13439_v63  ;;  %v1572_v10 = vsel %vm12903_vm8, %v8991_v42, %v15595_v23  ;;  %v13450_v48 = vsel %vm12903_vm8, %v1576_v15, %v15596_v1  ;;  %v15597_v60 = vrot.slane %v13114_v31, 7  ;;  %v15599_v21 = vrot.slane %v13133_v17, 7  ;;  %10097 = vmatprep.mubr.msk.f32.mxu0 %vm781_vm1, %v13439_v63 }
 0x1cc   : > { %v2063_v5 = vrot.slane %v2049_v55, %v12822_v39  ;;  %v2065_v27 = vcombine.low %v1572_v10, %v13433_v38  ;;  %v15601_v31 = vrot.slane %v13136_v61, 7  ;;  %v15602_v55 = vrot.slane %v13146_v47, 7  ;;  %v15604_v10 = vld [vmem:[#allocation62_spill] sm:$0xff] }
 0x1cd   : > { %v1582_v45 = vrot.slane %v15597_v60, 2  ;;  %v15598_v62 = vmov %v15597_v60  ;;  %v1585_v36 = vrot.slane %v15599_v21, 2  ;;  %v15600_v42 = vmov %v15599_v21 }
 0x1ce   : > { %v13459_v51 = vsel %vm12903_vm8, %v1579_v58, %v15598_v62  ;;  %v1588_v15 = vrot.slane %v15601_v31, 2  ;;  %v1591_v41 = vrot.slane %v15602_v55, 2  ;;  %v13479_v13 = vcombine.low %v2056_v14, %v2063_v5  ;;  %v15606_v5 = vld [vmem:[#allocation61_spill] sm:$0xff] }
 0x1cf   : > { %v2066_v6 = vcombine.low %v13450_v48, %v13459_v51  ;;  %v13471_v12 = vsel %vm12903_vm8, %v1582_v45, %v15600_v42  ;;  %v2073_v58 = vrot.slane %v2065_v27, %v12822_v39  ;;  %v15603_v23 = vmov %v15601_v31  ;;  %v15610_v31 = vld [vmem:[#allocation64_spill] sm:$0xff] }
 0x1d0   : > { %v13486_v17 = vsel %vm12903_vm8, %v1585_v36, %v15603_v23  ;;  %v1410_v1 = vrot.slane %v15604_v10, %v12811_v34  ;;  %v15605_v45 = vmov %v15602_v55  ;;  %v15607_v61 = vrot.slane %v15606_v5, 7  ;;  %10098 = vmatmul.mubr.msk.f32.gmra.mrb[6].mxu0 %vm781_vm1, %v13479_v13 }
 0x1d1   : > { %v2080_v60 = vrot.slane %v2066_v6, %v12822_v39  ;;  %v13497_v14 = vsel %vm12903_vm8, %v1588_v15, %v15605_v45  ;;  %v2082_v27 = vcombine.low %v13471_v12, %v13486_v17  ;;  %v15608_v6 = vld [vmem:[#allocation63_spill] sm:$0xff]  ;;  %v15611_v55 = vrot.slane %v15610_v31, 7  ;;  %v15612_v45 = vld [vmem:[#allocation65_spill] sm:$0xff]  ;;  %10100 = vmatprep.mubr.msk.f32.mxu0 %vm781_vm1, %v13439_v63  ;;  %v15624_v63 = vld [vmem:[#allocation54_spill] sm:$0xff] }
 0x1d2   : > { %v13503_v62 = vsel %vm12903_vm8, %v1591_v41, %v15607_v61  ;;  %v8992_v36 = vrot.slane %v1410_v1, 9  ;;  %v15609_v42 = vrot.slane %v15608_v6, 7  ;;  %v15613_v41 = vrot.slane %v15612_v45, 7 }
 0x1d3   : > { %v2083_v21 = vcombine.low %v13497_v14, %v13503_v62  ;;  %v1601_v15 = vrot.slane %v15611_v55, 2  ;;  %v13513_v23 = vcombine.low %v2073_v58, %v2080_v60  ;;  %v2090_v10 = vrot.slane %v2082_v27, %v12822_v39 }
 0x1d4   : > { %v1598_v47 = vrot.slane %v15609_v42, 2  ;;  %v1604_v61 = vrot.slane %v15613_v41, 2  ;;  %v1607_v32 = vrot.slane %v15614_v22, 2  ;;  %v1597_v55 = vsel %vm12903_vm8, %v8992_v36, %v15609_v42  ;;  %10101 = vmatmul.mubr.msk.f32.gmra.mrb[8].mxu0 %vm781_vm1, %v13479_v13 }
 0x1d5   : > { %v2097_v1 = vrot.slane %v2083_v21, %v12822_v39  ;;  %v15615_v58 = vrot.slane %v15610_v31, 7  ;;  %v15616_v27 = vmov %v15613_v41  ;;  %v15617_v21 = vrot.slane %v13166_v40, 7  ;;  %v15620_v41 = vld [vmem:[#allocation53_spill] sm:$0xff]  ;;  %10103 = vmatprep.mubr.msk.f32.mxu0 %vm781_vm1, %v13513_v23 }
 0x1d6   : > { %v13537_v22 = vsel %vm12903_vm8, %v1601_v15, %v15616_v27  ;;  %v948_v42 = vcombine.high %v15620_v41, %v15620_v41  ;;  %v2319_v41 = vcombine.low %v13225_v11, %v12924_v3 }
 0x1d7   : > { %v13531_v60 = vsel %vm12903_vm8, %v1598_v47, %v15615_v58  ;;  %v13545_v36 = vsel %vm12903_vm8, %v1604_v61, %v15617_v21  ;;  %v15618_v47 = vrot.slane %v13231_v16, 7  ;;  %v15621_v61 = vrot.slane %v13197_v59, 7  ;;  %v15623_v21 = vld [vmem:[#allocation55_spill] sm:$0xff] }
 0x1d8   : > { %v2099_v6 = vcombine.low %v1597_v55, %v13531_v60  ;;  %v2100_v40 = vcombine.low %v13537_v22, %v13545_v36  ;;  %v15622_v55 = vrot.slane %v13247_v0, 7  ;;  %v2335_v0 = vcombine.low %v12928_v4, %v12934_v8 }
 0x1d9   : > { %v13552_v31 = vsel %vm12903_vm8, %v1607_v32, %v15618_v47  ;;  %v15619_v15 = vmov %v15618_v47  ;;  %v1613_v58 = vrot.slane %v15621_v61, 2  ;;  %v2300_v32 = vsel %vm12903_vm8, %v15624_v63, %v15623_v21 }
 0x1da   : > { %v1610_v45 = vrot.slane %v15619_v15, 2  ;;  %v1616_v27 = vrot.slane %v15622_v55, 2  ;;  %v15625_v16 = vmov %v15621_v61  ;;  %v2318_v15 = vcombine.low %v13207_v33, %v13218_v49 }
 0x1db   : > { %v13580_v61 = vcombine.low %v2090_v10, %v2097_v1  ;;  %v13586_v59 = vsel %vm12903_vm8, %v1613_v58, %v15622_v55  ;;  %v15626_v63 = vrot.slane %v13200_v46, 7  ;;  %v2107_v33 = vrot.slane %v2099_v6, %v12822_v39  ;;  %v15627_v10 = vld [vmem:[#allocation52_spill] sm:$0xff]  ;;  %v15628_v6 = vld [vmem:[#allocation58_spill] sm:$0xff] }
 0x1dc   : > { %v13572_v47 = vsel %vm12903_vm8, %v1610_v45, %v15625_v16  ;;  %v2114_v49 = vrot.slane %v2100_v40, %v12822_v39  ;;  %v1019_v1 = vcombine.high %v15627_v10, %v15627_v10  ;;  %v2336_v58 = vcombine.low %v12938_v9, %v2300_v32 }
 0x1dd   : > { %v13592_v45 = vsel %vm12903_vm8, %v1616_v27, %v15626_v63  ;;  %v2116_v3 = vcombine.low %v13552_v31, %v13572_v47  ;;  %v2326_v27 = vrot.slane %v2318_v15, %v12822_v39  ;;  %v2333_v21 = vrot.slane %v2319_v41, %v12822_v39  ;;  %10104 = vmatmul.mubr.msk.f32.gmra.mrb[10].mxu0 %vm781_vm1, %v13580_v61 }
 0x1de   : > { %v2117_v11 = vcombine.low %v13586_v59, %v13592_v45  ;;  %v962_v16 = vrot.slane %v948_v42, %v12793_v28  ;;  %v1090_v40 = vcombine.high %v15628_v6, %v15628_v6  ;;  %v2352_v8 = vcombine.low %v13271_v25, %v13277_v18  ;;  %10106 = vmatprep.mubr.msk.f32.mxu0 %vm781_vm1, %v13513_v23 }
 0x1df   : > { %v2124_v55 = vrot.slane %v2116_v3, %v12822_v39  ;;  %v13620_v9 = vcombine.low %v2107_v33, %v2114_v49  ;;  %v2353_v42 = vcombine.low %v13294_v2, %v13309_v20  ;;  %v15629_v15 = vrot.slane %v12977_v30, 7 }
 0x1e0   : > { %v2131_v4 = vrot.slane %v2117_v11, %v12822_v39  ;;  %v1326_v32 = vrot.slane %v962_v16, %v12811_v34  ;;  %v1033_v63 = vrot.slane %v1019_v1, %v12793_v28  ;;  %v2334_v3 = vcombine.low %v2326_v27, %v2333_v21  ;;  %v9052_v16 = vld [vmem:[%s15531_s11 + $0x78] sm:$0xff] }
 0x1e1   : > { %v2301_v41 = vrot.slane %v15629_v15, 2  ;;  %v2343_v11 = vrot.slane %v2335_v0, %v12822_v39  ;;  %v2350_v25 = vrot.slane %v2336_v58, %v12822_v39  ;;  %10107 = vmatmul.mubr.msk.f32.gmra.mrb[12].mxu0 %vm781_vm1, %v13580_v61  ;;  %v2360_v2 = vrot.slane %v2352_v8, %v12822_v39 }
 0x1e2   : > { %v2302_v18 = vrot.slane %v1326_v32, 7  ;;  %v13632_v33 = vcombine.low %v2124_v55, %v2131_v4  ;;  %v2369_v20 = vcombine.low %v13315_v24, %v13322_v50  ;;  %v1366_v30 = vrot.slane %v1033_v63, %v12811_v34  ;;  %10109 = vmatprep.mubr.msk.f32.mxu0 %vm781_vm1, %v13620_v9  ;;  %v9051_v50 = vld [vmem:[%s15531_s11 + $0x70] sm:$0xff]  ;;  %v9069_v32 = vld [vmem:[%s15531_s11 + $0x80] sm:$0xff] }
 0x1e3   : > { %v2367_v49 = vrot.slane %v2353_v42, %v12822_v39  ;;  %v15630_v10 = vrot.slane %v13055_v44, 7  ;;  %v1104_v58 = vrot.slane %v1090_v40, %v12793_v28  ;;  %v1161_v24 = vcombine.high %v13168_v37, %v13168_v37 }
 0x1e4   : > { %v2303_v0 = vsel %vm12903_vm8, %v2301_v41, %v2302_v18  ;;  %v2305_v21 = vrot.slane %v1366_v30, 7  ;;  %v2351_v44 = vcombine.low %v2343_v11, %v2350_v25  ;;  %v2377_v6 = vrot.slane %v2369_v20, %v12822_v39  ;;  %v790_v18 = vld [vmem:[%s641_s27 + $0x8] sm:$0xff] }
 0x1e5   : > { %v2304_v1 = vrot.slane %v15630_v10, 2  ;;  %v2370_v27 = vcombine.low %v13328_v26, %v2303_v0  ;;  %10110 = vmatmul.mubr.msk.f32.gmra.mrb[14].mxu0 %vm781_vm1, %v13632_v33  ;;  %v2386_v40 = vcombine.low %v13356_v56, %v13362_v19  ;;  %v13662_v37 = vcombine.low %v2360_v2, %v2367_v49  ;;  %v9070_v56 = vld [vmem:[%s15531_s11 + $0x88] sm:$0xff] }
 0x1e6   : > { %10120 = vmatprep.mubr.msk.f32.mxu0 %vm781_vm1, %v2334_v3  ;;  %v2387_v55 = vcombine.low %v13368_v35, %v13374_v54  ;;  %v1406_v8 = vrot.slane %v1104_v58, %v12811_v34  ;;  %v10904_v42 = vpack.c.bf16 %v9052_v16, %v9051_v50  ;;  %v2403_v54 = vcombine.low %v13397_v53, %v13408_v29 }
 0x1e7   : > { %v2384_v26 = vrot.slane %v2370_v27, %v12822_v39  ;;  %v2306_v4 = vsel %vm12903_vm8, %v2304_v1, %v2305_v21  ;;  %v2394_v35 = vrot.slane %v2386_v40, %v12822_v39  ;;  %v15631_v63 = vrot.slane %v15606_v5, 7  ;;  %v15632_v5 = vld [vmem:[#allocation51_spill] sm:$0xff]  ;;  %v9089_v40 = vld [vmem:[%s15531_s11 + $0xa0] sm:$0xff] }
 0x1e8   : > { %v2404_v15 = vcombine.low %v13420_v57, %v2306_v4  ;;  %v2401_v41 = vrot.slane %v2387_v55, %v12822_v39  ;;  %v2308_v11 = vrot.slane %v1406_v8, 7  ;;  %v1175_v25 = vrot.slane %v1161_v24, %v12793_v28  ;;  %v9090_v55 = vld [vmem:[%s15531_s11 + $0xa8] sm:$0xff]  ;;  %v15634_v4 = vld [vmem:[#allocation70_spill] sm:$0xff] }
 0x1e9   : > { %10121 = vmatmul.mubr.msk.f32.vlgmr.msra.gmra.mrb[0].mxu0 %vm781_vm1, %v2351_v44  ;;  %v13676_v19 = vcombine.low %v2377_v6, %v2384_v26  ;;  %v2307_v3 = vrot.slane %v15631_v63, 2  ;;  %v10908_v2 = vpack.c.bf16 %v9070_v56, %v9069_v32  ;;  %v2420_v53 = vcombine.low %v13433_v38, %v13450_v48  ;;  %v9072_v6 = vld [vmem:[%s15531_s11 + $0x98] sm:$0xff] }
 0x1ea   : > { %10903 = vmatpush3.bf16.msra.mxu0 %v12836_v52  ;;  %10123 = vmatprep.mubr.msk.f32.mxu0 %vm781_vm1, %v13662_v37  ;;  %v2411_v52 = vrot.slane %v2403_v54, %v12822_v39  ;;  %v2418_v29 = vrot.slane %v2404_v15, %v12822_v39  ;;  %v2421_v57 = vcombine.low %v13459_v51, %v13471_v12  ;;  %v15633_v1 = vrot.slane %v13200_v46, 7  ;;  %v9091_v15 = vld [vmem:[%s15531_s11 + $0xb0] sm:$0xff] }
 0x1eb   : > { %10905 = vmatprep.subr.bf16.mxu0 %v10904_v42  ;;  %v793_v20 = vmul.f32 %v15632_v5, %v790_v18  ;;  %v13702_v30 = vcombine.low %v2394_v35, %v2401_v41  ;;  %v2309_v38 = vsel %vm12903_vm8, %v2307_v3, %v2308_v11  ;;  %v1446_v48 = vrot.slane %v1175_v25, %v12811_v34  ;;  %v9092_v41 = vld [vmem:[%s15531_s11 + $0xb8] sm:$0xff]  ;;  %v15636_v3 = vld [vmem:[#allocation56_spill] sm:$0xff] }
 0x1ec   : > { %v13710_v51 = vcombine.low %v2411_v52, %v2418_v29  ;;  %v2437_v12 = vcombine.low %v13486_v17, %v13497_v14  ;;  %v2438_v49 = vcombine.low %v13503_v62, %v2309_v38  ;;  %v2428_v0 = vrot.slane %v2420_v53, %v12822_v39  ;;  %v9110_v18 = vld [vmem:[%s15531_s11 + $0xc0] sm:$0xff]  ;;  %v15637_v52 = vld [vmem:[#allocation57_spill] sm:$0xff] }
 0x1ed   : > { %10124 = vmatmul.mubr.msk.f32.gmra.mrb[2].mxu0 %vm781_vm1, %v13676_v19  ;;  %796 = vst.msk [vmem:[#allocation2 + $0x51] sm:$0xff] %vm781_vm1, %v793_v20  ;;  %v2435_v10 = vrot.slane %v2421_v57, %v12822_v39  ;;  %v2310_v58 = vrot.slane %v15633_v1, 2  ;;  %v2311_v27 = vrot.slane %v1446_v48, 7  ;;  %v2454_v62 = vcombine.low %v13531_v60, %v13537_v22 }
 0x1ee   : > { %10126 = vmatprep.mubr.msk.f32.mxu0 %vm781_vm1, %v13662_v37  ;;  %10907 = vmatpush3.bf16.msra.mxu0 %v10904_v42  ;;  %v2445_v21 = vrot.slane %v2437_v12, %v12822_v39  ;;  %v2452_v17 = vrot.slane %v2438_v49, %v12822_v39  ;;  %v2455_v46 = vcombine.low %v13545_v36, %v13552_v31  ;;  %v15635_v42 = vld [vmem:[#allocation71_spill] sm:$0xff] }
 0x1ef   : > { %10909 = vmatprep.subr.bf16.mxu0 %v10908_v2  ;;  %v13727_v14 = vcombine.low %v2428_v0, %v2435_v10  ;;  %v2312_v24 = vsel %vm12903_vm8, %v2310_v58, %v2311_v27  ;;  %v2471_v16 = vcombine.low %v13572_v47, %v13586_v59  ;;  %v2462_v60 = vrot.slane %v2454_v62, %v12822_v39  ;;  %v15638_v0 = vld [vmem:[#allocation59_spill] sm:$0xff] }
 0x1f0   : > { %v13737_v50 = vcombine.low %v2445_v21, %v2452_v17  ;;  %v2472_v44 = vcombine.low %v13592_v45, %v2312_v24  ;;  %v2469_v22 = vrot.slane %v2455_v46, %v12822_v39  ;;  %v9071_v45 = vld [vmem:[%s15531_s11 + $0x90] sm:$0xff]  ;;  %v10916_v8 = vpack.c.bf16 %v9090_v55, %v9089_v40  ;;  %v15639_v21 = vld [vmem:[#allocation60_spill] sm:$0xff] }
 0x1f1   : > { %10127 = vmatmul.mubr.msk.f32.gmra.mrb[4].mxu0 %vm781_vm1, %v13676_v19  ;;  %v2479_v36 = vrot.slane %v2471_v16, %v12822_v39  ;;  %v10912_v26 = vpack.c.bf16 %v9072_v6, %v9071_v45  ;;  %v10920_v25 = vpack.c.bf16 %v9092_v41, %v9091_v15 }
 0x1f2   : > { %10129 = vmatprep.mubr.msk.f32.mxu0 %vm781_vm1, %v13702_v30  ;;  %v2486_v31 = vrot.slane %v2472_v44, %v12822_v39  ;;  %v13752_v47 = vcombine.low %v2462_v60, %v2469_v22 }
 0x1f4   : > { %v13756_v59 = vcombine.low %v2479_v36, %v2486_v31  ;;  %v807_v32 = vld [vmem:[#allocation2 + $0x50] sm:$0xff]  ;;  %v8987_v1 = vld.sshfl [vmem:[#allocation2 + $0x58] sm:$0x11 pattern:$0x75316420] }
 0x1f5   : > { %10130 = vmatmul.mubr.msk.f32.gmra.mrb[6].mxu0 %vm781_vm1, %v13710_v51  ;;  %v1176_v56 = vcombine.high %v807_v32, %v807_v32  ;;  %v1183_v35 = vrot.slane %v807_v32, %v12793_v28  ;;  %v1239_v16 = vrot.slane %v8987_v1, %v12793_v28 }
 0x1f6   : > { %10132 = vmatprep.mubr.msk.f32.mxu0 %vm781_vm1, %v13702_v30 }
 0x1f7   : > { %v1190_v54 = vrot.slane %v1176_v56, %v12793_v28  ;;  %v1191_v63 = vcombine.high %v1183_v35, %v1183_v35  ;;  %v13823_v53 = vrot.slane %v1183_v35, %v12793_v28  ;;  %v13878_v40 = vrot.slane %v1239_v16, %v12811_v34 }
 0x1f9   : > { %10133 = vmatmul.mubr.msk.f32.gmra.mrb[8].mxu0 %vm781_vm1, %v13710_v51  ;;  %v1192_v11 = vcombine.high %v1190_v54, %v1190_v54  ;;  %v1206_v29 = vrot.slane %v1190_v54, %v12793_v28  ;;  %v1213_v57 = vrot.slane %v1191_v63, %v12793_v28  ;;  %v1221_v48 = vcombine.high %v13823_v53, %v13823_v53  ;;  %v15641_v54 = vld [vmem:[#allocation67_spill] sm:$0xff] }
 0x1fa   : > { %10135 = vmatprep.mubr.msk.f32.mxu0 %vm781_vm1, %v13727_v14 }
 0x1fb   : > { %v1220_v20 = vrot.slane %v1192_v11, %v12793_v28  ;;  %v1223_v12 = vcombine.high %v1213_v57, %v1213_v57  ;;  %v1222_v49 = vcombine.high %v1206_v29, %v1206_v29  ;;  %v13842_v58 = vrot.slane %v1213_v57, %v12811_v34 }
 0x1fc   : > { %v13845_v27 = vrot.slane %v1221_v48, %v12811_v34  ;;  %v13853_v62 = vrot.slane %v1206_v29, %v12811_v34 }
 0x1fd   : > { %10136 = vmatmul.mubr.msk.f32.gmra.mrb[10].mxu0 %vm781_vm1, %v13737_v50  ;;  %v1224_v10 = vcombine.high %v1220_v20, %v1220_v20  ;;  %v13850_v17 = vrot.slane %v1223_v12, %v12811_v34  ;;  %v13856_v46 = vrot.slane %v1220_v20, %v12811_v34  ;;  %v13859_v24 = vrot.slane %v1222_v49, %v12811_v34 }
 0x1fe   : > { %10138 = vmatprep.mubr.msk.f32.mxu0 %vm781_vm1, %v13727_v14  ;;  %v15419_v60 = vrot.slane %v13842_v58, 7  ;;  %v3172_v22 = vrot.slane %v13845_v27, 7  ;;  %v3178_v31 = vrot.slane %v13853_v62, 7 }
 0x1ff   : > { %v13865_v44 = vrot.slane %v1224_v10, %v12811_v34  ;;  %v3175_v36 = vrot.slane %v13850_v17, 7  ;;  %v3181_v45 = vrot.slane %v13856_v46, 7  ;;  %v3184_v6 = vrot.slane %v13859_v24, 7 }
 0x200   : > { %v3171_v32 = vrot.slane %v15419_v60, 2  ;;  %v3174_v56 = vrot.slane %v3172_v22, 2  ;;  %v3180_v41 = vrot.slane %v3178_v31, 2  ;;  %v9131_v60 = vld [vmem:[%s15531_s11 + $0xe8] sm:$0xff] }
 0x201   : > { %10139 = vmatmul.mubr.msk.f32.gmra.mrb[12].mxu0 %vm781_vm1, %v13737_v50  ;;  %v3187_v55 = vrot.slane %v13865_v44, 7  ;;  %v3177_v15 = vrot.slane %v3175_v36, 2  ;;  %v3183_v63 = vrot.slane %v3181_v45, 2  ;;  %v3186_v11 = vrot.slane %v3184_v6, 2 }
 0x202   : > { %10141 = vmatprep.mubr.msk.f32.mxu0 %vm781_vm1, %v13752_v47  ;;  %v13892_v29 = vsel %vm12903_vm8, %v3171_v32, %v3172_v22  ;;  %v13906_v12 = vsel %vm12903_vm8, %v3180_v41, %v3181_v45  ;;  %v15643_v32 = vld [vmem:[#allocation69_spill] sm:$0xff] }
 0x203   : > { %v13902_v48 = vsel %vm12903_vm8, %v3177_v15, %v3178_v31  ;;  %v13910_v49 = vsel %vm12903_vm8, %v3183_v63, %v3184_v6  ;;  %v13914_v10 = vsel %vm12903_vm8, %v3186_v11, %v3187_v55  ;;  %v9112_v63 = vld [vmem:[%s15531_s11 + $0xd0] sm:$0xff]  ;;  %v9113_v11 = vld [vmem:[%s15531_s11 + $0xd8] sm:$0xff] }
 0x204   : > { %v3625_v45 = vcombine.low %v13910_v49, %v13914_v10  ;;  %v3902_v15 = vld [vmem:[%s12715_s19] sm:$0xff] }
 0x205   : > { %10142 = vmatmul.mubr.msk.f32.gmra.mrb[14].mxu0 %vm781_vm1, %v13756_v59  ;;  %3911 = vst.msk [vmem:[#allocation3 + $0x31] sm:$0xff] %vm3851_vm10, %v3902_v15 }
 0x206   : > { %10152 = vmatprep.mubr.msk.f32.mxu0 %vm781_vm1, %v13349_v7 }
 0x209   : > { %10153 = vmatmul.mubr.msk.f32.vlgmr.msra.gmra.mrb[0].mxu0 %vm781_vm1, %v15634_v4 }
 0x20a   : > { %10911 = vmatpush3.bf16.msra.mxu0 %v10908_v2  ;;  %10155 = vmatprep.mubr.msk.f32.mxu0 %vm781_vm1, %v13349_v7  ;;  %v9111_v2 = vld [vmem:[%s15531_s11 + $0xc8] sm:$0xff] }
 0x20b   : > { %10913 = vmatprep.subr.bf16.mxu0 %v10912_v26  ;;  %v13832_v38 = vpack.c.bf16 %v9111_v2, %v9110_v18  ;;  %v3190_v18 = vrot.slane %v13878_v40, 7 }
 0x20d   : > { %10156 = vmatmul.mubr.msk.f32.gmra.mrb[2].mxu0 %vm781_vm1, %v15634_v4  ;;  %v3600_v57 = vrot.slane %v3190_v18, 2 }
 0x20e   : > { %10158 = vmatprep.mubr.msk.f32.mxu0 %vm781_vm1, %v15635_v42  ;;  %10915 = vmatpush3.bf16.msra.mxu0 %v10912_v26  ;;  %v15640_v26 = vld [vmem:[#allocation66_spill] sm:$0xff] }
 0x20f   : > { %10917 = vmatprep.subr.bf16.mxu0 %v10916_v8 }
 0x211   : > { %10159 = vmatmul.mubr.msk.f32.gmra.mrb[4].mxu0 %vm781_vm1, %v13479_v13 }
 0x212   : > { %10161 = vmatprep.mubr.msk.f32.mxu0 %vm781_vm1, %v15635_v42 }
 0x215   : > { %10162 = vmatmul.mubr.msk.f32.gmra.mrb[6].mxu0 %vm781_vm1, %v13479_v13 }
 0x216   : > { %10164 = vmatprep.mubr.msk.f32.mxu0 %vm781_vm1, %v13513_v23 }
 0x219   : > { %10165 = vmatmul.mubr.msk.f32.gmra.mrb[8].mxu0 %vm781_vm1, %v13580_v61 }
 0x21a   : > { %10167 = vmatprep.mubr.msk.f32.mxu0 %vm781_vm1, %v13513_v23 }
 0x21d   : > { %10168 = vmatmul.mubr.msk.f32.gmra.mrb[10].mxu0 %vm781_vm1, %v13580_v61 }
 0x21e   : > { %10170 = vmatprep.mubr.msk.f32.mxu0 %vm781_vm1, %v13620_v9 }
 0x221   : > { %10171 = vmatmul.mubr.msk.f32.gmra.mrb[12].mxu0 %vm781_vm1, %v13632_v33 }
 0x222   : > { %10173 = vmatprep.mubr.msk.f32.mxu0 %vm781_vm1, %v13620_v9 }
 0x225   : > { %10174 = vmatmul.mubr.msk.f32.gmra.mrb[14].mxu0 %vm781_vm1, %v13632_v33 }
 0x226   : > { %10184 = vmatprep.mubr.msk.f32.mxu0 %vm781_vm1, %v15636_v3 }
 0x229   : > { %10185 = vmatmul.mubr.msk.f32.vlgmr.msra.gmra.mrb[0].mxu0 %vm781_vm1, %v15637_v52 }
 0x22a   : > { %10919 = vmatpush3.bf16.msra.mxu0 %v10916_v8  ;;  %10187 = vmatprep.mubr.msk.f32.mxu0 %vm781_vm1, %v15636_v3  ;;  %v1232_v8 = vcombine.high %v8987_v1, %v8987_v1  ;;  %v15642_v1 = vld [vmem:[#allocation68_spill] sm:$0xff] }
 0x22b   : > { %10921 = vmatprep.subr.bf16.mxu0 %v10920_v25 }
 0x22c   : > { %v1246_v35 = vrot.slane %v1232_v8, %v12793_v28  ;;  %v13896_v28 = vsel %vm12903_vm8, %v3174_v56, %v3175_v36  ;;  %v3609_v36 = vcombine.low %v13902_v48, %v13906_v12  ;;  %v3633_v56 = vrot.slane %v3625_v45, %v12822_v39  ;;  %v3957_v45 = vld [vmem:[%s15648_s7 + $0x8] sm:$0xff] }
 0x22d   : > { %10188 = vmatmul.mubr.msk.f32.gmra.mrb[2].mxu0 %vm781_vm1, %v15637_v52  ;;  %v3608_v22 = vcombine.low %v13892_v29, %v13896_v28 }
 0x22e   : > { %10190 = vmatprep.mubr.msk.f32.mxu0 %vm781_vm1, %v15638_v0  ;;  %10923 = vmatpush3.bf16.msra.mxu0 %v10920_v25  ;;  %v3189_v25 = vrot.slane %v3187_v55, 2  ;;  %v1486_v2 = vrot.slane %v1246_v35, %v12811_v34  ;;  %v13935_v8 = vrot.slane %v3609_v36, %v12822_v39 }
 0x22f   : > { %10925 = vmatprep.subr.bf16.mxu0 %v13832_v38  ;;  %v13932_v55 = vrot.slane %v3608_v22, %v12822_v39  ;;  %v15647_v22 = vld [vmem:[#allocation50_spill] sm:$0xff] }
 0x230   : > { %v3601_v20 = vrot.slane %v1486_v2, 7  ;;  %v13920_v16 = vsel %vm12903_vm8, %v3189_v25, %v3190_v18  ;;  %v3958_v25 = vld [vmem:[%s15644_s18] sm:$0xff]  ;;  %v3959_v18 = vld [vmem:[%s15645_s9 + $0x8] sm:$0xff]  ;;  %v3890_v2 = vld [vmem:[%s12722_s24] sm:$0xff] }
 0x231   : > { %10191 = vmatmul.mubr.msk.f32.gmra.mrb[4].mxu0 %vm781_vm1, %v15639_v21  ;;  %v3894_v36 = vmul.f32 %v3890_v2, %v15647_v22  ;;  %v3893_v2 = vld [vmem:[%s12722_s24 + $0x18] sm:$0xff]  ;;  %v3215_v43 = vcombine.low %v13914_v10, %v13920_v16  ;;  %v9196_v10 = vld [vmem:[%s15648_s7 + $0x18] sm:$0xff] }
 0x232   : > { %10193 = vmatprep.mubr.msk.f32.mxu0 %vm781_vm1, %v15638_v0  ;;  %v3602_v31 = vsel %vm12903_vm8, %v3600_v57, %v3601_v20  ;;  %v13964_v57 = vpack.c.bf16 %v3959_v18, %v3958_v25  ;;  %v15646_v20 = vmov 0.0   ;;  %v3892_v18 = vld [vmem:[%s12722_s24 + $0x10] sm:$0xff] }
 0x233   : > { %v3626_v6 = vcombine.low %v13920_v16, %v3602_v31  ;;  %3874 = vst.msk [vmem:[#allocation3] sm:$0x1] %vm3830_vm9, %v15646_v20  ;;  %3831 = vst.msk [vmem:[#allocation4] sm:$0x1] %vm3830_vm9, %v15646_v20  ;;  %v3956_v31 = vld [vmem:[%s15648_s7] sm:$0xff] }
 0x234   : > { %3832 = vst.msk [vmem:[#allocation4 + $0x18] sm:$0x1] %vm3830_vm9, %v15646_v20  ;;  %3833 = vst.msk [vmem:[#allocation4 + $0x30] sm:$0x1] %vm3830_vm9, %v15646_v20  ;;  %10949 = vmatprep.subr.bf16.mxu1 %v13964_v57 }
 0x235   : > { %10194 = vmatmul.mubr.msk.f32.gmra.mrb[6].mxu0 %vm781_vm1, %v15639_v21  ;;  %v3640_v35 = vrot.slane %v3626_v6, %v12822_v39  ;;  %3834 = vst.msk [vmem:[#allocation4 + $0x48] sm:$0x1] %vm3830_vm9, %v15646_v20  ;;  %3835 = vst.msk [vmem:[#allocation4 + $0x60] sm:$0x1] %vm3830_vm9, %v15646_v20  ;;  %v3891_v6 = vld [vmem:[%s12722_s24 + $0x8] sm:$0xff]  ;;  %10951 = vmatpush3.bf16.msra.mxu1 %v13964_v57  ;;  %s15654_s24 = sld [smem:[#allocation79_spill]] }
 0x236   : > { %10196 = vmatprep.mubr.msk.f32.mxu0 %vm781_vm1, %v15640_v26  ;;  %3836 = vst.msk [vmem:[#allocation4 + $0x78] sm:$0x1] %vm3830_vm9, %v15646_v20  ;;  %3837 = vst.msk [vmem:[#allocation4 + $0x90] sm:$0x1] %vm3830_vm9, %v15646_v20  ;;  %v3895_v25 = vmul.f32 %v3891_v6, %v15647_v22 }
 0x237   : > { %v13945_v41 = vcombine.low %v3633_v56, %v3640_v35  ;;  %3838 = vst.msk [vmem:[#allocation4 + $0xa8] sm:$0x1] %vm3830_vm9, %v15646_v20  ;;  %3839 = vst.msk [vmem:[#allocation4 + $0x11] sm:$0x1] %vm3830_vm9, %v15646_v20  ;;  %v10928_v56 = vpack.c.bf16 %v9113_v11, %v9112_v63  ;;  %v10952_v35 = vpack.c.bf16 %v3957_v45, %v3956_v31  ;;  %v3903_v31 = vld [vmem:[%s12715_s19 + $0x8] sm:$0xff] }
 0x238   : > { %3840 = vst.msk [vmem:[#allocation4 + $0x29] sm:$0x1] %vm3830_vm9, %v15646_v20  ;;  %3841 = vst.msk [vmem:[#allocation4 + $0x41] sm:$0x1] %vm3830_vm9, %v15646_v20  ;;  %v3896_v63 = vmul.f32 %v3892_v18, %v15647_v22  ;;  %v3897_v11 = vmul.f32 %v3893_v2, %v15647_v22  ;;  %v9150_v18 = vld [vmem:[%s15531_s11 + $0x100] sm:$0xff]  ;;  %v9151_v2 = vld [vmem:[%s15531_s11 + $0x108] sm:$0xff] }
 0x239   : > { %10197 = vmatmul.mubr.msk.f32.gmra.mrb[8].mxu0 %vm781_vm1, %v15641_v54  ;;  %3842 = vst.msk [vmem:[#allocation4 + $0x59] sm:$0x1] %vm3830_vm9, %v15646_v20  ;;  %3843 = vst.msk [vmem:[#allocation4 + $0x71] sm:$0x1] %vm3830_vm9, %v15646_v20  ;;  %10953 = vmatprep.subr.bf16.mxu1 %v10952_v35 }
 0x23a   : > { %10199 = vmatprep.mubr.msk.f32.mxu0 %vm781_vm1, %v15640_v26  ;;  %3844 = vst.msk [vmem:[#allocation4 + $0x89] sm:$0x1] %vm3830_vm9, %v15646_v20  ;;  %3845 = vst.msk [vmem:[#allocation4 + $0xa1] sm:$0x1] %vm3830_vm9, %v15646_v20 }
 0x23b   : > { %3846 = vst.msk [vmem:[#allocation4 + $0xb9] sm:$0x1] %vm3830_vm9, %v15646_v20  ;;  %3875 = vst.msk [vmem:[#allocation3 + $0x18] sm:$0x1] %vm3830_vm9, %v15646_v20  ;;  %v14318_v16 = vld [vmem:[%s15654_s24] ss:$0 sm:$0xff] }
 0x23c   : > { %3876 = vst.msk [vmem:[#allocation3 + $0x30] sm:$0x1] %vm3830_vm9, %v15646_v20  ;;  %3877 = vst.msk [vmem:[#allocation3 + $0x48] sm:$0x1] %vm3830_vm9, %v15646_v20 }
 0x23d   : > { %10200 = vmatmul.mubr.msk.f32.gmra.mrb[10].mxu0 %vm781_vm1, %v15641_v54  ;;  %3878 = vst.msk [vmem:[#allocation3 + $0x60] sm:$0x1] %vm3830_vm9, %v15646_v20  ;;  %3879 = vst.msk [vmem:[#allocation3 + $0x78] sm:$0x1] %vm3830_vm9, %v15646_v20 }
 0x23e   : > { %10202 = vmatprep.mubr.msk.f32.mxu0 %vm781_vm1, %v15642_v1  ;;  %3880 = vst.msk [vmem:[#allocation3 + $0x90] sm:$0x1] %vm3830_vm9, %v15646_v20  ;;  %3881 = vst.msk [vmem:[#allocation3 + $0xa8] sm:$0x1] %vm3830_vm9, %v15646_v20 }
 0x23f   : > { %3882 = vst.msk [vmem:[#allocation3 + $0x11] sm:$0x1] %vm3830_vm9, %v15646_v20  ;;  %3883 = vst.msk [vmem:[#allocation3 + $0x29] sm:$0x1] %vm3830_vm9, %v15646_v20 }
 0x240   : > { %3884 = vst.msk [vmem:[#allocation3 + $0x41] sm:$0x1] %vm3830_vm9, %v15646_v20  ;;  %3885 = vst.msk [vmem:[#allocation3 + $0x59] sm:$0x1] %vm3830_vm9, %v15646_v20 }
 0x241   : > { %10203 = vmatmul.mubr.msk.f32.gmra.mrb[12].mxu0 %vm781_vm1, %v15643_v32  ;;  %3886 = vst.msk [vmem:[#allocation3 + $0x71] sm:$0x1] %vm3830_vm9, %v15646_v20  ;;  %3887 = vst.msk [vmem:[#allocation3 + $0x89] sm:$0x1] %vm3830_vm9, %v15646_v20 }
 0x242   : > { %10205 = vmatprep.mubr.msk.f32.mxu0 %vm781_vm1, %v15642_v1  ;;  %3888 = vst.msk [vmem:[#allocation3 + $0xa1] sm:$0x1] %vm3830_vm9, %v15646_v20  ;;  %3889 = vst.msk [vmem:[#allocation3 + $0xb9] sm:$0x1] %vm3830_vm9, %v15646_v20 }
 0x243   : > { %7323 = vst.msk [vmem:[#allocation5] sm:$0x1] %vm3830_vm9, %v15646_v20  ;;  %7324 = vst.msk [vmem:[#allocation5 + $0x18] sm:$0x1] %vm3830_vm9, %v15646_v20  ;;  %v14104_v45 = vld [vmem:[#allocation3 + $0x30] sm:$0xff] }
 0x244   : > { %7325 = vst.msk [vmem:[#allocation5 + $0x30] sm:$0x1] %vm3830_vm9, %v15646_v20  ;;  %7326 = vst.msk [vmem:[#allocation5 + $0x48] sm:$0x1] %vm3830_vm9, %v15646_v20 }
 0x245   : > { %10206 = vmatmul.mubr.msk.f32.gmra.mrb[14].mxu0 %vm781_vm1, %v15643_v32  ;;  %7327 = vst.msk [vmem:[#allocation5 + $0x60] sm:$0x1] %vm3830_vm9, %v15646_v20  ;;  %7328 = vst.msk [vmem:[#allocation5 + $0x78] sm:$0x1] %vm3830_vm9, %v15646_v20 }
 0x246   : > { %10216 = vmatprep.mubr.msk.f32.mxu0 %vm781_vm1, %v13662_v37  ;;  %7329 = vst.msk [vmem:[#allocation5 + $0x11] sm:$0x1] %vm3830_vm9, %v15646_v20  ;;  %7330 = vst.msk [vmem:[#allocation5 + $0x29] sm:$0x1] %vm3830_vm9, %v15646_v20 }
 0x247   : > { %7331 = vst.msk [vmem:[#allocation5 + $0x41] sm:$0x1] %vm3830_vm9, %v15646_v20  ;;  %7332 = vst.msk [vmem:[#allocation5 + $0x59] sm:$0x1] %vm3830_vm9, %v15646_v20 }
 0x248   : > { %7333 = vst.msk [vmem:[#allocation5 + $0x71] sm:$0x1] %vm3830_vm9, %v15646_v20  ;;  %7334 = vst.msk [vmem:[#allocation5 + $0x89] sm:$0x1] %vm3830_vm9, %v15646_v20  ;;  %v9130_v20 = vld [vmem:[%s15531_s11 + $0xe0] sm:$0xff] }
 0x249   : > { %3898 = vst.msk [vmem:[#allocation3 + $0x1] sm:$0xff] %vm3851_vm10, %v3894_v36  ;;  %10217 = vmatmul.mubr.msk.f32.vlgmr.msra.gmra.mrb[0].mxu0 %vm781_vm1, %v13676_v19  ;;  %3899 = vst.msk [vmem:[#allocation3 + $0x9] sm:$0xff] %vm3851_vm10, %v3895_v25  ;;  %v10932_v15 = vpack.c.bf16 %v9131_v60, %v9130_v20  ;;  %v10940_v20 = vpack.c.bf16 %v9151_v2, %v9150_v18 }
 0x24a   : > { %3912 = vst.msk [vmem:[#allocation3 + $0x39] sm:$0xff] %vm3851_vm10, %v3903_v31  ;;  %10927 = vmatpush3.bf16.msra.mxu0 %v13832_v38  ;;  %10219 = vmatprep.mubr.msk.f32.mxu0 %vm781_vm1, %v13662_v37  ;;  %3900 = vst.msk [vmem:[#allocation3 + $0x19] sm:$0xff] %vm3851_vm10, %v3896_v63 }
 0x24b   : > { %3901 = vst.msk [vmem:[#allocation3 + $0x21] sm:$0xff] %vm3851_vm10, %v3897_v11  ;;  %10929 = vmatprep.subr.bf16.mxu0 %v10928_v56 }
 0x24d   : > { %10220 = vmatmul.mubr.msk.f32.gmra.mrb[2].mxu0 %vm781_vm1, %v13676_v19 }
 0x24e   : > { %10222 = vmatprep.mubr.msk.f32.mxu0 %vm781_vm1, %v13702_v30  ;;  %10931 = vmatpush3.bf16.msra.mxu0 %v10928_v56  ;;  %v9132_v56 = vld [vmem:[%s15531_s11 + $0xf0] sm:$0xff] }
 0x24f   : > { %10933 = vmatprep.subr.bf16.mxu0 %v10932_v15 }
 0x250   : > { %v3944_v57 = vld [vmem:[#allocation3] sm:$0xff]  ;;  %v3945_v38 = vld [vmem:[#allocation3 + $0x8] sm:$0xff] }
 0x251   : > { %10340 = vmatprep.mubr.msk.f32.mxu1 %vm3851_vm10, %v3944_v57  ;;  %10223 = vmatmul.mubr.msk.f32.gmra.mrb[4].mxu0 %vm781_vm1, %v13710_v51  ;;  %v14096_v36 = vld [vmem:[#allocation3 + $0x18] sm:$0xff] }
 0x252   : > { %10341 = vmatmul.mubr.msk.f32.vlgmr.msra.gmra.mrb[0].mxu1 %vm3851_vm10, %v3945_v38  ;;  %10225 = vmatprep.mubr.msk.f32.mxu0 %vm781_vm1, %v13702_v30  ;;  %v14100_v60 = vld [vmem:[#allocation3 + $0x20] sm:$0xff]  ;;  %v14114_v6 = vld [vmem:[#allocation3 + $0x38] sm:$0xff] }
 0x253   : > { %10955 = vmatpush3.bf16.msra.mxu1 %v10952_v35  ;;  %10343 = vmatprep.mubr.msk.f32.mxu1 %vm3851_vm10, %v14096_v36  ;;  %v9133_v35 = vld [vmem:[%s15531_s11 + $0xf8] sm:$0xff] }
 0x254   : > { %v10936_v25 = vpack.c.bf16 %v9133_v35, %v9132_v56 }
 0x255   : > { %10226 = vmatmul.mubr.msk.f32.gmra.mrb[6].mxu0 %vm781_vm1, %v13710_v51 }
 0x256   : > { %10344 = vmatmul.mubr.msk.f32.gmra.mrb[2].mxu1 %vm3851_vm10, %v14100_v60  ;;  %10228 = vmatprep.mubr.msk.f32.mxu0 %vm781_vm1, %v13727_v14 }
 0x257   : > { %10346 = vmatprep.mubr.msk.f32.mxu1 %vm3851_vm10, %v14104_v45 }
 0x259   : > { %10229 = vmatmul.mubr.msk.f32.gmra.mrb[8].mxu0 %vm781_vm1, %v13737_v50 }
 0x25a   : > { %10347 = vmatmul.mubr.msk.f32.gmra.mrb[4].mxu1 %vm3851_vm10, %v14114_v6  ;;  %10231 = vmatprep.mubr.msk.f32.mxu0 %vm781_vm1, %v13727_v14 }
 0x25d   : > { %10232 = vmatmul.mubr.msk.f32.gmra.mrb[10].mxu0 %vm781_vm1, %v13737_v50 }
 0x25e   : > { %10234 = vmatprep.mubr.msk.f32.mxu0 %vm781_vm1, %v13752_v47 }
 0x261   : > { %10235 = vmatmul.mubr.msk.f32.gmra.mrb[12].mxu0 %vm781_vm1, %v13756_v59 }
 0x262   : > { %10237 = vmatprep.mubr.msk.f32.mxu0 %vm781_vm1, %v13752_v47 }
 0x265   : > { %10238 = vmatmul.mubr.msk.f32.gmra.mrb[14].mxu0 %vm781_vm1, %v13756_v59 }
 0x266   : > { %10248 = vmatprep.mubr.msk.f32.mxu0 %vm781_vm1, %v13349_v7  ;;  %v1450_v7 = vrot.slane %v13823_v53, %v12811_v34  ;;  %v3198_v53 = vcombine.low %v13896_v28, %v13902_v48 }
 0x268   : > { %v9109_v63 = vrot.slane %v1450_v7, 9 }
 0x269   : > { %10249 = vmatmul.mubr.msk.f32.vlgmr.msra.gmra.mrb[0].mxu0 %vm781_vm1, %v15634_v4  ;;  %v15649_v4 = vrot.slane %v13842_v58, 7 }
 0x26a   : > { %10935 = vmatpush3.bf16.msra.mxu0 %v10932_v15  ;;  %10251 = vmatprep.mubr.msk.f32.mxu0 %vm781_vm1, %v15635_v42 }
 0x26b   : > { %10937 = vmatprep.subr.bf16.mxu0 %v10936_v25  ;;  %v3170_v34 = vsel %vm12903_vm8, %v9109_v63, %v15649_v4  ;;  %v9209_v4 = vld [vmem:[%s15645_s9 + $0x10] sm:$0xff] }
 0x26d   : > { %10252 = vmatmul.mubr.msk.f32.gmra.mrb[2].mxu0 %vm781_vm1, %v13479_v13 }
 0x26e   : > { %10254 = vmatprep.mubr.msk.f32.mxu0 %vm781_vm1, %v15635_v42  ;;  %10939 = vmatpush3.bf16.msra.mxu0 %v10936_v25  ;;  %v3197_v42 = vcombine.low %v3170_v34, %v13892_v29  ;;  %v9210_v34 = vld [vmem:[%s15645_s9 + $0x18] sm:$0xff] }
 0x26f   : > { %10941 = vmatprep.subr.bf16.mxu0 %v10940_v20 }
 0x270   : > { %v3205_v11 = vrot.slane %v3197_v42, %v12822_v39 }
 0x271   : > { %10255 = vmatmul.mubr.msk.f32.gmra.mrb[4].mxu0 %vm781_vm1, %v13479_v13  ;;  %v3214_v13 = vcombine.low %v13906_v12, %v13910_v49  ;;  %v9152_v12 = vld [vmem:[%s15531_s11 + $0x110] sm:$0xff]  ;;  %v9153_v49 = vld [vmem:[%s15531_s11 + $0x118] sm:$0xff] }
 0x272   : > { %10257 = vmatprep.mubr.msk.f32.mxu0 %vm781_vm1, %v13513_v23 }
 0x273   : > { %v3222_v29 = vrot.slane %v3214_v13, %v12822_v39 }
 0x275   : > { %10258 = vmatmul.mubr.msk.f32.gmra.mrb[6].mxu0 %vm781_vm1, %v13580_v61 }
 0x276   : > { %10260 = vmatprep.mubr.msk.f32.mxu0 %vm781_vm1, %v13513_v23  ;;  %v3212_v23 = vrot.slane %v3198_v53, %v12822_v39 }
 0x278   : > { %v3213_v28 = vcombine.low %v3205_v11, %v3212_v23  ;;  %v14343_v23 = vpack.c.bf16 %v9210_v34, %v9209_v4 }
 0x279   : > { %10261 = vmatmul.mubr.msk.f32.gmra.mrb[8].mxu0 %vm781_vm1, %v13580_v61  ;;  %v3229_v61 = vrot.slane %v3215_v43, %v12822_v39 }
 0x27a   : > { %10263 = vmatprep.mubr.msk.f32.mxu0 %vm781_vm1, %v13620_v9 }
 0x27b   : > { %v3230_v48 = vcombine.low %v3222_v29, %v3229_v61 }
 0x27d   : > { %10264 = vmatmul.mubr.msk.f32.gmra.mrb[10].mxu0 %vm781_vm1, %v13632_v33 }
 0x27e   : > { %10266 = vmatprep.mubr.msk.f32.mxu0 %vm781_vm1, %v13620_v9  ;;  %v10944_v9 = vpack.c.bf16 %v9153_v49, %v9152_v12 }
 0x281   : > { %10267 = vmatmul.mubr.msk.f32.gmra.mrb[12].mxu0 %vm781_vm1, %v13632_v33  ;;  %v3401_v33 = vcombine.low %v13842_v58, %v13845_v27 }
 0x282   : > { %10269 = vmatprep.mubr.msk.f32.mxu0 %vm781_vm1, %v3213_v28 }
 0x285   : > { %10270 = vmatmul.mubr.msk.f32.gmra.mrb[14].mxu0 %vm781_vm1, %v3230_v48 }
 0x286   : > { %10280 = vmatprep.mubr.msk.f32.mxu0 %vm781_vm1, %v15636_v3  ;;  %v3402_v3 = vcombine.low %v13850_v17, %v13853_v62 }
 0x289   : > { %10281 = vmatmul.mubr.msk.f32.vlgmr.msra.gmra.mrb[0].mxu0 %vm781_vm1, %v15637_v52  ;;  %v3418_v52 = vcombine.low %v13856_v46, %v13859_v24 }
 0x28a   : > { %10943 = vmatpush3.bf16.msra.mxu0 %v10940_v20  ;;  %10283 = vmatprep.mubr.msk.f32.mxu0 %vm781_vm1, %v15638_v0 }
 0x28b   : > { %10945 = vmatprep.subr.bf16.mxu0 %v10944_v9  ;;  %v3426_v58 = vrot.slane %v3418_v52, %v12822_v39 }
 0x28d   : > { %10284 = vmatmul.mubr.msk.f32.gmra.mrb[2].mxu0 %vm781_vm1, %v15639_v21 }
 0x28e   : > { %10286 = vmatprep.mubr.msk.f32.mxu0 %vm781_vm1, %v15638_v0  ;;  %10947 = vmatpush3.bf16.msra.mxu0 %v10944_v9  ;;  %v3419_v0 = vcombine.low %v13865_v44, %v13878_v40 }
 0x290   : > { %v3433_v27 = vrot.slane %v3419_v0, %v12822_v39 }
 0x291   : > { %10287 = vmatmul.mubr.msk.f32.gmra.mrb[4].mxu0 %vm781_vm1, %v15639_v21  ;;  %v3409_v21 = vrot.slane %v3401_v33, %v12822_v39 }
 0x292   : > { %10289 = vmatprep.mubr.msk.f32.mxu0 %vm781_vm1, %v15640_v26  ;;  %v3434_v62 = vcombine.low %v3426_v58, %v3433_v27 }
 0x295   : > { %10290 = vmatmul.mubr.msk.f32.gmra.mrb[6].mxu0 %vm781_vm1, %v15641_v54 }
 0x296   : > { %10292 = vmatprep.mubr.msk.f32.mxu0 %vm781_vm1, %v15640_v26  ;;  %v3416_v26 = vrot.slane %v3402_v3, %v12822_v39  ;;  %v15650_v39 = vcombine.low %v13932_v55, %v13935_v8 }
 0x298   : > { %v3417_v17 = vcombine.low %v3409_v21, %v3416_v26 }
 0x299   : > { %10293 = vmatmul.mubr.msk.f32.gmra.mrb[8].mxu0 %vm781_vm1, %v15641_v54  ;;  %v9195_v54 = vld [vmem:[%s15648_s7 + $0x10] sm:$0xff] }
 0x29a   : > { %10295 = vmatprep.mubr.msk.f32.mxu0 %vm781_vm1, %v15642_v1 }
 0x29d   : > { %10296 = vmatmul.mubr.msk.f32.gmra.mrb[10].mxu0 %vm781_vm1, %v15643_v32 }
 0x29e   : > { %10298 = vmatprep.mubr.msk.f32.mxu0 %vm781_vm1, %v15642_v1  ;;  %v10956_v1 = vpack.c.bf16 %v9196_v10, %v9195_v54 }
 0x2a0   : > { %10957 = vmatprep.subr.bf16.mxu1 %v10956_v1 }
 0x2a1   : > { %10299 = vmatmul.mubr.msk.f32.gmra.mrb[12].mxu0 %vm781_vm1, %v15643_v32 }
 0x2a2   : > { %10301 = vmatprep.mubr.msk.f32.mxu0 %vm781_vm1, %v3417_v17 }
 0x2a5   : > { %10302 = vmatmul.mubr.msk.f32.gmra.mrb[14].mxu0 %vm781_vm1, %v3434_v62 }
 0x2a6   : > { %10312 = vmatprep.mubr.msk.f32.mxu0 %vm781_vm1, %v13662_v37  ;;  %v3904_v37 = vld [vmem:[%s12715_s19 + $0x10] sm:$0xff] }
 0x2a7   : > { %3913 = vst.msk [vmem:[#allocation3 + $0x49] sm:$0xff] %vm3851_vm10, %v3904_v37 }
 0x2a9   : > { %10313 = vmatmul.mubr.msk.f32.vlgmr.msra.gmra.mrb[0].mxu0 %vm781_vm1, %v13676_v19  ;;  %v3905_v19 = vld [vmem:[%s12715_s19 + $0x18] sm:$0xff] }
 0x2aa   : > { %10315 = vmatprep.mubr.msk.f32.mxu0 %vm781_vm1, %v13702_v30  ;;  %3914 = vst.msk [vmem:[#allocation3 + $0x51] sm:$0xff] %vm3851_vm10, %v3905_v19 }
 0x2ad   : > { %10316 = vmatmul.mubr.msk.f32.gmra.mrb[2].mxu0 %vm781_vm1, %v13710_v51 }
 0x2ae   : > { %10318 = vmatprep.mubr.msk.f32.mxu0 %vm781_vm1, %v13702_v30  ;;  %v3906_v30 = vld [vmem:[%s12715_s19 + $0x20] sm:$0xff] }
 0x2af   : > { %3915 = vst.msk [vmem:[#allocation3 + $0x61] sm:$0xff] %vm3851_vm10, %v3906_v30 }
 0x2b1   : > { %10319 = vmatmul.mubr.msk.f32.gmra.mrb[4].mxu0 %vm781_vm1, %v13710_v51  ;;  %v3907_v51 = vld [vmem:[%s12715_s19 + $0x28] sm:$0xff] }
 0x2b2   : > { %10321 = vmatprep.mubr.msk.f32.mxu0 %vm781_vm1, %v13727_v14  ;;  %3916 = vst.msk [vmem:[#allocation3 + $0x69] sm:$0xff] %vm3851_vm10, %v3907_v51 }
 0x2b5   : > { %10322 = vmatmul.mubr.msk.f32.gmra.mrb[6].mxu0 %vm781_vm1, %v13737_v50 }
 0x2b6   : > { %10324 = vmatprep.mubr.msk.f32.mxu0 %vm781_vm1, %v13727_v14  ;;  %v14281_v14 = vld [vmem:[#allocation3 + $0x48] sm:$0xff]  ;;  %v14293_v46 = vld [vmem:[#allocation3 + $0x60] sm:$0xff] }
 0x2b7   : > { %10349 = vmatprep.mubr.msk.f32.mxu1 %vm3851_vm10, %v14281_v14 }
 0x2b9   : > { %10325 = vmatmul.mubr.msk.f32.gmra.mrb[8].mxu0 %vm781_vm1, %v13737_v50  ;;  %v3908_v50 = vld [vmem:[%s12715_s19 + $0x30] sm:$0xff]  ;;  %v14297_v24 = vld [vmem:[#allocation3 + $0x68] sm:$0xff] }
 0x2ba   : > { %10327 = vmatprep.mubr.msk.f32.mxu0 %vm781_vm1, %v13752_v47  ;;  %3917 = vst.msk [vmem:[#allocation3 + $0x79] sm:$0xff] %vm3851_vm10, %v3908_v50  ;;  %15651 = vst [vmem:[#allocation62_spill] sm:$0xff] %v14297_v24 }
 0x2bd   : > { %10328 = vmatmul.mubr.msk.f32.gmra.mrb[10].mxu0 %vm781_vm1, %v13756_v59 }
 0x2be   : > { %10330 = vmatprep.mubr.msk.f32.mxu0 %vm781_vm1, %v13752_v47  ;;  %v14286_v47 = vld [vmem:[#allocation3 + $0x50] sm:$0xff] }
 0x2bf   : > { %10350 = vmatmul.mubr.msk.f32.gmra.mrb[6].mxu1 %vm3851_vm10, %v14286_v47 }
 0x2c0   : > { %10352 = vmatprep.mubr.msk.f32.mxu1 %vm3851_vm10, %v14293_v46 }
 0x2c1   : > { %10331 = vmatmul.mubr.msk.f32.gmra.mrb[12].mxu0 %vm781_vm1, %v13756_v59  ;;  %v3909_v59 = vld [vmem:[%s12715_s19 + $0x38] sm:$0xff]  ;;  %v14301_v44 = vld [vmem:[#allocation3 + $0x78] sm:$0xff]  ;;  %s15666_s19 = sld [smem:[#allocation84_spill]] }
 0x2c2   : > { %10333 = vmatprep.mubr.msk.f32.mxu0 %vm781_vm1, %v15650_v39  ;;  %3918 = vst.msk [vmem:[#allocation3 + $0x81] sm:$0xff] %vm3851_vm10, %v3909_v59  ;;  %15652 = vst [vmem:[#allocation61_spill] sm:$0xff] %v14301_v44 }
 0x2c3   : > { %10353 = vmatmul.mubr.msk.f32.gmra.mrb[8].mxu1 %vm3851_vm10, %v14297_v24 }
 0x2c4   : > { %10355 = vmatprep.mubr.msk.f32.mxu1 %vm3851_vm10, %v14301_v44 }
 0x2c5   : > { %10334 = vmatmul.mubr.msk.f32.gmra.mrb[14].mxu0 %vm781_vm1, %v13945_v41 }
 0x2c9   : > { %v14305_v40 = vld [vmem:[#allocation3 + $0x80] sm:$0xff] }
 0x2ca   : > { %15653 = vst [vmem:[#allocation63_spill] sm:$0xff] %v14305_v40  ;;  %10356 = vmatmul.mubr.msk.f32.gmra.mrb[10].mxu1 %vm3851_vm10, %v14305_v40 }
 0x37c   : > { %v10314_v55 = vpop.f32.mrb[0].mxu0 }
 0x37d   : > { %v3815_v8 = vadd.f32 %v10314_v55, %v14318_v16  ;;  %v3712_v32 = vpop.f32.mrb[1].mxu0 }
 0x37e   : > { %v3814_v41 = vadd.f32 %v14318_v16, %v3712_v32 }
 0x37f   : > { %v3848_v31 = vmul.f32 %v3815_v8, %v15647_v22 }
 0x380   : > { %v3847_v15 = vmul.f32 %v3814_v41, %v15647_v22  ;;  %v10317_v57 = vpop.f32.mrb[2].mxu0  ;;  %v9223_v41 = vld [vmem:[%s15648_s7 + $0x20] sm:$0xff] }
 0x381   : > { %3853 = vst.msk [vmem:[#allocation4 + $0x9] sm:$0xff] %vm3851_vm10, %v3848_v31  ;;  %v3817_v38 = vadd.f32 %v10317_v57, %v14318_v16  ;;  %v3722_v56 = vpop.f32.mrb[3].mxu0  ;;  %v9224_v31 = vld [vmem:[%s15648_s7 + $0x28] sm:$0xff] }
 0x382   : > { %3852 = vst.msk [vmem:[#allocation4 + $0x1] sm:$0xff] %vm3851_vm10, %v3847_v15  ;;  %v3816_v35 = vadd.f32 %v14318_v16, %v3722_v56  ;;  %v10964_v57 = vpack.c.bf16 %v9224_v31, %v9223_v41 }
 0x383   : > { %v3850_v25 = vmul.f32 %v3817_v38, %v15647_v22 }
 0x384   : > { %v3849_v18 = vmul.f32 %v3816_v35, %v15647_v22  ;;  %v10320_v2 = vpop.f32.mrb[4].mxu0  ;;  %v3919_v35 = vld [vmem:[%s12729_s2] sm:$0xff]  ;;  %v9280_v22 = vld [vmem:[%s15648_s7 + $0x48] sm:$0xff] }
 0x385   : > { %3855 = vst.msk [vmem:[#allocation4 + $0x21] sm:$0xff] %vm3851_vm10, %v3850_v25  ;;  %v3819_v7 = vadd.f32 %v10320_v2, %v14318_v16  ;;  %v3732_v20 = vpop.f32.mrb[5].mxu0  ;;  %v3923_v25 = vmul.f32 %v3919_v35, %v15632_v5 }
 0x386   : > { %3854 = vst.msk [vmem:[#allocation4 + $0x19] sm:$0xff] %vm3851_vm10, %v3849_v18  ;;  %v3818_v63 = vadd.f32 %v14318_v16, %v3732_v20  ;;  %v3920_v18 = vld [vmem:[%s12729_s2 + $0x8] sm:$0xff] }
 0x387   : > { %3858 = vst.msk [vmem:[#allocation4 + $0x39] sm:$0xff] %vm3851_vm10, %v3819_v7  ;;  %v3924_v7 = vmul.f32 %v3920_v18, %v15632_v5  ;;  %3928 = vst.msk [vmem:[#allocation3 + $0x91] sm:$0xff] %vm3851_vm10, %v3923_v25  ;;  %v4670_v25 = vld [vmem:[#allocation3 + $0x2] sm:$0xff] }
 0x388   : > { %3857 = vst.msk [vmem:[#allocation4 + $0x31] sm:$0xff] %vm3851_vm10, %v3818_v63  ;;  %v10323_v42 = vpop.f32.mrb[6].mxu0  ;;  %v4283_v38 = vld [vmem:[#allocation4 + $0x9] sm:$0xff] }
 0x389   : > { %v3821_v53 = vadd.f32 %v10323_v42, %v14318_v16  ;;  %v3742_v13 = vpop.f32.mrb[7].mxu0  ;;  %v3932_v43 = vld [vmem:[#allocation4] sm:$0xff]  ;;  %v3933_v11 = vld [vmem:[#allocation4 + $0x8] sm:$0xff]  ;;  %3929 = vst.msk [vmem:[#allocation3 + $0x99] sm:$0xff] %vm3851_vm10, %v3924_v7  ;;  %v9265_v7 = vld [vmem:[%s15645_s9 + $0x30] sm:$0xff] }
 0x38a   : > { %v3820_v29 = vadd.f32 %v14318_v16, %v3742_v13  ;;  %10362 = vmatprep.mubr.msk.f32.mxu1 %vm3851_vm10, %v3932_v43  ;;  %v4282_v15 = vld [vmem:[#allocation4 + $0x1] sm:$0xff] }
 0x38b   : > { %3860 = vst.msk [vmem:[#allocation4 + $0x51] sm:$0xff] %vm3851_vm10, %v3821_v53  ;;  %10363 = vmatmul.mubr.msk.f32.vlgmr.msra.gmra.mrb[0].mxu1 %vm3851_vm10, %v3933_v11  ;;  %v4294_v43 = vld [vmem:[#allocation3 + $0x1] sm:$0xff] }
 0x38c   : > { %3859 = vst.msk [vmem:[#allocation4 + $0x49] sm:$0xff] %vm3851_vm10, %v3820_v29  ;;  %10959 = vmatpush3.bf16.msra.mxu1 %v10956_v1  ;;  %v10326_v61 = vpop.f32.mrb[8].mxu0  ;;  %v14427_v2 = vld [vmem:[#allocation4 + $0x21] sm:$0xff] }
 0x38d   : > { %v3823_v28 = vadd.f32 %v10326_v61, %v14318_v16  ;;  %v3752_v48 = vpop.f32.mrb[9].mxu0  ;;  %v14351_v12 = vld [vmem:[#allocation4 + $0x18] sm:$0xff]  ;;  %v14353_v49 = vld [vmem:[#allocation4 + $0x20] sm:$0xff]  ;;  %10961 = vmatprep.subr.bf16.mxu1 %v14343_v23  ;;  %v9238_v29 = vld [vmem:[%s15645_s9 + $0x28] sm:$0xff] }
 0x38e   : > { %v3822_v9 = vadd.f32 %v14318_v16, %v3752_v48  ;;  %10365 = vmatprep.mubr.msk.f32.mxu1 %vm3851_vm10, %v14351_v12  ;;  %v14419_v56 = vld [vmem:[#allocation4 + $0x19] sm:$0xff]  ;;  %v4295_v61 = vld [vmem:[#allocation3 + $0x9] sm:$0xff] }
 0x38f   : > { %3862 = vst.msk [vmem:[#allocation4 + $0x69] sm:$0xff] %vm3851_vm10, %v3823_v28  ;;  %10366 = vmatmul.mubr.msk.f32.gmra.mrb[2].mxu1 %vm3851_vm10, %v14353_v49  ;;  %v14362_v33 = vld [vmem:[#allocation4 + $0x30] sm:$0xff]  ;;  %v14369_v26 = vld [vmem:[#allocation4 + $0x38] sm:$0xff] }
 0x390   : > { %3861 = vst.msk [vmem:[#allocation4 + $0x61] sm:$0xff] %vm3851_vm10, %v3822_v9  ;;  %v10329_v3 = vpop.f32.mrb[10].mxu0  ;;  %10368 = vmatprep.mubr.msk.f32.mxu1 %vm3851_vm10, %v14362_v33  ;;  %v14432_v20 = vld [vmem:[#allocation4 + $0x31] sm:$0xff]  ;;  %v14438_v63 = vld [vmem:[#allocation4 + $0x39] sm:$0xff]  ;;  %v14478_v9 = vld [vmem:[#allocation3 + $0x21] sm:$0xff] }
 0x391   : > { %v3825_v52 = vadd.f32 %v10329_v3, %v14318_v16  ;;  %v3762_v0 = vpop.f32.mrb[11].mxu0  ;;  %v14473_v28 = vld [vmem:[#allocation3 + $0x19] sm:$0xff]  ;;  %v14480_v3 = vld [vmem:[#allocation3 + $0x31] sm:$0xff] }
 0x392   : > { %v3824_v21 = vadd.f32 %v14318_v16, %v3762_v0  ;;  %v14446_v34 = vld [vmem:[#allocation4 + $0x51] sm:$0xff]  ;;  %v14488_v0 = vld [vmem:[#allocation3 + $0x49] sm:$0xff]  ;;  %v14534_v41 = vld [vmem:[#allocation4 + $0x3a] sm:$0xff] }
 0x393   : > { %3864 = vst.msk [vmem:[#allocation4 + $0x81] sm:$0xff] %vm3851_vm10, %v3825_v52  ;;  %10369 = vmatmul.mubr.msk.f32.gmra.mrb[4].mxu1 %vm3851_vm10, %v14369_v26  ;;  %v14374_v58 = vld [vmem:[#allocation4 + $0x48] sm:$0xff]  ;;  %v14381_v37 = vld [vmem:[#allocation4 + $0x50] sm:$0xff]  ;;  %v14486_v52 = vld [vmem:[#allocation3 + $0x39] sm:$0xff] }
 0x394   : > { %3863 = vst.msk [vmem:[#allocation4 + $0x79] sm:$0xff] %vm3851_vm10, %v3824_v21  ;;  %v10332_v27 = vpop.f32.mrb[12].mxu0  ;;  %10371 = vmatprep.mubr.msk.f32.mxu1 %vm3851_vm10, %v14374_v58  ;;  %v14442_v4 = vld [vmem:[#allocation4 + $0x49] sm:$0xff]  ;;  %v14494_v21 = vld [vmem:[#allocation3 + $0x51] sm:$0xff] }
 0x395   : > { %v3827_v17 = vadd.f32 %v10332_v27, %v14318_v16  ;;  %v3772_v62 = vpop.f32.mrb[13].mxu0  ;;  %v14496_v27 = vld [vmem:[#allocation3 + $0x61] sm:$0xff]  ;;  %v14538_v31 = vld [vmem:[#allocation4 + $0x4a] sm:$0xff] }
 0x396   : > { %v3826_v39 = vadd.f32 %v14318_v16, %v3772_v62  ;;  %v14454_v53 = vld [vmem:[#allocation4 + $0x69] sm:$0xff]  ;;  %v14504_v62 = vld [vmem:[#allocation3 + $0x79] sm:$0xff] }
 0x397   : > { %v3866_v19 = vmul.f32 %v3827_v17, %v15632_v5  ;;  %10372 = vmatmul.mubr.msk.f32.gmra.mrb[6].mxu1 %vm3851_vm10, %v14381_v37  ;;  %v14386_v30 = vld [vmem:[#allocation4 + $0x60] sm:$0xff]  ;;  %v14395_v1 = vld [vmem:[#allocation4 + $0x68] sm:$0xff] }
 0x398   : > { %v3865_v51 = vmul.f32 %v3826_v39, %v15632_v5  ;;  %v10335_v50 = vpop.f32.mrb[14].mxu0  ;;  %10374 = vmatprep.mubr.msk.f32.mxu1 %vm3851_vm10, %v14386_v30  ;;  %v14450_v42 = vld [vmem:[#allocation4 + $0x61] sm:$0xff]  ;;  %v14502_v17 = vld [vmem:[#allocation3 + $0x69] sm:$0xff] }
 0x399   : > { %3871 = vst.msk [vmem:[#allocation4 + $0x99] sm:$0xff] %vm3851_vm10, %v3866_v19  ;;  %v3829_v59 = vadd.f32 %v10335_v50, %v14318_v16  ;;  %v3782_v54 = vpop.f32.mrb[15].mxu0  ;;  %v14510_v39 = vld [vmem:[#allocation3 + $0x81] sm:$0xff]  ;;  %v9251_v19 = vld [vmem:[%s15648_s7 + $0x30] sm:$0xff] }
 0x39a   : > { %3870 = vst.msk [vmem:[#allocation4 + $0x91] sm:$0xff] %vm3851_vm10, %v3865_v51  ;;  %v3828_v10 = vadd.f32 %v14318_v16, %v3782_v54  ;;  %v14462_v11 = vld [vmem:[#allocation4 + $0x81] sm:$0xff]  ;;  %v9252_v51 = vld [vmem:[%s15648_s7 + $0x38] sm:$0xff]  ;;  %v4659_v54 = vld [vmem:[#allocation4 + $0xa] sm:$0xff] }
 0x39b   : > { %v3868_v55 = vmul.f32 %v3829_v59, %v15632_v5  ;;  %10375 = vmatmul.mubr.msk.f32.gmra.mrb[8].mxu1 %vm3851_vm10, %v14395_v1  ;;  %v14400_v8 = vld [vmem:[#allocation4 + $0x78] sm:$0xff]  ;;  %v14407_v16 = vld [vmem:[#allocation4 + $0x80] sm:$0xff]  ;;  %v10972_v59 = vpack.c.bf16 %v9252_v51, %v9251_v19 }
 0x39c   : > { %v3867_v32 = vmul.f32 %v3828_v10, %v15632_v5  ;;  %10377 = vmatprep.mubr.msk.f32.mxu1 %vm3851_vm10, %v14400_v8  ;;  %v14458_v13 = vld [vmem:[#allocation4 + $0x79] sm:$0xff]  ;;  %v4658_v50 = vld [vmem:[#allocation4 + $0x2] sm:$0xff] }
 0x39d   : > { %3873 = vst.msk [vmem:[#allocation4 + $0xb1] sm:$0xff] %vm3851_vm10, %v3868_v55  ;;  %v14522_v10 = vld [vmem:[#allocation4 + $0x1a] sm:$0xff]  ;;  %v14526_v55 = vld [vmem:[#allocation4 + $0x22] sm:$0xff]  ;;  %v14576_v19 = vld [vmem:[#allocation3 + $0x32] sm:$0xff] }
 0x39e   : > { %3872 = vst.msk [vmem:[#allocation4 + $0xa9] sm:$0xff] %vm3851_vm10, %v3867_v32  ;;  %v14530_v32 = vld [vmem:[#allocation4 + $0x32] sm:$0xff]  ;;  %v14554_v35 = vld [vmem:[#allocation4 + $0x7a] sm:$0xff]  ;;  %v14558_v18 = vld [vmem:[#allocation4 + $0x82] sm:$0xff] }
 0x39f   : > { %10378 = vmatmul.mubr.msk.f32.gmra.mrb[10].mxu1 %vm3851_vm10, %v14407_v16  ;;  %v14582_v51 = vld [vmem:[#allocation3 + $0x3a] sm:$0xff] }
 0x3a0   : > { %10384 = vmatprep.mubr.msk.f32.mxu1 %vm3851_vm10, %v4282_v15  ;;  %v14542_v15 = vld [vmem:[#allocation4 + $0x52] sm:$0xff] }
 0x3a3   : > { %10385 = vmatmul.mubr.msk.f32.vlgmr.msra.gmra.mrb[0].mxu1 %vm3851_vm10, %v4283_v38  ;;  %v14550_v38 = vld [vmem:[#allocation4 + $0x6a] sm:$0xff] }
 0x3a4   : > { %10963 = vmatpush3.bf16.msra.mxu1 %v14343_v23  ;;  %10387 = vmatprep.mubr.msk.f32.mxu1 %vm3851_vm10, %v14419_v56  ;;  %v9237_v23 = vld [vmem:[%s15645_s9 + $0x20] sm:$0xff] }
 0x3a5   : > { %10965 = vmatprep.subr.bf16.mxu1 %v10964_v57  ;;  %v10968_v48 = vpack.c.bf16 %v9238_v29, %v9237_v23  ;;  %v4671_v23 = vld [vmem:[#allocation3 + $0xa] sm:$0xff]  ;;  %v14569_v29 = vld [vmem:[#allocation3 + $0x1a] sm:$0xff] }
 0x3a7   : > { %10388 = vmatmul.mubr.msk.f32.gmra.mrb[2].mxu1 %vm3851_vm10, %v14427_v2 }
 0x3a8   : > { %10390 = vmatprep.mubr.msk.f32.mxu1 %vm3851_vm10, %v14432_v20 }
 0x3ab   : > { %10391 = vmatmul.mubr.msk.f32.gmra.mrb[4].mxu1 %vm3851_vm10, %v14438_v63 }
 0x3ac   : > { %10393 = vmatprep.mubr.msk.f32.mxu1 %vm3851_vm10, %v14442_v4 }
 0x3af   : > { %10394 = vmatmul.mubr.msk.f32.gmra.mrb[6].mxu1 %vm3851_vm10, %v14446_v34 }
 0x3b0   : > { %10396 = vmatprep.mubr.msk.f32.mxu1 %vm3851_vm10, %v14450_v42 }
 0x3b3   : > { %10397 = vmatmul.mubr.msk.f32.gmra.mrb[8].mxu1 %vm3851_vm10, %v14454_v53 }
 0x3b4   : > { %10399 = vmatprep.mubr.msk.f32.mxu1 %vm3851_vm10, %v14458_v13 }
 0x3b7   : > { %10400 = vmatmul.mubr.msk.f32.gmra.mrb[10].mxu1 %vm3851_vm10, %v14462_v11 }
 0x3b8   : > { %10406 = vmatprep.mubr.msk.f32.mxu1 %vm3851_vm10, %v4294_v43  ;;  %v9266_v43 = vld [vmem:[%s15645_s9 + $0x38] sm:$0xff] }
 0x3bb   : > { %10407 = vmatmul.mubr.msk.f32.vlgmr.msra.gmra.mrb[0].mxu1 %vm3851_vm10, %v4295_v61  ;;  %v10976_v61 = vpack.c.bf16 %v9266_v43, %v9265_v7  ;;  %v14600_v7 = vld [vmem:[#allocation3 + $0x7a] sm:$0xff]  ;;  %v14606_v43 = vld [vmem:[#allocation3 + $0x82] sm:$0xff] }
 0x3bc   : > { %10967 = vmatpush3.bf16.msra.mxu1 %v10964_v57  ;;  %10409 = vmatprep.mubr.msk.f32.mxu1 %vm3851_vm10, %v14473_v28  ;;  %v14546_v57 = vld [vmem:[#allocation4 + $0x62] sm:$0xff] }
 0x3bd   : > { %10969 = vmatprep.subr.bf16.mxu1 %v10968_v48 }
 0x3bf   : > { %10410 = vmatmul.mubr.msk.f32.gmra.mrb[2].mxu1 %vm3851_vm10, %v14478_v9 }
 0x3c0   : > { %10412 = vmatprep.mubr.msk.f32.mxu1 %vm3851_vm10, %v14480_v3 }
 0x3c3   : > { %10413 = vmatmul.mubr.msk.f32.gmra.mrb[4].mxu1 %vm3851_vm10, %v14486_v52 }
 0x3c4   : > { %10415 = vmatprep.mubr.msk.f32.mxu1 %vm3851_vm10, %v14488_v0 }
 0x3c7   : > { %10416 = vmatmul.mubr.msk.f32.gmra.mrb[6].mxu1 %vm3851_vm10, %v14494_v21 }
 0x3c8   : > { %10418 = vmatprep.mubr.msk.f32.mxu1 %vm3851_vm10, %v14496_v27 }
 0x3cb   : > { %10419 = vmatmul.mubr.msk.f32.gmra.mrb[8].mxu1 %vm3851_vm10, %v14502_v17 }
 0x3cc   : > { %10421 = vmatprep.mubr.msk.f32.mxu1 %vm3851_vm10, %v14504_v62 }
 0x3cf   : > { %10422 = vmatmul.mubr.msk.f32.gmra.mrb[10].mxu1 %vm3851_vm10, %v14510_v39 }
 0x3d0   : > { %10428 = vmatprep.mubr.msk.f32.mxu1 %vm3851_vm10, %v4658_v50  ;;  %v14584_v50 = vld [vmem:[#allocation3 + $0x4a] sm:$0xff] }
 0x3d3   : > { %10429 = vmatmul.mubr.msk.f32.vlgmr.msra.gmra.mrb[0].mxu1 %vm3851_vm10, %v4659_v54  ;;  %v14592_v54 = vld [vmem:[#allocation3 + $0x62] sm:$0xff] }
 0x3d4   : > { %10971 = vmatpush3.bf16.msra.mxu1 %v10968_v48  ;;  %10431 = vmatprep.mubr.msk.f32.mxu1 %vm3851_vm10, %v14522_v10  ;;  %v14574_v48 = vld [vmem:[#allocation3 + $0x22] sm:$0xff] }
 0x3d5   : > { %10973 = vmatprep.subr.bf16.mxu1 %v10972_v59 }
 0x3d7   : > { %10432 = vmatmul.mubr.msk.f32.gmra.mrb[2].mxu1 %vm3851_vm10, %v14526_v55 }
 0x3d8   : > { %10434 = vmatprep.mubr.msk.f32.mxu1 %vm3851_vm10, %v14530_v32 }
 0x3db   : > { %10435 = vmatmul.mubr.msk.f32.gmra.mrb[4].mxu1 %vm3851_vm10, %v14534_v41 }
 0x3dc   : > { %10437 = vmatprep.mubr.msk.f32.mxu1 %vm3851_vm10, %v14538_v31 }
 0x3df   : > { %10438 = vmatmul.mubr.msk.f32.gmra.mrb[6].mxu1 %vm3851_vm10, %v14542_v15 }
 0x3e0   : > { %10440 = vmatprep.mubr.msk.f32.mxu1 %vm3851_vm10, %v14546_v57 }
 0x3e3   : > { %10441 = vmatmul.mubr.msk.f32.gmra.mrb[8].mxu1 %vm3851_vm10, %v14550_v38 }
 0x3e4   : > { %10443 = vmatprep.mubr.msk.f32.mxu1 %vm3851_vm10, %v14554_v35 }
 0x3e7   : > { %10444 = vmatmul.mubr.msk.f32.gmra.mrb[10].mxu1 %vm3851_vm10, %v14558_v18 }
 0x3e8   : > { %10450 = vmatprep.mubr.msk.f32.mxu1 %vm3851_vm10, %v4670_v25  ;;  %v14598_v25 = vld [vmem:[#allocation3 + $0x6a] sm:$0xff] }
 0x3e9   : > { %15655 = vst [vmem:[#allocation64_spill] sm:$0xff] %v14598_v25 }
 0x3eb   : > { %10451 = vmatmul.mubr.msk.f32.vlgmr.msra.gmra.mrb[0].mxu1 %vm3851_vm10, %v4671_v23  ;;  %v9279_v23 = vld [vmem:[%s15648_s7 + $0x40] sm:$0xff] }
 0x3ec   : > { %10975 = vmatpush3.bf16.msra.mxu1 %v10972_v59  ;;  %10453 = vmatprep.mubr.msk.f32.mxu1 %vm3851_vm10, %v14569_v29  ;;  %v14590_v59 = vld [vmem:[#allocation3 + $0x52] sm:$0xff] }
 0x3ed   : > { %10977 = vmatprep.subr.bf16.mxu1 %v10976_v61 }
 0x3ef   : > { %10454 = vmatmul.mubr.msk.f32.gmra.mrb[2].mxu1 %vm3851_vm10, %v14574_v48 }
 0x3f0   : > { %10456 = vmatprep.mubr.msk.f32.mxu1 %vm3851_vm10, %v14576_v19 }
 0x3f3   : > { %10457 = vmatmul.mubr.msk.f32.gmra.mrb[4].mxu1 %vm3851_vm10, %v14582_v51 }
 0x3f4   : > { %10459 = vmatprep.mubr.msk.f32.mxu1 %vm3851_vm10, %v14584_v50 }
 0x3f7   : > { %10460 = vmatmul.mubr.msk.f32.gmra.mrb[6].mxu1 %vm3851_vm10, %v14590_v59 }
 0x3f8   : > { %10462 = vmatprep.mubr.msk.f32.mxu1 %vm3851_vm10, %v14592_v54 }
 0x3fb   : > { %10463 = vmatmul.mubr.msk.f32.gmra.mrb[8].mxu1 %vm3851_vm10, %v14598_v25  ;;  %v10980_v25 = vpack.c.bf16 %v9280_v22, %v9279_v23  ;;  %v14636_v22 = vld [vmem:[#allocation4 + $0x90] sm:$0xff] }
 0x3fc   : > { %10465 = vmatprep.mubr.msk.f32.mxu1 %vm3851_vm10, %v14600_v7 }
 0x3ff   : > { %10466 = vmatmul.mubr.msk.f32.gmra.mrb[10].mxu1 %vm3851_vm10, %v14606_v43 }
 0x400   : > { %10472 = vmatprep.mubr.msk.f32.mxu1 %vm3851_vm10, %v14351_v12  ;;  %v14640_v12 = vld [vmem:[#allocation4 + $0x98] sm:$0xff] }
 0x403   : > { %10473 = vmatmul.mubr.msk.f32.vlgmr.msra.gmra.mrb[0].mxu1 %vm3851_vm10, %v14353_v49  ;;  %v9293_v49 = vld [vmem:[%s15645_s9 + $0x40] sm:$0xff] }
 0x404   : > { %10979 = vmatpush3.bf16.msra.mxu1 %v10976_v61  ;;  %10475 = vmatprep.mubr.msk.f32.mxu1 %vm3851_vm10, %v14362_v33  ;;  %v9294_v61 = vld [vmem:[%s15645_s9 + $0x48] sm:$0xff] }
 0x405   : > { %10981 = vmatprep.subr.bf16.mxu1 %v10980_v25  ;;  %v10984_v23 = vpack.c.bf16 %v9294_v61, %v9293_v49  ;;  %v9308_v49 = vld [vmem:[%s15648_s7 + $0x58] sm:$0xff] }
 0x407   : > { %10476 = vmatmul.mubr.msk.f32.gmra.mrb[2].mxu1 %vm3851_vm10, %v14369_v26 }
 0x408   : > { %10478 = vmatprep.mubr.msk.f32.mxu1 %vm3851_vm10, %v14374_v58 }
 0x40b   : > { %10479 = vmatmul.mubr.msk.f32.gmra.mrb[4].mxu1 %vm3851_vm10, %v14381_v37 }
 0x40c   : > { %10481 = vmatprep.mubr.msk.f32.mxu1 %vm3851_vm10, %v14386_v30 }
 0x40f   : > { %10482 = vmatmul.mubr.msk.f32.gmra.mrb[6].mxu1 %vm3851_vm10, %v14395_v1 }
 0x410   : > { %10484 = vmatprep.mubr.msk.f32.mxu1 %vm3851_vm10, %v14400_v8 }
 0x413   : > { %10485 = vmatmul.mubr.msk.f32.gmra.mrb[8].mxu1 %vm3851_vm10, %v14407_v16 }
 0x414   : > { %10487 = vmatprep.mubr.msk.f32.mxu1 %vm3851_vm10, %v14636_v22 }
 0x417   : > { %10488 = vmatmul.mubr.msk.f32.gmra.mrb[10].mxu1 %vm3851_vm10, %v14640_v12 }
 0x418   : > { %10494 = vmatprep.mubr.msk.f32.mxu1 %vm3851_vm10, %v14096_v36  ;;  %v14668_v36 = vld [vmem:[#allocation3 + $0x90] sm:$0xff] }
 0x419   : > { %15656 = vst [vmem:[#allocation65_spill] sm:$0xff] %v14668_v36 }
 0x41b   : > { %10495 = vmatmul.mubr.msk.f32.vlgmr.msra.gmra.mrb[0].mxu1 %vm3851_vm10, %v14100_v60  ;;  %v14674_v60 = vld [vmem:[#allocation3 + $0x98] sm:$0xff] }
 0x41c   : > { %10983 = vmatpush3.bf16.msra.mxu1 %v10980_v25  ;;  %10497 = vmatprep.mubr.msk.f32.mxu1 %vm3851_vm10, %v14104_v45  ;;  %v9307_v25 = vld [vmem:[%s15648_s7 + $0x50] sm:$0xff] }
 0x41d   : > { %10985 = vmatprep.subr.bf16.mxu1 %v10984_v23  ;;  %v10988_v61 = vpack.c.bf16 %v9308_v49, %v9307_v25  ;;  %v9349_v49 = vld [vmem:[%s15645_s9 + $0x60] sm:$0xff] }
 0x41f   : > { %10498 = vmatmul.mubr.msk.f32.gmra.mrb[2].mxu1 %vm3851_vm10, %v14114_v6 }
 0x420   : > { %10500 = vmatprep.mubr.msk.f32.mxu1 %vm3851_vm10, %v14281_v14 }
 0x423   : > { %10501 = vmatmul.mubr.msk.f32.gmra.mrb[4].mxu1 %vm3851_vm10, %v14286_v47 }
 0x424   : > { %10503 = vmatprep.mubr.msk.f32.mxu1 %vm3851_vm10, %v14293_v46 }
 0x427   : > { %10504 = vmatmul.mubr.msk.f32.gmra.mrb[6].mxu1 %vm3851_vm10, %v14297_v24 }
 0x428   : > { %10506 = vmatprep.mubr.msk.f32.mxu1 %vm3851_vm10, %v14301_v44  ;;  %v3922_v44 = vld [vmem:[%s12729_s2 + $0x18] sm:$0xff] }
 0x429   : > { %v3926_v24 = vmul.f32 %v3922_v44, %v15632_v5  ;;  %v14710_v44 = vld [vmem:[#allocation4 + $0x91] sm:$0xff] }
 0x42b   : > { %10507 = vmatmul.mubr.msk.f32.gmra.mrb[8].mxu1 %vm3851_vm10, %v14305_v40  ;;  %3931 = vst.msk [vmem:[#allocation3 + $0xb1] sm:$0xff] %vm3851_vm10, %v3926_v24  ;;  %v14714_v24 = vld [vmem:[#allocation4 + $0x99] sm:$0xff] }
 0x42c   : > { %10509 = vmatprep.mubr.msk.f32.mxu1 %vm3851_vm10, %v14668_v36  ;;  %v3921_v36 = vld [vmem:[%s12729_s2 + $0x10] sm:$0xff]  ;;  %s15659_s2 = smov %s15658_s21 }
 0x42d   : > { %v3925_v40 = vmul.f32 %v3921_v36, %v15632_v5  ;;  %v9336_v36 = vld [vmem:[%s15648_s7 + $0x68] sm:$0xff] }
 0x42f   : > { %10510 = vmatmul.mubr.msk.f32.gmra.mrb[10].mxu1 %vm3851_vm10, %v14674_v60  ;;  %3930 = vst.msk [vmem:[#allocation3 + $0xa9] sm:$0xff] %vm3851_vm10, %v3925_v40  ;;  %v9321_v40 = vld [vmem:[%s15645_s9 + $0x50] sm:$0xff] }
 0x430   : > { %10516 = vmatprep.mubr.msk.f32.mxu1 %vm3851_vm10, %v14419_v56  ;;  %v9322_v56 = vld [vmem:[%s15645_s9 + $0x58] sm:$0xff] }
 0x433   : > { %10517 = vmatmul.mubr.msk.f32.vlgmr.msra.gmra.mrb[0].mxu1 %vm3851_vm10, %v14427_v2  ;;  %v10992_v2 = vpack.c.bf16 %v9322_v56, %v9321_v40  ;;  %v14816_v56 = vld [vmem:[#allocation3 + $0x9a] sm:$0xff] }
 0x434   : > { %10987 = vmatpush3.bf16.msra.mxu1 %v10984_v23  ;;  %10519 = vmatprep.mubr.msk.f32.mxu1 %vm3851_vm10, %v14432_v20  ;;  %v9335_v23 = vld [vmem:[%s15648_s7 + $0x60] sm:$0xff] }
 0x435   : > { %10989 = vmatprep.subr.bf16.mxu1 %v10988_v61  ;;  %v10996_v25 = vpack.c.bf16 %v9336_v36, %v9335_v23  ;;  %v9364_v23 = vld [vmem:[%s15648_s7 + $0x78] sm:$0xff] }
 0x437   : > { %10520 = vmatmul.mubr.msk.f32.gmra.mrb[2].mxu1 %vm3851_vm10, %v14438_v63 }
 0x438   : > { %10522 = vmatprep.mubr.msk.f32.mxu1 %vm3851_vm10, %v14442_v4 }
 0x43b   : > { %10523 = vmatmul.mubr.msk.f32.gmra.mrb[4].mxu1 %vm3851_vm10, %v14446_v34 }
 0x43c   : > { %10525 = vmatprep.mubr.msk.f32.mxu1 %vm3851_vm10, %v14450_v42 }
 0x43f   : > { %10526 = vmatmul.mubr.msk.f32.gmra.mrb[6].mxu1 %vm3851_vm10, %v14454_v53 }
 0x440   : > { %10528 = vmatprep.mubr.msk.f32.mxu1 %vm3851_vm10, %v14458_v13 }
 0x443   : > { %10529 = vmatmul.mubr.msk.f32.gmra.mrb[8].mxu1 %vm3851_vm10, %v14462_v11 }
 0x444   : > { %10531 = vmatprep.mubr.msk.f32.mxu1 %vm3851_vm10, %v14710_v44 }
 0x447   : > { %10532 = vmatmul.mubr.msk.f32.gmra.mrb[10].mxu1 %vm3851_vm10, %v14714_v24 }
 0x448   : > { %10538 = vmatprep.mubr.msk.f32.mxu1 %vm3851_vm10, %v14473_v28  ;;  %v14742_v28 = vld [vmem:[#allocation3 + $0x91] sm:$0xff] }
 0x44b   : > { %10539 = vmatmul.mubr.msk.f32.vlgmr.msra.gmra.mrb[0].mxu1 %vm3851_vm10, %v14478_v9  ;;  %v14748_v9 = vld [vmem:[#allocation3 + $0x99] sm:$0xff] }
 0x44c   : > { %10991 = vmatpush3.bf16.msra.mxu1 %v10988_v61  ;;  %10541 = vmatprep.mubr.msk.f32.mxu1 %vm3851_vm10, %v14480_v3  ;;  %v9350_v61 = vld [vmem:[%s15645_s9 + $0x68] sm:$0xff] }
 0x44d   : > { %10993 = vmatprep.subr.bf16.mxu1 %v10992_v2  ;;  %v11000_v40 = vpack.c.bf16 %v9350_v61, %v9349_v49  ;;  %v9439_v61 = vld [vmem:[%s15659_s2 + $0x28] sm:$0xff] }
 0x44f   : > { %10542 = vmatmul.mubr.msk.f32.gmra.mrb[2].mxu1 %vm3851_vm10, %v14486_v52 }
 0x450   : > { %10544 = vmatprep.mubr.msk.f32.mxu1 %vm3851_vm10, %v14488_v0 }
 0x453   : > { %10545 = vmatmul.mubr.msk.f32.gmra.mrb[4].mxu1 %vm3851_vm10, %v14494_v21 }
 0x454   : > { %10547 = vmatprep.mubr.msk.f32.mxu1 %vm3851_vm10, %v14496_v27 }
 0x457   : > { %10548 = vmatmul.mubr.msk.f32.gmra.mrb[6].mxu1 %vm3851_vm10, %v14502_v17 }
 0x458   : > { %10550 = vmatprep.mubr.msk.f32.mxu1 %vm3851_vm10, %v14504_v62 }
 0x45b   : > { %10551 = vmatmul.mubr.msk.f32.gmra.mrb[8].mxu1 %vm3851_vm10, %v14510_v39 }
 0x45c   : > { %10553 = vmatprep.mubr.msk.f32.mxu1 %vm3851_vm10, %v14742_v28 }
 0x45f   : > { %10554 = vmatmul.mubr.msk.f32.gmra.mrb[10].mxu1 %vm3851_vm10, %v14748_v9 }
 0x460   : > { %10560 = vmatprep.mubr.msk.f32.mxu1 %vm3851_vm10, %v14522_v10  ;;  %v14778_v10 = vld [vmem:[#allocation4 + $0x92] sm:$0xff] }
 0x463   : > { %10561 = vmatmul.mubr.msk.f32.vlgmr.msra.gmra.mrb[0].mxu1 %vm3851_vm10, %v14526_v55  ;;  %v14782_v55 = vld [vmem:[#allocation4 + $0x9a] sm:$0xff] }
 0x464   : > { %10995 = vmatpush3.bf16.msra.mxu1 %v10992_v2  ;;  %10563 = vmatprep.mubr.msk.f32.mxu1 %vm3851_vm10, %v14530_v32  ;;  %v9363_v2 = vld [vmem:[%s15648_s7 + $0x70] sm:$0xff] }
 0x465   : > { %10997 = vmatprep.subr.bf16.mxu1 %v10996_v25  ;;  %v11004_v36 = vpack.c.bf16 %v9364_v23, %v9363_v2 }
 0x467   : > { %10564 = vmatmul.mubr.msk.f32.gmra.mrb[2].mxu1 %vm3851_vm10, %v14534_v41 }
 0x468   : > { %10566 = vmatprep.mubr.msk.f32.mxu1 %vm3851_vm10, %v14538_v31 }
 0x46b   : > { %10567 = vmatmul.mubr.msk.f32.gmra.mrb[4].mxu1 %vm3851_vm10, %v14542_v15 }
 0x46c   : > { %10569 = vmatprep.mubr.msk.f32.mxu1 %vm3851_vm10, %v14546_v57 }
 0x46f   : > { %10570 = vmatmul.mubr.msk.f32.gmra.mrb[6].mxu1 %vm3851_vm10, %v14550_v38 }
 0x470   : > { %10572 = vmatprep.mubr.msk.f32.mxu1 %vm3851_vm10, %v14554_v35 }
 0x473   : > { %10573 = vmatmul.mubr.msk.f32.gmra.mrb[8].mxu1 %vm3851_vm10, %v14558_v18 }
 0x474   : > { %10575 = vmatprep.mubr.msk.f32.mxu1 %vm3851_vm10, %v14778_v10 }
 0x477   : > { %10576 = vmatmul.mubr.msk.f32.gmra.mrb[10].mxu1 %vm3851_vm10, %v14782_v55 }
 0x478   : > { %10582 = vmatprep.mubr.msk.f32.mxu1 %vm3851_vm10, %v14569_v29  ;;  %v15657_v29 = vld [vmem:[#allocation64_spill] sm:$0xff] }
 0x47b   : > { %10583 = vmatmul.mubr.msk.f32.vlgmr.msra.gmra.mrb[0].mxu1 %vm3851_vm10, %v14574_v48  ;;  %v14810_v48 = vld [vmem:[#allocation3 + $0x92] sm:$0xff] }
 0x47c   : > { %10999 = vmatpush3.bf16.msra.mxu1 %v10996_v25  ;;  %10585 = vmatprep.mubr.msk.f32.mxu1 %vm3851_vm10, %v14576_v19  ;;  %v9392_v25 = vld [vmem:[%s15648_s7 + $0x88] sm:$0xff] }
 0x47d   : > { %11001 = vmatprep.subr.bf16.mxu1 %v11000_v40 }
 0x47f   : > { %10586 = vmatmul.mubr.msk.f32.gmra.mrb[2].mxu1 %vm3851_vm10, %v14582_v51 }
 0x480   : > { %10588 = vmatprep.mubr.msk.f32.mxu1 %vm3851_vm10, %v14584_v50 }
 0x483   : > { %10589 = vmatmul.mubr.msk.f32.gmra.mrb[4].mxu1 %vm3851_vm10, %v14590_v59 }
 0x484   : > { %10591 = vmatprep.mubr.msk.f32.mxu1 %vm3851_vm10, %v14592_v54 }
 0x487   : > { %10592 = vmatmul.mubr.msk.f32.gmra.mrb[6].mxu1 %vm3851_vm10, %v15657_v29 }
 0x488   : > { %10594 = vmatprep.mubr.msk.f32.mxu1 %vm3851_vm10, %v14600_v7 }
 0x48b   : > { %10595 = vmatmul.mubr.msk.f32.gmra.mrb[8].mxu1 %vm3851_vm10, %v14606_v43 }
 0x48c   : > { %10597 = vmatprep.mubr.msk.f32.mxu1 %vm3851_vm10, %v14810_v48 }
 0x48f   : > { %10598 = vmatmul.mubr.msk.f32.gmra.mrb[10].mxu1 %vm3851_vm10, %v14816_v56 }
 0x490   : > { %10604 = vmatprep.mubr.msk.f32.mxu1 %vm3851_vm10, %v14362_v33  ;;  %v9420_v33 = vld [vmem:[%s15658_s21 + $0x10] sm:$0xff]  ;;  %s15668_s21 = sshll.u32 %s12685_s30, 6 }
 0x491   : > { %s15194_s1 = scalar_lea.vmem [#allocation17], %s15668_s21 }
 0x492   : > { %s8717_s15 = sshll.u32 %s15194_s1, 4  ;;  %s15216_s15 = int_to_ptr.vmem [resolvable:$true] %s8717_s15 }
 0x493   : > { %10605 = vmatmul.mubr.msk.f32.vlgmr.msra.gmra.mrb[0].mxu1 %vm3851_vm10, %v14369_v26  ;;  %v9421_v26 = vld [vmem:[%s15659_s2 + $0x18] sm:$0xff]  ;;  %s11844_s17 = scalar_lea.vmem %s15216_s15, 1024  ;;  %p11851_p11 = scmp.lt.s32.totalorder %s15216_s15, %s11849_s14 }
 0x494   : > { %11003 = vmatpush3.bf16.msra.mxu1 %v11000_v40  ;;  %10607 = vmatprep.mubr.msk.f32.mxu1 %vm3851_vm10, %v14374_v58  ;;  %v11020_v58 = vpack.c.bf16 %v9421_v26, %v9420_v33  ;;  %p11845_p6 = scmp.ne.s32.totalorder %s15216_s15, %s11844_s17 }
 0x495   : > { %11005 = vmatprep.subr.bf16.mxu1 %v11004_v36 }
 0x496   : > { %11021 = vmatprep.subr.bf16.mxu0 %v11020_v58  ;;  %p11846_p5 = pnand %p11845_p6, %p15672_p12 }
 0x497   : > { %10608 = vmatmul.mubr.msk.f32.gmra.mrb[2].mxu1 %vm3851_vm10, %v14381_v37  ;;  %v6174_v37 = vld [vmem:[#allocation4 + $0xa8] sm:$0xff]  ;;  %11023 = vmatpush3.bf16.msra.mxu0 %v11020_v58 }
 0x498   : > { %10610 = vmatprep.mubr.msk.f32.mxu1 %vm3851_vm10, %v14386_v30  ;;  %v6175_v30 = vld [vmem:[#allocation4 + $0xb0] sm:$0xff]  ;;  %p11847_p2 = pneg %p11846_p5 }
 0x49b   : > { %10611 = vmatmul.mubr.msk.f32.gmra.mrb[4].mxu1 %vm3851_vm10, %v14395_v1  ;;  %v9377_v1 = vld [vmem:[%s15645_s9 + $0x70] sm:$0xff] }
 0x49c   : > { %10613 = vmatprep.mubr.msk.f32.mxu1 %vm3851_vm10, %v14400_v8  ;;  %v9378_v8 = vld [vmem:[%s15645_s9 + $0x78] sm:$0xff] }
 0x49f   : > { %10614 = vmatmul.mubr.msk.f32.gmra.mrb[6].mxu1 %vm3851_vm10, %v14407_v16  ;;  %v11008_v16 = vpack.c.bf16 %v9378_v8, %v9377_v1 }
 0x4a0   : > { %10616 = vmatprep.mubr.msk.f32.mxu1 %vm3851_vm10, %v14636_v22  ;;  %v15660_v22 = vld [vmem:[#allocation62_spill] sm:$0xff] }
 0x4a3   : > { %10617 = vmatmul.mubr.msk.f32.gmra.mrb[8].mxu1 %vm3851_vm10, %v14640_v12  ;;  %v15661_v12 = vld [vmem:[#allocation61_spill] sm:$0xff] }
 0x4a4   : > { %10619 = vmatprep.mubr.msk.f32.mxu1 %vm3851_vm10, %v6174_v37 }
 0x4a7   : > { %10620 = vmatmul.mubr.msk.f32.gmra.mrb[10].mxu1 %vm3851_vm10, %v6175_v30 }
 0x4a8   : > { %10626 = vmatprep.mubr.msk.f32.mxu1 %vm3851_vm10, %v14104_v45  ;;  %v15662_v45 = vld [vmem:[#allocation63_spill] sm:$0xff] }
 0x4ab   : > { %10627 = vmatmul.mubr.msk.f32.vlgmr.msra.gmra.mrb[0].mxu1 %vm3851_vm10, %v14114_v6  ;;  %v15663_v6 = vld [vmem:[#allocation65_spill] sm:$0xff] }
 0x4ac   : > { %11007 = vmatpush3.bf16.msra.mxu1 %v11004_v36  ;;  %10629 = vmatprep.mubr.msk.f32.mxu1 %vm3851_vm10, %v14281_v14  ;;  %v6186_v14 = vld [vmem:[#allocation3 + $0xa8] sm:$0xff] }
 0x4ad   : > { %11009 = vmatprep.subr.bf16.mxu1 %v11008_v16 }
 0x4af   : > { %10630 = vmatmul.mubr.msk.f32.gmra.mrb[2].mxu1 %vm3851_vm10, %v14286_v47  ;;  %v6187_v47 = vld [vmem:[#allocation3 + $0xb0] sm:$0xff] }
 0x4b0   : > { %10632 = vmatprep.mubr.msk.f32.mxu1 %vm3851_vm10, %v14293_v46  ;;  %v9391_v46 = vld [vmem:[%s15648_s7 + $0x80] sm:$0xff] }
 0x4b1   : > { %v11012_v49 = vpack.c.bf16 %v9392_v25, %v9391_v46 }
 0x4b3   : > { %10633 = vmatmul.mubr.msk.f32.gmra.mrb[4].mxu1 %vm3851_vm10, %v15660_v22 }
 0x4b4   : > { %10635 = vmatprep.mubr.msk.f32.mxu1 %vm3851_vm10, %v15661_v12 }
 0x4b7   : > { %10636 = vmatmul.mubr.msk.f32.gmra.mrb[6].mxu1 %vm3851_vm10, %v15662_v45 }
 0x4b8   : > { %10638 = vmatprep.mubr.msk.f32.mxu1 %vm3851_vm10, %v15663_v6 }
 0x4bb   : > { %10639 = vmatmul.mubr.msk.f32.gmra.mrb[8].mxu1 %vm3851_vm10, %v14674_v60 }
 0x4bc   : > { %10641 = vmatprep.mubr.msk.f32.mxu1 %vm3851_vm10, %v6186_v14 }
 0x4bf   : > { %10642 = vmatmul.mubr.msk.f32.gmra.mrb[10].mxu1 %vm3851_vm10, %v6187_v47 }
 0x4c0   : > { %10648 = vmatprep.mubr.msk.f32.mxu1 %vm3851_vm10, %v14432_v20  ;;  %v6550_v20 = vld [vmem:[#allocation4 + $0xa9] sm:$0xff] }
 0x4c3   : > { %10649 = vmatmul.mubr.msk.f32.vlgmr.msra.gmra.mrb[0].mxu1 %vm3851_vm10, %v14438_v63  ;;  %v6551_v63 = vld [vmem:[#allocation4 + $0xb1] sm:$0xff] }
 0x4c4   : > { %11011 = vmatpush3.bf16.msra.mxu1 %v11008_v16  ;;  %10651 = vmatprep.mubr.msk.f32.mxu1 %vm3851_vm10, %v14442_v4  ;;  %v9405_v4 = vld [vmem:[%s15645_s9 + $0x80] sm:$0xff] }
 0x4c5   : > { %11013 = vmatprep.subr.bf16.mxu1 %v11012_v49 }
 0x4c7   : > { %10652 = vmatmul.mubr.msk.f32.gmra.mrb[2].mxu1 %vm3851_vm10, %v14446_v34  ;;  %v9406_v34 = vld [vmem:[%s15645_s9 + $0x88] sm:$0xff] }
 0x4c8   : > { %10654 = vmatprep.mubr.msk.f32.mxu1 %vm3851_vm10, %v14450_v42  ;;  %v11016_v42 = vpack.c.bf16 %v9406_v34, %v9405_v4 }
 0x4cb   : > { %10655 = vmatmul.mubr.msk.f32.gmra.mrb[4].mxu1 %vm3851_vm10, %v14454_v53  ;;  %v6562_v53 = vld [vmem:[#allocation3 + $0xa9] sm:$0xff] }
 0x4cc   : > { %10657 = vmatprep.mubr.msk.f32.mxu1 %vm3851_vm10, %v14458_v13  ;;  %v6563_v13 = vld [vmem:[#allocation3 + $0xb1] sm:$0xff] }
 0x4cf   : > { %10658 = vmatmul.mubr.msk.f32.gmra.mrb[6].mxu1 %vm3851_vm10, %v14462_v11  ;;  %v6926_v11 = vld [vmem:[#allocation4 + $0xaa] sm:$0xff] }
 0x4d0   : > { %10660 = vmatprep.mubr.msk.f32.mxu1 %vm3851_vm10, %v14710_v44 }
 0x4d3   : > { %10661 = vmatmul.mubr.msk.f32.gmra.mrb[8].mxu1 %vm3851_vm10, %v14714_v24 }
 0x4d4   : > { %10663 = vmatprep.mubr.msk.f32.mxu1 %vm3851_vm10, %v6550_v20 }
 0x4d7   : > { %10664 = vmatmul.mubr.msk.f32.gmra.mrb[10].mxu1 %vm3851_vm10, %v6551_v63 }
 0x4d8   : > { %10670 = vmatprep.mubr.msk.f32.mxu1 %vm3851_vm10, %v14480_v3  ;;  %v6927_v3 = vld [vmem:[#allocation4 + $0xb2] sm:$0xff] }
 0x4db   : > { %10671 = vmatmul.mubr.msk.f32.vlgmr.msra.gmra.mrb[0].mxu1 %vm3851_vm10, %v14486_v52  ;;  %v6938_v52 = vld [vmem:[#allocation3 + $0xaa] sm:$0xff] }
 0x4dc   : > { %11015 = vmatpush3.bf16.msra.mxu1 %v11012_v49  ;;  %10673 = vmatprep.mubr.msk.f32.mxu1 %vm3851_vm10, %v14488_v0  ;;  %v6939_v0 = vld [vmem:[#allocation3 + $0xb2] sm:$0xff] }
 0x4dd   : > { %11017 = vmatprep.subr.bf16.mxu1 %v11016_v42 }
 0x4df   : > { %10674 = vmatmul.mubr.msk.f32.gmra.mrb[2].mxu1 %vm3851_vm10, %v14494_v21  ;;  %v7361_v21 = vld [vmem:[%s15659_s2] sm:$0xff] }
 0x4e0   : > { %10676 = vmatprep.mubr.msk.f32.mxu1 %vm3851_vm10, %v14496_v27  ;;  %v7362_v27 = vld [vmem:[%s15659_s2 + $0x8] sm:$0xff] }
 0x4e3   : > { %10677 = vmatmul.mubr.msk.f32.gmra.mrb[4].mxu1 %vm3851_vm10, %v14502_v17  ;;  %v11024_v17 = vpack.c.bf16 %v7362_v27, %v7361_v21 }
 0x4e4   : > { %10679 = vmatprep.mubr.msk.f32.mxu1 %vm3851_vm10, %v14504_v62  ;;  %v9419_v62 = vld [vmem:[%s15664_s23] ss:$0 sm:$0xff]  ;;  %s9512_s23 = sshll.u32 %s15667_s4, 5 }
 0x4e5   : > { %11025 = vmatprep.subr.bf16.mxu0 %v11024_v17  ;;  %s8714_s24 = sadd.s32 %s9525_s25, %s9512_s23 }
 0x4e6   : > { %s9513_s13 = sshll.u32 %s8714_s24, 7 }
 0x4e7   : > { %10680 = vmatmul.mubr.msk.f32.gmra.mrb[6].mxu1 %vm3851_vm10, %v14510_v39  ;;  %s15214_s18 = scalar_lea.hbm %s15670_s12, %s9513_s13 }
 0x4e8   : > { %10682 = vmatprep.mubr.msk.f32.mxu1 %vm3851_vm10, %v14742_v28 }
 0x4eb   : > { %10683 = vmatmul.mubr.msk.f32.gmra.mrb[8].mxu1 %vm3851_vm10, %v14748_v9 }
 0x4ec   : > { %10685 = vmatprep.mubr.msk.f32.mxu1 %vm3851_vm10, %v6562_v53  ;;  %v9449_v53 = vld [vmem:[%s15659_s2 + $0x38] sm:$0xff] }
 0x4ef   : > { %10686 = vmatmul.mubr.msk.f32.gmra.mrb[10].mxu1 %vm3851_vm10, %v6563_v13 }
 0x4f0   : > { %10692 = vmatprep.mubr.msk.f32.mxu1 %vm3851_vm10, %v14530_v32 }
 0x4f3   : > { %10693 = vmatmul.mubr.msk.f32.vlgmr.msra.gmra.mrb[0].mxu1 %vm3851_vm10, %v14534_v41 }
 0x4f4   : > { %11019 = vmatpush3.bf16.msra.mxu1 %v11016_v42  ;;  %10695 = vmatprep.mubr.msk.f32.mxu1 %vm3851_vm10, %v14538_v31  ;;  %v9448_v42 = vld [vmem:[%s15659_s2 + $0x30] sm:$0xff] }
 0x4f5   : > { %v11032_v13 = vpack.c.bf16 %v9449_v53, %v9448_v42 }
 0x4f7   : > { %10696 = vmatmul.mubr.msk.f32.gmra.mrb[2].mxu1 %vm3851_vm10, %v14542_v15 }
 0x4f8   : > { %10698 = vmatprep.mubr.msk.f32.mxu1 %vm3851_vm10, %v14546_v57 }
 0x4fb   : > { %10699 = vmatmul.mubr.msk.f32.gmra.mrb[4].mxu1 %vm3851_vm10, %v14550_v38 }
 0x4fc   : > { %10701 = vmatprep.mubr.msk.f32.mxu1 %vm3851_vm10, %v14554_v35  ;;  %v15665_v35 = vld [vmem:[#allocation50_spill] sm:$0xff] }
 0x4ff   : > { %10702 = vmatmul.mubr.msk.f32.gmra.mrb[6].mxu1 %vm3851_vm10, %v14558_v18 }
 0x500   : > { %10704 = vmatprep.mubr.msk.f32.mxu1 %vm3851_vm10, %v14778_v10 }
 0x503   : > { %10705 = vmatmul.mubr.msk.f32.gmra.mrb[8].mxu1 %vm3851_vm10, %v14782_v55  ;;  %v9438_v55 = vld [vmem:[%s15659_s2 + $0x20] sm:$0xff] }
 0x504   : > { %10707 = vmatprep.mubr.msk.f32.mxu1 %vm3851_vm10, %v6926_v11  ;;  %v11028_v23 = vpack.c.bf16 %v9439_v61, %v9438_v55 }
 0x507   : > { %10708 = vmatmul.mubr.msk.f32.gmra.mrb[10].mxu1 %vm3851_vm10, %v6927_v3 }
 0x508   : > { %10714 = vmatprep.mubr.msk.f32.mxu1 %vm3851_vm10, %v14576_v19 }
 0x50b   : > { %10715 = vmatmul.mubr.msk.f32.vlgmr.msra.gmra.mrb[0].mxu1 %vm3851_vm10, %v14582_v51 }
 0x50c   : > { %10717 = vmatprep.mubr.msk.f32.mxu1 %vm3851_vm10, %v14584_v50 }
 0x50f   : > { %10718 = vmatmul.mubr.msk.f32.gmra.mrb[2].mxu1 %vm3851_vm10, %v14590_v59 }
 0x510   : > { %10720 = vmatprep.mubr.msk.f32.mxu1 %vm3851_vm10, %v14592_v54 }
 0x513   : > { %10721 = vmatmul.mubr.msk.f32.gmra.mrb[4].mxu1 %vm3851_vm10, %v15657_v29 }
 0x514   : > { %10723 = vmatprep.mubr.msk.f32.mxu1 %vm3851_vm10, %v14600_v7 }
 0x517   : > { %10724 = vmatmul.mubr.msk.f32.gmra.mrb[6].mxu1 %vm3851_vm10, %v14606_v43 }
 0x518   : > { %10726 = vmatprep.mubr.msk.f32.mxu1 %vm3851_vm10, %v14810_v48 }
 0x51b   : > { %10727 = vmatmul.mubr.msk.f32.gmra.mrb[8].mxu1 %vm3851_vm10, %v14816_v56 }
 0x51c   : > { %10729 = vmatprep.mubr.msk.f32.mxu1 %vm3851_vm10, %v6938_v52 }
 0x51f   : > { %10730 = vmatmul.mubr.msk.f32.gmra.mrb[10].mxu1 %vm3851_vm10, %v6939_v0 }
 0x5de   : > { %v10716_v39 = vpop.f32.mrb[0].mxu1 }
 0x5df   : > { %v7300_v32 = vadd.f32 %v10716_v39, %v9419_v62  ;;  %v7221_v41 = vpop.f32.mrb[1].mxu1  ;;  %v9459_v39 = vld [vmem:[%s15659_s2 + $0x48] sm:$0xff] }
 0x5e0   : > { %v7299_v31 = vadd.f32 %v9419_v62, %v7221_v41 }
 0x5e1   : > { %v7312_v15 = vmax.f32 %v7300_v32, 0.0 }
 0x5e2   : > { %v7311_v57 = vmax.f32 %v7299_v31, 0.0  ;;  %v10719_v38 = vpop.f32.mrb[2].mxu1 }
 0x5e3   : > { %v7336_v18 = vmul.f32 %v7312_v15, %v15665_v35  ;;  %v7302_v19 = vadd.f32 %v10719_v38, %v9419_v62  ;;  %v7231_v51 = vpop.f32.mrb[3].mxu1 }
 0x5e4   : > { %v7335_v50 = vmul.f32 %v7311_v57, %v15665_v35  ;;  %v7301_v59 = vadd.f32 %v9419_v62, %v7231_v51  ;;  %v9468_v51 = vld [vmem:[%s15659_s2 + $0x50] sm:$0xff] }
 0x5e5   : > { %7338 = vst.msk [vmem:[#allocation5 + $0x9] sm:$0xff] %vm3851_vm10, %v7336_v18  ;;  %v7314_v54 = vmax.f32 %v7302_v19, 0.0 }
 0x5e6   : > { %7337 = vst.msk [vmem:[#allocation5 + $0x1] sm:$0xff] %vm3851_vm10, %v7335_v50  ;;  %v7313_v7 = vmax.f32 %v7301_v59, 0.0  ;;  %v10722_v43 = vpop.f32.mrb[4].mxu1  ;;  %v9469_v50 = vld [vmem:[%s15659_s2 + $0x58] sm:$0xff] }
 0x5e7   : > { %7341 = vst.msk [vmem:[#allocation5 + $0x21] sm:$0xff] %vm3851_vm10, %v7314_v54  ;;  %v7304_v60 = vadd.f32 %v10722_v43, %v9419_v62  ;;  %v7241_v44 = vpop.f32.mrb[5].mxu1  ;;  %v11040_v59 = vpack.c.bf16 %v9469_v50, %v9468_v51  ;;  %v9478_v43 = vld [vmem:[%s15659_s2 + $0x60] sm:$0xff] }
 0x5e8   : > { %7340 = vst.msk [vmem:[#allocation5 + $0x19] sm:$0xff] %vm3851_vm10, %v7313_v7  ;;  %v7303_v24 = vadd.f32 %v9419_v62, %v7241_v44 }
 0x5e9   : > { %v7316_v28 = vmax.f32 %v7304_v60, 0.0  ;;  %v9479_v60 = vld [vmem:[%s15659_s2 + $0x68] sm:$0xff] }
 0x5ea   : > { %v7315_v9 = vmax.f32 %v7303_v24, 0.0  ;;  %v10725_v10 = vpop.f32.mrb[6].mxu1  ;;  %v11044_v44 = vpack.c.bf16 %v9479_v60, %v9478_v43 }
 0x5eb   : > { %7343 = vst.msk [vmem:[#allocation5 + $0x39] sm:$0xff] %vm3851_vm10, %v7316_v28  ;;  %v7306_v40 = vadd.f32 %v10725_v10, %v9419_v62  ;;  %v7251_v29 = vpop.f32.mrb[7].mxu1  ;;  %v9489_v10 = vld [vmem:[%s15659_s2 + $0x78] sm:$0xff] }
 0x5ec   : > { %7342 = vst.msk [vmem:[#allocation5 + $0x31] sm:$0xff] %vm3851_vm10, %v7315_v9  ;;  %v7305_v48 = vadd.f32 %v9419_v62, %v7251_v29  ;;  %v7364_v26 = vld [vmem:[#allocation5 + $0x9] sm:$0xff]  ;;  %v9498_v29 = vld [vmem:[%s15659_s2 + $0x80] sm:$0xff] }
 0x5ed   : > { %v7318_v56 = vmax.f32 %v7306_v40, 0.0  ;;  %v7363_v2 = vld [vmem:[#allocation5 + $0x1] sm:$0xff]  ;;  %v7633_v31 = vld [vmem:[#allocation5 + $0xa] sm:$0xff] }
 0x5ee   : > { %v7317_v36 = vmax.f32 %v7305_v48, 0.0  ;;  %v10728_v33 = vpop.f32.mrb[8].mxu1  ;;  %10736 = vmatprep.mubr.msk.f32.mxu0 %vm3851_vm10, %v7363_v2  ;;  %v15013_v12 = vld [vmem:[#allocation5 + $0x21] sm:$0xff]  ;;  %v9488_v9 = vld [vmem:[%s15659_s2 + $0x70] sm:$0xff] }
 0x5ef   : > { %7345 = vst.msk [vmem:[#allocation5 + $0x51] sm:$0xff] %vm3851_vm10, %v7318_v56  ;;  %v7308_v58 = vadd.f32 %v10728_v33, %v9419_v62  ;;  %v7261_v37 = vpop.f32.mrb[9].mxu1  ;;  %10737 = vmatmul.mubr.msk.f32.vlgmr.msra.gmra.mrb[16].mxu0 %vm3851_vm10, %v7364_v26  ;;  %v15008_v30 = vld [vmem:[#allocation5 + $0x19] sm:$0xff]  ;;  %v7354_v11 = vld [vmem:[#allocation5 + $0x8] sm:$0xff]  ;;  %v11048_v55 = vpack.c.bf16 %v9489_v10, %v9488_v9 }
 0x5f0   : > { %7344 = vst.msk [vmem:[#allocation5 + $0x49] sm:$0xff] %vm3851_vm10, %v7317_v36  ;;  %v7307_v1 = vadd.f32 %v9419_v62, %v7261_v37  ;;  %11027 = vmatpush3.bf16.msra.mxu0 %v11024_v17  ;;  %10739 = vmatprep.mubr.msk.f32.mxu0 %vm3851_vm10, %v15008_v30  ;;  %v7355_v3 = vld [vmem:[#allocation5 + $0x18] sm:$0xff]  ;;  %v7356_v52 = vld [vmem:[#allocation5 + $0x20] sm:$0xff]  ;;  %v9499_v48 = vld [vmem:[%s15659_s2 + $0x88] sm:$0xff] }
 0x5f1   : > { %v7320_v8 = vmax.f32 %v7308_v58, 0.0  ;;  %11029 = vmatprep.subr.bf16.mxu0 %v11028_v23  ;;  %v7632_v32 = vld [vmem:[#allocation5 + $0x2] sm:$0xff]  ;;  %v7634_v15 = vld [vmem:[#allocation5 + $0x1a] sm:$0xff]  ;;  %v11052_v56 = vpack.c.bf16 %v9499_v48, %v9498_v29 }
 0x5f2   : > { %v7319_v16 = vmax.f32 %v7307_v1, 0.0  ;;  %v10731_v22 = vpop.f32.mrb[10].mxu1  ;;  %v15023_v49 = vld [vmem:[#allocation5 + $0x39] sm:$0xff]  ;;  %v7635_v57 = vld [vmem:[#allocation5 + $0x22] sm:$0xff] }
 0x5f3   : > { %7347 = vst.msk [vmem:[#allocation5 + $0x69] sm:$0xff] %vm3851_vm10, %v7320_v8  ;;  %v7310_v45 = vadd.f32 %v10731_v22, %v9419_v62  ;;  %v7271_v6 = vpop.f32.mrb[11].mxu1  ;;  %10740 = vmatmul.mubr.msk.f32.gmra.mrb[18].mxu0 %vm3851_vm10, %v15013_v12  ;;  %v15018_v14 = vld [vmem:[#allocation5 + $0x31] sm:$0xff]  ;;  %v15079_v35 = vld [vmem:[#allocation5 + $0x3a] sm:$0xff] }
 0x5f4   : > { %7346 = vst.msk [vmem:[#allocation5 + $0x61] sm:$0xff] %vm3851_vm10, %v7319_v16  ;;  %v7309_v47 = vadd.f32 %v9419_v62, %v7271_v6  ;;  %10742 = vmatprep.mubr.msk.f32.mxu0 %vm3851_vm10, %v15018_v14  ;;  %v15049_v0 = vld [vmem:[#allocation5 + $0x30] sm:$0xff]  ;;  %v15053_v21 = vld [vmem:[#allocation5 + $0x38] sm:$0xff]  ;;  %v9458_v62 = vld [vmem:[%s15659_s2 + $0x40] sm:$0xff] }
 0x5f5   : > { %v7322_v46 = vmax.f32 %v7310_v45, 0.0  ;;  %v11036_v41 = vpack.c.bf16 %v9459_v39, %v9458_v62  ;;  %v15075_v38 = vld [vmem:[#allocation5 + $0x32] sm:$0xff]  ;;  %v9508_v37 = vld [vmem:[%s15666_s19] ss:$0 sm:$0xff]  ;;  %s11850_s19 = scalar_lea.vmem %s11849_s14, 2048 }
 0x5f6   : > { %v7321_v25 = vmax.f32 %v7309_v47, 0.0  ;;  %v15035_v34 = vld [vmem:[#allocation5 + $0x51] sm:$0xff]  ;;  %p11852_p9 = scmp.lt.s32.totalorder %s11850_s19, %s11844_s17 }
 0x5f7   : > { %v7349_v20 = vmul.f32 %v7322_v46, %v15632_v5  ;;  %10743 = vmatmul.mubr.msk.f32.gmra.mrb[20].mxu0 %vm3851_vm10, %v15023_v49  ;;  %v15028_v63 = vld [vmem:[#allocation5 + $0x49] sm:$0xff]  ;;  %v15087_v19 = vld [vmem:[#allocation5 + $0x52] sm:$0xff] }
 0x5f8   : > { %v7348_v4 = vmul.f32 %v7321_v25, %v15632_v5  ;;  %10745 = vmatprep.mubr.msk.f32.mxu0 %vm3851_vm10, %v15028_v63  ;;  %v7353_v5 = vld [vmem:[#allocation5] sm:$0xff]  ;;  %v15057_v27 = vld [vmem:[#allocation5 + $0x48] sm:$0xff]  ;;  %v15061_v17 = vld [vmem:[#allocation5 + $0x50] sm:$0xff]  ;;  %p11853_p7 = por %p11852_p9, %p11851_p11 }
 0x5f9   : > { %7352 = vst.msk [vmem:[#allocation5 + $0x81] sm:$0xff] %vm3851_vm10, %v7349_v20  ;;  %v15083_v18 = vld [vmem:[#allocation5 + $0x4a] sm:$0xff] }
 0x5fa   : > { %7351 = vst.msk [vmem:[#allocation5 + $0x79] sm:$0xff] %vm3851_vm10, %v7348_v4  ;;  %v7935_v28 = vld [vmem:[#allocation5 + $0x69] sm:$0xff]  ;;  %p11854_p4 = pnand %p11853_p7, %p11847_p2 }
 0x5fb   : > { %10746 = vmatmul.mubr.msk.f32.gmra.mrb[22].mxu0 %vm3851_vm10, %v15035_v34  ;;  %v7786_v54 = vld [vmem:[#allocation5 + $0x60] sm:$0xff]  ;;  %v7787_v7 = vld [vmem:[#allocation5 + $0x68] sm:$0xff] }
 0x5fc   : > { %10752 = vmatprep.mubr.msk.f32.mxu0 %vm3851_vm10, %v7353_v5  ;;  %v7934_v24 = vld [vmem:[#allocation5 + $0x61] sm:$0xff]  ;;  %v8083_v40 = vld [vmem:[#allocation5 + $0x6a] sm:$0xff] }
 0x5fd   : > { %v8082_v61 = vld [vmem:[#allocation5 + $0x62] sm:$0xff] }
 0x5ff   : > { %10753 = vmatmul.mubr.msk.f32.vlgmr.msra.gmra.mrb[16].mxu0 %vm3851_vm10, %v7354_v11 }
 0x600   : > { %11031 = vmatpush3.bf16.msra.mxu0 %v11028_v23  ;;  %10755 = vmatprep.mubr.msk.f32.mxu0 %vm3851_vm10, %v7355_v3  ;;  %v8380_v33 = vld [vmem:[#allocation5 + $0x81] sm:$0xff] }
 0x601   : > { %11033 = vmatprep.subr.bf16.mxu0 %v11032_v13  ;;  %v8231_v2 = vld [vmem:[#allocation5 + $0x78] sm:$0xff]  ;;  %v8232_v23 = vld [vmem:[#allocation5 + $0x80] sm:$0xff] }
 0x602   : > { %v8379_v36 = vld [vmem:[#allocation5 + $0x79] sm:$0xff]  ;;  %v8528_v58 = vld [vmem:[#allocation5 + $0x82] sm:$0xff] }
 0x603   : > { %10756 = vmatmul.mubr.msk.f32.gmra.mrb[18].mxu0 %vm3851_vm10, %v7356_v52  ;;  %v8527_v26 = vld [vmem:[#allocation5 + $0x7a] sm:$0xff] }
 0x604   : > { %10758 = vmatprep.mubr.msk.f32.mxu0 %vm3851_vm10, %v15049_v0 }
 0x607   : > { %10759 = vmatmul.mubr.msk.f32.gmra.mrb[20].mxu0 %vm3851_vm10, %v15053_v21 }
 0x608   : > { %10761 = vmatprep.mubr.msk.f32.mxu0 %vm3851_vm10, %v15057_v27 }
 0x60b   : > { %10762 = vmatmul.mubr.msk.f32.gmra.mrb[22].mxu0 %vm3851_vm10, %v15061_v17 }
 0x60c   : > { %10768 = vmatprep.mubr.msk.f32.mxu0 %vm3851_vm10, %v7632_v32 }
 0x60f   : > { %10769 = vmatmul.mubr.msk.f32.vlgmr.msra.gmra.mrb[16].mxu0 %vm3851_vm10, %v7633_v31 }
 0x610   : > { %11035 = vmatpush3.bf16.msra.mxu0 %v11032_v13  ;;  %10771 = vmatprep.mubr.msk.f32.mxu0 %vm3851_vm10, %v7634_v15 }
 0x611   : > { %11037 = vmatprep.subr.bf16.mxu0 %v11036_v41 }
 0x613   : > { %10772 = vmatmul.mubr.msk.f32.gmra.mrb[18].mxu0 %vm3851_vm10, %v7635_v57 }
 0x614   : > { %10774 = vmatprep.mubr.msk.f32.mxu0 %vm3851_vm10, %v15075_v38 }
 0x617   : > { %10775 = vmatmul.mubr.msk.f32.gmra.mrb[20].mxu0 %vm3851_vm10, %v15079_v35 }
 0x618   : > { %10777 = vmatprep.mubr.msk.f32.mxu0 %vm3851_vm10, %v15083_v18 }
 0x61b   : > { %10778 = vmatmul.mubr.msk.f32.gmra.mrb[22].mxu0 %vm3851_vm10, %v15087_v19 }
 0x61c   : > { %10784 = vmatprep.mubr.msk.f32.mxu0 %vm3851_vm10, %v7355_v3 }
 0x61f   : > { %10785 = vmatmul.mubr.msk.f32.vlgmr.msra.gmra.mrb[16].mxu0 %vm3851_vm10, %v7356_v52 }
 0x620   : > { %11039 = vmatpush3.bf16.msra.mxu0 %v11036_v41  ;;  %10787 = vmatprep.mubr.msk.f32.mxu0 %vm3851_vm10, %v15049_v0 }
 0x621   : > { %11041 = vmatprep.subr.bf16.mxu0 %v11040_v59 }
 0x623   : > { %10788 = vmatmul.mubr.msk.f32.gmra.mrb[18].mxu0 %vm3851_vm10, %v15053_v21 }
 0x624   : > { %10790 = vmatprep.mubr.msk.f32.mxu0 %vm3851_vm10, %v15057_v27 }
 0x627   : > { %10791 = vmatmul.mubr.msk.f32.gmra.mrb[20].mxu0 %vm3851_vm10, %v15061_v17 }
 0x628   : > { %10793 = vmatprep.mubr.msk.f32.mxu0 %vm3851_vm10, %v7786_v54 }
 0x62b   : > { %10794 = vmatmul.mubr.msk.f32.gmra.mrb[22].mxu0 %vm3851_vm10, %v7787_v7 }
 0x62c   : > { %10800 = vmatprep.mubr.msk.f32.mxu0 %vm3851_vm10, %v15008_v30 }
 0x62f   : > { %10801 = vmatmul.mubr.msk.f32.vlgmr.msra.gmra.mrb[16].mxu0 %vm3851_vm10, %v15013_v12 }
 0x630   : > { %11043 = vmatpush3.bf16.msra.mxu0 %v11040_v59  ;;  %10803 = vmatprep.mubr.msk.f32.mxu0 %vm3851_vm10, %v15018_v14 }
 0x631   : > { %11045 = vmatprep.subr.bf16.mxu0 %v11044_v44 }
 0x633   : > { %10804 = vmatmul.mubr.msk.f32.gmra.mrb[18].mxu0 %vm3851_vm10, %v15023_v49 }
 0x634   : > { %10806 = vmatprep.mubr.msk.f32.mxu0 %vm3851_vm10, %v15028_v63 }
 0x637   : > { %10807 = vmatmul.mubr.msk.f32.gmra.mrb[20].mxu0 %vm3851_vm10, %v15035_v34 }
 0x638   : > { %10809 = vmatprep.mubr.msk.f32.mxu0 %vm3851_vm10, %v7934_v24 }
 0x63b   : > { %10810 = vmatmul.mubr.msk.f32.gmra.mrb[22].mxu0 %vm3851_vm10, %v7935_v28 }
 0x63c   : > { %10816 = vmatprep.mubr.msk.f32.mxu0 %vm3851_vm10, %v7634_v15 }
 0x63f   : > { %10817 = vmatmul.mubr.msk.f32.vlgmr.msra.gmra.mrb[16].mxu0 %vm3851_vm10, %v7635_v57 }
 0x640   : > { %11047 = vmatpush3.bf16.msra.mxu0 %v11044_v44  ;;  %10819 = vmatprep.mubr.msk.f32.mxu0 %vm3851_vm10, %v15075_v38 }
 0x641   : > { %11049 = vmatprep.subr.bf16.mxu0 %v11048_v55 }
 0x643   : > { %10820 = vmatmul.mubr.msk.f32.gmra.mrb[18].mxu0 %vm3851_vm10, %v15079_v35 }
 0x644   : > { %10822 = vmatprep.mubr.msk.f32.mxu0 %vm3851_vm10, %v15083_v18 }
 0x647   : > { %10823 = vmatmul.mubr.msk.f32.gmra.mrb[20].mxu0 %vm3851_vm10, %v15087_v19 }
 0x648   : > { %10825 = vmatprep.mubr.msk.f32.mxu0 %vm3851_vm10, %v8082_v61 }
 0x64b   : > { %10826 = vmatmul.mubr.msk.f32.gmra.mrb[22].mxu0 %vm3851_vm10, %v8083_v40 }
 0x64c   : > { %10832 = vmatprep.mubr.msk.f32.mxu0 %vm3851_vm10, %v15049_v0 }
 0x64f   : > { %10833 = vmatmul.mubr.msk.f32.vlgmr.msra.gmra.mrb[16].mxu0 %vm3851_vm10, %v15053_v21 }
 0x650   : > { %11051 = vmatpush3.bf16.msra.mxu0 %v11048_v55  ;;  %10835 = vmatprep.mubr.msk.f32.mxu0 %vm3851_vm10, %v15057_v27 }
 0x651   : > { %11053 = vmatprep.subr.bf16.mxu0 %v11052_v56 }
 0x653   : > { %10836 = vmatmul.mubr.msk.f32.gmra.mrb[18].mxu0 %vm3851_vm10, %v15061_v17 }
 0x654   : > { %10838 = vmatprep.mubr.msk.f32.mxu0 %vm3851_vm10, %v7786_v54 }
 0x657   : > { %10839 = vmatmul.mubr.msk.f32.gmra.mrb[20].mxu0 %vm3851_vm10, %v7787_v7 }
 0x658   : > { %10841 = vmatprep.mubr.msk.f32.mxu0 %vm3851_vm10, %v8231_v2 }
 0x65b   : > { %10842 = vmatmul.mubr.msk.f32.gmra.mrb[22].mxu0 %vm3851_vm10, %v8232_v23 }
 0x65c   : > { %10848 = vmatprep.mubr.msk.f32.mxu0 %vm3851_vm10, %v15018_v14 }
 0x65f   : > { %10849 = vmatmul.mubr.msk.f32.vlgmr.msra.gmra.mrb[16].mxu0 %vm3851_vm10, %v15023_v49 }
 0x660   : > { %11055 = vmatpush3.bf16.msra.mxu0 %v11052_v56  ;;  %10851 = vmatprep.mubr.msk.f32.mxu0 %vm3851_vm10, %v15028_v63 }
 0x663   : > { %10852 = vmatmul.mubr.msk.f32.gmra.mrb[18].mxu0 %vm3851_vm10, %v15035_v34 }
 0x664   : > { %10854 = vmatprep.mubr.msk.f32.mxu0 %vm3851_vm10, %v7934_v24 }
 0x667   : > { %10855 = vmatmul.mubr.msk.f32.gmra.mrb[20].mxu0 %vm3851_vm10, %v7935_v28 }
 0x668   : > { %10857 = vmatprep.mubr.msk.f32.mxu0 %vm3851_vm10, %v8379_v36 }
 0x66b   : > { %10858 = vmatmul.mubr.msk.f32.gmra.mrb[22].mxu0 %vm3851_vm10, %v8380_v33 }
 0x66c   : > { %10864 = vmatprep.mubr.msk.f32.mxu0 %vm3851_vm10, %v15075_v38 }
 0x66f   : > { %10865 = vmatmul.mubr.msk.f32.vlgmr.msra.gmra.mrb[16].mxu0 %vm3851_vm10, %v15079_v35 }
 0x670   : > { %10867 = vmatprep.mubr.msk.f32.mxu0 %vm3851_vm10, %v15083_v18 }
 0x673   : > { %10868 = vmatmul.mubr.msk.f32.gmra.mrb[18].mxu0 %vm3851_vm10, %v15087_v19 }
 0x674   : > { %10870 = vmatprep.mubr.msk.f32.mxu0 %vm3851_vm10, %v8082_v61 }
 0x677   : > { %10871 = vmatmul.mubr.msk.f32.gmra.mrb[20].mxu0 %vm3851_vm10, %v8083_v40 }
 0x678   : > { %10873 = vmatprep.mubr.msk.f32.mxu0 %vm3851_vm10, %v8527_v26 }
 0x67b   : > { %10874 = vmatmul.mubr.msk.f32.gmra.mrb[22].mxu0 %vm3851_vm10, %v8528_v58 }
 0x742   : > { %v10866_v30 = vpop.f32.mrb[16].mxu0 }
 0x743   : > { %v8677_v1 = vadd.f32 %v10866_v30, %v9508_v37  ;;  %v8622_v8 = vpop.f32.mrb[17].mxu0 }
 0x744   : > { %v8676_v16 = vadd.f32 %v9508_v37, %v8622_v8 }
 0x745   : > { %v8685_v22 = vmax.f32 %v8677_v1, 0.0 }
 0x746   : > { %v8684_v12 = vmax.f32 %v8676_v16, 0.0  ;;  %v10869_v45 = vpop.f32.mrb[18].mxu0 }
 0x747   : > { %8693 = vst.msk [vmem:[%s15194_s1 + $0x8] sm:$0xff] %vm3851_vm10, %v8685_v22  ;;  %v8679_v6 = vadd.f32 %v10869_v45, %v9508_v37  ;;  %v8632_v14 = vpop.f32.mrb[19].mxu0 }
 0x748   : > { %8692 = vst.msk [vmem:[%s15194_s1] sm:$0xff] %vm3851_vm10, %v8684_v12  ;;  %v8678_v47 = vadd.f32 %v9508_v37, %v8632_v14 }
 0x749   : > { %v8687_v46 = vmax.f32 %v8679_v6, 0.0 }
 0x74a   : > { %v8686_v25 = vmax.f32 %v8678_v47, 0.0  ;;  %v10872_v49 = vpop.f32.mrb[20].mxu0 }
 0x74b   : > { %8695 = vst.msk [vmem:[%s15194_s1 + $0x18] sm:$0xff] %vm3851_vm10, %v8687_v46  ;;  %v8681_v20 = vadd.f32 %v10872_v49, %v9508_v37  ;;  %v8642_v63 = vpop.f32.mrb[21].mxu0 }
 0x74c   : > { %8694 = vst.msk [vmem:[%s15194_s1 + $0x10] sm:$0xff] %vm3851_vm10, %v8686_v25  ;;  %v8680_v4 = vadd.f32 %v9508_v37, %v8642_v63 }
 0x74d   : > { %v8689_v34 = vmax.f32 %v8681_v20, 0.0 }
 0x74e   : > { %v8688_v42 = vmax.f32 %v8680_v4, 0.0  ;;  %v10875_v53 = vpop.f32.mrb[22].mxu0 }
 0x74f   : > { %8697 = vst.msk [vmem:[%s15194_s1 + $0x28] sm:$0xff] %vm3851_vm10, %v8689_v34  ;;  %v8683_v5 = vadd.f32 %v10875_v53, %v9508_v37  ;;  %v8652_v13 = vpop.f32.mrb[23].mxu0 }
 0x750   : > { %8696 = vst.msk [vmem:[%s15194_s1 + $0x20] sm:$0xff] %vm3851_vm10, %v8688_v42  ;;  %v8682_v11 = vadd.f32 %v9508_v37, %v8652_v13 }
 0x751   : > { %v8691_v3 = vmax.f32 %v8683_v5, 0.0 }
 0x752   : > { %v8690_v52 = vmax.f32 %v8682_v11, 0.0 }
 0x753   : > { %8699 = vst.msk [vmem:[%s15194_s1 + $0x38] sm:$0xff] %vm3851_vm10, %v8691_v3 }
 0x754   : > { %8698 = vst.msk [vmem:[%s15194_s1 + $0x30] sm:$0xff] %vm3851_vm10, %v8690_v52 }
 0x755   : > { %11857 = shalt.err (!%p11854_p4)
}
 0x756   : > { %s11858_s4 = scalar_lea.hbm %s15214_s18, 1024  ;;  %s11862_s25 = scalar_lea.hbm %s15671_s5, 8192 }
 0x757   : > { %p11859_p13 = scmp.ne.s32.totalorder %s15214_s18, %s11858_s4  ;;  %p11863_p1 = scmp.lt.u32.totalorder %s15214_s18, %s15671_s5 }
 0x758   : > { %p11864_p10 = scmp.lt.u32.totalorder %s11862_s25, %s11858_s4  ;;  %p11866_p6 = scmp.lt.u32.totalorder %s11858_s4, %s15214_s18 }
 0x759   : > { %p11860_p3 = pnand %p11859_p13, %p15672_p12 }
 0x75a   : > { %p11865_p0 = por %p11864_p10, %p11863_p1 }
 0x75b   : > { %p11861_p8 = pneg %p11860_p3 }
 0x75c   : > { %p11867_p5 = por %p11866_p6, %p11865_p0 }
 0x75e   : > { %p11868_p2 = pnand %p11867_p5, %p11861_p8 }
 0x760   : > { %11871 = shalt.err (!%p11868_p2)
}
 0x761   : > { %s12072_s13 = smov 128   ;;  %s12073_s27 = smov 8  }
 0x762   : > { %11464 = dma.vmem_to_hbm [thread:$0]  (%p15672_p12), %s15216_s15, 1024, %s15214_s18, %s8701_s29, %s12072_s13, %s12072_s13, %s12073_s27  }
 0x763 PF: > { %s15673_s20 = sld [smem:[#allocation35_spill]]  ;;  %s15674_s12 = sld [smem:[#allocation49_spill]] }
 0x764   : > { %p11490_p11 = scmp.ge.s32.totalorder %s12058_s10, 2 }
 0x769   : > { %s8732_s17 = sand.u32 1, %s15673_s20   ;;  %p15675_p9 = scmp.ne.s32.totalorder %s15674_s12, 0 }
 0x76a   : > { %s8733_s26 = scalar_lea.sflag [#allocation8], %s8732_s17 }
 0x76b   : > { %p11486_p7 = pnand %p11490_p11, %p15675_p9 }
 0x76d   : > { %11977 = dma.done.wait (!%p11486_p7), %s8733_s26, 1024  }
 0x76e   : > { %11979 = vsyncadd (!%p11486_p7), %s8733_s26, 4294966272  ;;  %s38_s10 = sadd.s32 1, %s12058_s10   ;;  %s15677_s25 = sld [smem:[#allocation26_spill]] }
 0x76f   : > { %p15251_p4 = scmp.ge.s32.totalorder %s38_s10, 10   ;;  %s15678_s26 = sld [smem:[#allocation27_spill]] }
 0x770   : > { %s15679_s30 = sld [smem:[#allocation29_spill]]  ;;  %s15680_s29 = sld [smem:[#allocation30_spill]] }
 0x771   : > { %s15681_s22 = sld [smem:[#allocation32_spill]]  ;;  %s15682_s17 = sld [smem:[#allocation33_spill]] }
 0x772   : > { %s15683_s18 = sld [smem:[#allocation34_spill]]  ;;  %s15684_s19 = sld [smem:[#allocation45_spill]] }
 0x773   : > { %s15685_s20 = sld [smem:[#allocation36_spill]]  ;;  %s15686_s21 = sld [smem:[#allocation37_spill]] }
 0x774   : > { %s15687_s4 = sld [smem:[#allocation46_spill]]  ;;  %s15688_s23 = sld [smem:[#allocation40_spill]] }
 0x775   : > { %s15689_s24 = sld [smem:[#allocation41_spill]]  ;;  %s15690_s13 = sld [smem:[#allocation42_spill]] }
 0x776   : > { %s15691_s27 = smov %s15721_s28  ;;  %s15692_s12 = sld [smem:[#allocation43_spill]] }
 0x777   : > { %s15693_s28 = smov %s15679_s30  ;;  %s15695_s30 = smov %s12559_s0 }
 0x778   : > { %s15696_s14 = smov %s15681_s22  ;;  %s15697_s15 = smov %s12014_s16 }
 0x779   : > { %s15698_s16 = smov %s12508_s6  ;;  %37 = sbr.rel (!%p15251_p4) target bundleno = 34 (0x22), region = 221 }
 0x77a   : > { %s15699_s22 = smov %s15687_s4 }
 0x780   :  { %8738 = vsyncpa [#allocation7], 1 }
 0x781   :  { %8740 = vsyncpa [#allocation7 + $0x1], 1 }
 0x782   :  { %8741 = vsyncpa [#allocation10], 1 }
 0x783   :  { %8743 = vsyncpa [#allocation10 + $0x1], 1 }
 0x784   :  { %8744 = vsyncpa [#allocation13], 1 }
 0x785   :  { %8746 = vsyncpa [#allocation13 + $0x1], 1 }
 0x786   :  { %8747 = vsyncpa [#allocation16], 1 }
 0x787   :  { %8749 = vsyncpa [#allocation16 + $0x1], 1 }
 0x788   :  { %8750 = vsyncpa [#allocation8], 1 }
 0x789   :  { %8752 = vsyncpa [#allocation8 + $0x1], 1 }

</bundles_post_ra>
